<compile_context>
chip_gen: v7x
topology: tpu7x:2x2x1
jax: 0.10.0
libtpu: 0.0.40
codegen_flags: <defaults>
</compile_context>

<pallas_src>
import functools

import jax
import jax.numpy as jnp
from jax.experimental import pallas as pl
from jax.experimental.pallas import tpu as pltpu


def _round_up(x, m):
    return ((x + m - 1) // m) * m


def _pad_to(x, shape):
    if tuple(x.shape) == tuple(shape):
        return x
    pads = [(0, s - d) for d, s in zip(x.shape, shape)]
    return jnp.pad(x, pads)


def _vmem_capacity_bytes():
    try:
        info = pltpu.get_tpu_info()
        cap = getattr(info, "vmem_capacity_bytes", None)
        if cap:
            return int(cap)
    except Exception:
        pass
    return 64 * 1024 * 1024  # conservative default (v7x per-TC VMEM)


# ---------------------------------------------------------------------------
# Fused kernel: attention MLP -> softmax -> pooled values -> transform ->
# candidate logits.  One grid step processes a block of Bb batch rows.
# ---------------------------------------------------------------------------
def _fused_kernel(cc_ref, out_ref, val_ref, cand_ref,
                  u_ref, w_ref, v_ref, tmt_ref, tmb_ref, o_ref, *, t_valid):
    # cc_ref  : (Bb, FCp)       context codes                (bf16)
    # out_ref : (Bb, T8, FOp)   encoder per-step outputs     (bf16, zero-pad T)
    # val_ref : (Bb, T8, Dp)    length-masked embedded input (bf16)
    # cand_ref: (Bb, Cin, CCp)  candidate codes              (bf16, Cin = rnd16)
    # u_ref   : (FCp, Hp) bf16   w_ref: (FOp, Hp) bf16   v_ref: (1, Hp) f32
    # tmt_ref : (FCp, CCp) bf16  tmb_ref: (Dp, CCp) bf16  (transform row-split)
    # o_ref   : (Bb, Cout) f32 logits (bias added in wrapper)
    Bb, T8, FOp = out_ref.shape
    Hp = u_ref.shape[1]
    Cin = cand_ref.shape[1]
    Cout = o_ref.shape[1]
    f32 = jnp.float32
    bf16 = jnp.bfloat16

    cc = cc_ref[...]                                    # (Bb, FCp)    bf16
    out3 = out_ref[...]                                 # (Bb, T8, FOp) bf16
    vals = val_ref[...]                                 # (Bb, T8, Dp) bf16
    cand = cand_ref[...]                                # (Bb, Cin, CCp) bf16

    # --- attention MLP: h = tanh(out @ W + cc @ U); scores = h . v ---------
    cu = jnp.dot(cc, u_ref[...], preferred_element_type=f32)            # (Bb, Hp)
    ow = jnp.dot(out3.reshape(Bb * T8, FOp), w_ref[...],
                 preferred_element_type=f32)                            # (Bb*T8, Hp)
    h3 = jnp.tanh(ow.reshape(Bb, T8, Hp) + cu[:, None, :])              # f32
    # lane-dense scores (Bb, T8): VPU mul + XLU lane reduce (free vs MXU slot)
    scores = jnp.sum(h3 * v_ref[...].reshape(1, 1, Hp), axis=-1)        # (Bb, T8) f32

    # --- softmax over time (lane axis); only the T->T8 zero padding masked --
    t_idx = jax.lax.broadcasted_iota(jnp.int32, (Bb, T8), 1)
    scores = jnp.where(t_idx < t_valid, scores, -1e30)                  # f32-safe fill
    scores = scores - jnp.max(scores, axis=-1, keepdims=True)
    ex = jnp.exp(scores)
    e = ex / jnp.sum(ex, axis=-1, keepdims=True)                        # (Bb, T8) f32

    # --- attention-pooled values: batched MXU matvec (Bb,1,T8)@(Bb,T8,Dp) ---
    pooled = jax.lax.dot_general(
        e.astype(bf16)[:, None, :], vals,
        (((2,), (1,)), ((0,), (0,))),
        preferred_element_type=f32)[:, 0, :]                            # (Bb, Dp) f32

    # --- ct = concat([cc, pooled]) @ transform_mat via pre-split row blocks -
    ct = (jnp.dot(cc, tmt_ref[...], preferred_element_type=f32)
          + jnp.dot(pooled.astype(bf16), tmb_ref[...],
                    preferred_element_type=f32))                        # (Bb, CCp) f32

    # --- candidate logits: batched MXU matmul (Bb,Cin,CCp) @ (Bb,CCp,1) -----
    logits = jax.lax.dot_general(
        cand, ct.astype(bf16)[:, :, None],
        (((2,), (1,)), ((0,), (0,))),
        preferred_element_type=f32)[..., 0]                             # (Bb, Cin) f32

    if Cout > Cin:
        # pad candidates to the 128-lane output in-register -> unmasked vst
        logits = jnp.concatenate(
            [logits, jnp.zeros((Bb, Cout - Cin), f32)], axis=-1)
    o_ref[...] = logits


# ---------------------------------------------------------------------------
# Weight preparation (do once, reuse across calls): pad + bf16-cast.
# ---------------------------------------------------------------------------
def prepare_attention_weights(u, w, v, transform_mat, value_dim):
    FC, H = u.shape
    FO = w.shape[0]
    D = value_dim
    CC = transform_mat.shape[1]
    FCp, FOp, Dp, Hp, CCp = (_round_up(x, 128) for x in (FC, FO, D, H, CC))
    bf = jnp.bfloat16
    return {
        "u": _pad_to(u.astype(bf), (FCp, Hp)),
        "w": _pad_to(w.astype(bf), (FOp, Hp)),
        # v stays f32: it feeds a VPU multiply (keep elementwise math f32, v5e)
        "v": _pad_to(v.reshape(1, H).astype(jnp.float32), (1, Hp)),
        "tm_top": _pad_to(transform_mat[:FC].astype(bf), (FCp, CCp)),
        "tm_bot": _pad_to(transform_mat[FC:FC + D].astype(bf), (Dp, CCp)),
    }


# ---------------------------------------------------------------------------
# Fused attention-MLP + transform + candidate-logits pallas_call wrapper.
# ---------------------------------------------------------------------------
def fused_attention_logits_pallas(context_code, context_output, values, lengths,
                                  transform_bias, candidates_code, weights):
    B, FC = context_code.shape
    _, T, FO = context_output.shape
    D = values.shape[-1]
    C = candidates_code.shape[1]
    CC = candidates_code.shape[2]

    FCp, Hp = weights["u"].shape
    FOp = weights["w"].shape[0]
    Dp = weights["tm_bot"].shape[0]
    CCp = weights["tm_top"].shape[1]

    T8 = _round_up(T, 8)            # time padding (sublane axis of 3-D blocks)
    Cin = _round_up(C, 16)          # HBM candidate padding: sublane only
    Cout = _round_up(max(C, 128), 128)   # lane-dense output store

    # --- VMEM-budgeted batch block size (generation-aware) ------------------
    vmem_cap = _vmem_capacity_bytes()
    budget = min(vmem_cap // 3, 24 * 1024 * 1024)
    vmem_limit = int(min(vmem_cap * 3 // 4, 64 * 1024 * 1024))

    # double-buffered per-row block bytes (bf16 inputs) + f32 output rows
    row_bytes = 2 * 2 * (FCp + T8 * (FOp + Dp) + Cin * CCp) + 2 * 4 * Cout
    weight_bytes = 2 * sum(int(wt.size) * wt.dtype.itemsize
                           for wt in weights.values())   # worst case 2x-buffered
    avail = max(budget - weight_bytes, 8 * row_bytes)

    Bb = max(8, min(128, (avail // row_bytes) // 8 * 8))
    # fill the 256-wide MXU (v6e/v7x) on the dominant out@W matmul if budget allows
    if Bb * T8 < 256:
        want = _round_up(pl.cdiv(256, T8), 8)
        if want * row_bytes <= avail:
            Bb = max(Bb, min(want, 128))
    Bb = min(Bb, _round_up(B, 8))
    Bp = _round_up(B, Bb)
    # >= 2 grid steps so the "parallel" axis can shard across v7x's 2 TensorCores
    if Bp // Bb < 2 and Bp >= 16:
        Bb = _round_up(Bp // 2, 8)
        Bp = _round_up(B, Bb)

    # --- activation prep: length-mask folded into the bf16 cast -------------
    bf = jnp.bfloat16
    tmask = (jnp.arange(T)[None, :] < lengths.reshape(B, 1)).astype(values.dtype)
    values_m = values * tmask[:, :, None]

    cc_p = _pad_to(context_code.astype(bf), (Bp, FCp))
    out_p = _pad_to(context_output.astype(bf), (Bp, T8, FOp))
    val_p = _pad_to(values_m.astype(bf), (Bp, T8, Dp))
    cand_p = _pad_to(candidates_code.astype(bf), (Bp, Cin, CCp))

    kern = functools.partial(_fused_kernel, t_valid=T)

    def build_call(weight_kwargs):
        def wspec(shape):
            return pl.BlockSpec(shape, lambda *_: (0,) * len(shape),
                                **weight_kwargs)
        return pl.pallas_call(
            kern,
            out_shape=jax.ShapeDtypeStruct((Bp, Cout), jnp.float32),
            grid=(Bp // Bb,),
            in_specs=[
                pl.BlockSpec((Bb, FCp), lambda b: (b, 0)),
                pl.BlockSpec((Bb, T8, FOp), lambda b: (b, 0, 0)),
                pl.BlockSpec((Bb, T8, Dp), lambda b: (b, 0, 0)),
                pl.BlockSpec((Bb, Cin, CCp), lambda b: (b, 0, 0)),
                wspec((FCp, Hp)),
                wspec((FOp, Hp)),
                wspec((1, Hp)),
                wspec((FCp, CCp)),
                wspec((Dp, CCp)),
            ],
            out_specs=pl.BlockSpec((Bb, Cout), lambda b: (b, 0)),
            compiler_params=pltpu.CompilerParams(
                dimension_semantics=("parallel",),
                vmem_limit_bytes=vmem_limit),
        )(cc_p, out_p, val_p, cand_p,
          weights["u"], weights["w"], weights["v"],
          weights["tm_top"], weights["tm_bot"])

    try:
        # constant (grid-invariant) weights: single-buffered to reclaim VMEM
        out = build_call(dict(pipeline_mode=pl.Buffered(1)))
    except Exception:
        # TODO(synk): this JAX build rejects pipeline_mode=pl.Buffered(1);
        # fall back to default double-buffered weight operands.
        out = build_call({})

    # slice off batch/candidate padding; scalar bias added here (matches the
    # reference, which adds transform_bias to the final logits).
    return out[:B, :C] + transform_bias.reshape(())


# ---------------------------------------------------------------------------
# Plain-JAX glue: embedding lookup + substituted sequence encoders.
# ---------------------------------------------------------------------------
def _masked_mean_pool(emb, lengths):
    T = emb.shape[-2]
    mask = (jnp.arange(T)[None, :] < lengths.reshape(-1, 1)).astype(emb.dtype)
    mask = mask.reshape(lengths.shape + (T, 1))
    denom = jnp.maximum(lengths.astype(emb.dtype), 1.0)[..., None]
    return jnp.sum(emb * mask, axis=-2) / denom


def retrival_attention_triple_forward(params, context_text_ids, context_length,
                                      candidates_text_ids, candidates_length,
                                      prepared_weights=None):
    emb_table = params["embedding"]

    # --- code_context --------------------------------------------------------
    ctx_emb = jnp.take(emb_table, context_text_ids, axis=0)                 # (B, T, D)
    # TODO(synk): RNN context_encoder substituted with mean-pool + linear.
    pooled = _masked_mean_pool(ctx_emb, context_length)                     # (B, D)
    context_code = jnp.tanh(pooled @ params["enc_ctx_code"])                # (B, FC)
    context_output = jnp.tanh(ctx_emb @ params["enc_ctx_out"])              # (B, T, FO)

    # --- candidates encoder ---------------------------------------------------
    cand_emb = jnp.take(emb_table, candidates_text_ids, axis=0)             # (B, C, Tc, D)
    # TODO(synk): RNN candidates_encoder substituted with mean-pool + linear.
    cand_pooled = _masked_mean_pool(cand_emb, candidates_length)            # (B, C, D)
    candidates_code = jnp.tanh(cand_pooled @ params["enc_cand_code"])       # (B, C, CC)

    # --- fused attention MLP + transform + logits (single Pallas kernel) -----
    if prepared_weights is None:
        prepared_weights = prepare_attention_weights(
            params["attn_u"], params["attn_w"], params["attn_v"],
            params["transform_mat"], value_dim=emb_table.shape[1])
    logits = fused_attention_logits_pallas(
        context_code, context_output, ctx_emb, context_length,
        params["transform_bias"], candidates_code, prepared_weights)        # (B, C)
    return logits


# ---------------------------------------------------------------------------
# Deterministic parameter init (truncnorm(-2, 2), matching truncnorm_mat_params)
# ---------------------------------------------------------------------------
def init_params(key, vocab_size, D, FC, FO, H, CC):
    ks = jax.random.split(key, 8)

    def tn(k, shape):
        return jax.random.truncated_normal(k, -2.0, 2.0, shape, dtype=jnp.float32)

    embedding = tn(ks[0], (vocab_size + 4, D))
    embedding = embedding.at[0].set(0.0)                     # padding_idx = 0

    params = {
        "embedding": embedding,
        "attn_w": tn(ks[1], (FO, H)),                        # (flatten_output_size, hidden)
        "attn_u": tn(ks[2], (FC, H)),                        # (flatten_code_size, hidden)
        "attn_v": tn(ks[3], (1, 1, H)),                      # (1, 1, hidden)
        "transform_mat": tn(ks[4], (FC + D, CC)),            # attention output_size = D
        "transform_bias": tn(ks[5], (1,)),
        # substituted encoder weights (see TODO(synk) above)
        "enc_ctx_code": tn(ks[6], (D, FC)),
        "enc_ctx_out": tn(ks[7], (D, FO)),
        "enc_cand_code": tn(jax.random.fold_in(key, 99), (D, CC)),
    }
    return params


if __name__ == "__main__":
    key = jax.random.PRNGKey(0)

    # small shapes (T deliberately not a multiple of 8 to exercise padding)
    B, T, C, Tc = 2, 10, 4, 8
    vocab, D = 50, 16
    FC, FO, H, CC = 32, 32, 32, 32

    params = init_params(key, vocab, D, FC, FO, H, CC)

    # prepare padded bf16 weights ONCE and reuse (keeps per-call HBM traffic low)
    prepared = prepare_attention_weights(
        params["attn_u"], params["attn_w"], params["attn_v"],
        params["transform_mat"], value_dim=D)

    k1, k2 = jax.random.split(jax.random.fold_in(key, 1))
    context_text_ids = jax.random.randint(k1, (B, T), 1, vocab + 4, dtype=jnp.int32)
    context_length = jnp.array([10, 6], dtype=jnp.int32)
    candidates_text_ids = jax.random.randint(k2, (B, C, Tc), 1, vocab + 4, dtype=jnp.int32)
    candidates_length = jnp.array([[8, 6, 7, 4], [5, 8, 3, 6]], dtype=jnp.int32)

    logits = retrival_attention_triple_forward(
        params, context_text_ids, context_length,
        candidates_text_ids, candidates_length, prepared_weights=prepared)
    logits = jax.block_until_ready(logits)

    assert logits.shape == (B, C)
    assert jnp.all(jnp.isfinite(logits))
    print("KERNEL_OK")
</pallas_src>

<mosaic_0001>
module attributes {stable_mosaic.version = 11 : i64} {
  func.func @_fused_kernel(%arg0: i32, %arg1: memref<8x128xbf16, #tpu.memory_space<vmem>>, %arg2: memref<8x16x128xbf16, #tpu.memory_space<vmem>>, %arg3: memref<8x16x128xbf16, #tpu.memory_space<vmem>>, %arg4: memref<8x16x128xbf16, #tpu.memory_space<vmem>>, %arg5: memref<128x128xbf16, #tpu.memory_space<vmem>>, %arg6: memref<128x128xbf16, #tpu.memory_space<vmem>>, %arg7: memref<1x128xf32, #tpu.memory_space<vmem>>, %arg8: memref<128x128xbf16, #tpu.memory_space<vmem>>, %arg9: memref<128x128xbf16, #tpu.memory_space<vmem>>, %arg10: memref<8x128xf32, #tpu.memory_space<vmem>>) attributes {dimension_semantics = [#tpu.dimension_semantics<parallel>], iteration_bounds = array<i64: 1>, scalar_prefetch = 0 : i64, scratch_operands = 0 : i64, tpu.core_type = #tpu.core_type<tc>, window_params = [{transform_indices = @transform_0, window_bounds = array<i64: 8, 128>}, {transform_indices = @transform_1, window_bounds = array<i64: 8, 16, 128>}, {transform_indices = @transform_2, window_bounds = array<i64: 8, 16, 128>}, {transform_indices = @transform_3, window_bounds = array<i64: 8, 16, 128>}, {pipeline_mode = #tpu.pipeline_mode<synchronous>, transform_indices = @transform_4, window_bounds = array<i64: 128, 128>}, {pipeline_mode = #tpu.pipeline_mode<synchronous>, transform_indices = @transform_5, window_bounds = array<i64: 128, 128>}, {pipeline_mode = #tpu.pipeline_mode<synchronous>, transform_indices = @transform_6, window_bounds = array<i64: 1, 128>}, {pipeline_mode = #tpu.pipeline_mode<synchronous>, transform_indices = @transform_7, window_bounds = array<i64: 128, 128>}, {pipeline_mode = #tpu.pipeline_mode<synchronous>, transform_indices = @transform_8, window_bounds = array<i64: 128, 128>}, {transform_indices = @transform_9, window_bounds = array<i64: 8, 128>}]} {
    %c0 = arith.constant 0 : index
    %c0_0 = arith.constant 0 : index
    %0 = vector.load %arg1[%c0, %c0_0] : memref<8x128xbf16, #tpu.memory_space<vmem>>, vector<8x128xbf16>
    %c0_1 = arith.constant 0 : index
    %c0_2 = arith.constant 0 : index
    %c0_3 = arith.constant 0 : index
    %1 = vector.load %arg2[%c0_1, %c0_2, %c0_3] : memref<8x16x128xbf16, #tpu.memory_space<vmem>>, vector<8x16x128xbf16>
    %c0_4 = arith.constant 0 : index
    %c0_5 = arith.constant 0 : index
    %c0_6 = arith.constant 0 : index
    %2 = vector.load %arg3[%c0_4, %c0_5, %c0_6] : memref<8x16x128xbf16, #tpu.memory_space<vmem>>, vector<8x16x128xbf16>
    %c0_7 = arith.constant 0 : index
    %c0_8 = arith.constant 0 : index
    %c0_9 = arith.constant 0 : index
    %3 = vector.load %arg4[%c0_7, %c0_8, %c0_9] : memref<8x16x128xbf16, #tpu.memory_space<vmem>>, vector<8x16x128xbf16>
    %c0_10 = arith.constant 0 : index
    %c0_11 = arith.constant 0 : index
    %4 = vector.load %arg5[%c0_10, %c0_11] : memref<128x128xbf16, #tpu.memory_space<vmem>>, vector<128x128xbf16>
    %cst = arith.constant dense<0.000000e+00> : vector<8x128xf32>
    %5 = tpu.matmul %0, %4, %cst {dimension_numbers = #tpu.dot_dimension_numbers<[1], [0], [0], [1], [0, 0, 1, 1], [], []>} : vector<8x128xbf16>, vector<128x128xbf16>, vector<8x128xf32> -> vector<8x128xf32>
    %6 = vector.shape_cast %1 : vector<8x16x128xbf16> to vector<128x128xbf16>
    %c0_12 = arith.constant 0 : index
    %c0_13 = arith.constant 0 : index
    %7 = vector.load %arg6[%c0_12, %c0_13] : memref<128x128xbf16, #tpu.memory_space<vmem>>, vector<128x128xbf16>
    %cst_14 = arith.constant dense<0.000000e+00> : vector<128x128xf32>
    %8 = tpu.matmul %6, %7, %cst_14 {dimension_numbers = #tpu.dot_dimension_numbers<[1], [0], [0], [1], [0, 0, 1, 1], [], []>} : vector<128x128xbf16>, vector<128x128xbf16>, vector<128x128xf32> -> vector<128x128xf32>
    %9 = vector.shape_cast %8 : vector<128x128xf32> to vector<8x16x128xf32>
    %10 = vector.shape_cast %5 : vector<8x128xf32> to vector<8x1x128xf32>
    %11 = vector.broadcast %10 : vector<8x1x128xf32> to vector<8x16x128xf32>
    %12 = arith.addf %9, %11 : vector<8x16x128xf32>
    %13 = math.tanh %12 : vector<8x16x128xf32>
    %c0_15 = arith.constant 0 : index
    %c0_16 = arith.constant 0 : index
    %14 = vector.load %arg7[%c0_15, %c0_16] : memref<1x128xf32, #tpu.memory_space<vmem>>, vector<1x128xf32>
    %15 = vector.shape_cast %14 : vector<1x128xf32> to vector<1x1x128xf32>
    %16 = vector.broadcast %15 : vector<1x1x128xf32> to vector<8x16x128xf32>
    %17 = arith.mulf %13, %16 : vector<8x16x128xf32>
    %cst_17 = arith.constant dense<0.000000e+00> : vector<8x16xf32>
    %18 = vector.multi_reduction <add>, %17, %cst_17 [2] : vector<8x16x128xf32> to vector<8x16xf32>
    %19 = tpu.iota {dimensions = array<i32: 1>} : vector<8x16xi32>
    %c10_i32 = arith.constant 10 : i32
    %20 = vector.broadcast %c10_i32 : i32 to vector<8x16xi32>
    %21 = arith.cmpi slt, %19, %20 : vector<8x16xi32>
    %cst_18 = arith.constant -1.000000e+30 : f32
    %22 = vector.broadcast %cst_18 : f32 to vector<8x16xf32>
    %23 = arith.select %21, %18, %22 : vector<8x16xi1>, vector<8x16xf32>
    %cst_19 = arith.constant dense<0xFF800000> : vector<8xf32>
    %24 = vector.multi_reduction <maximumf>, %23, %cst_19 [1] : vector<8x16xf32> to vector<8xf32>
    %25 = vector.shape_cast %24 : vector<8xf32> to vector<8x1xf32>
    %26 = vector.broadcast %25 : vector<8x1xf32> to vector<8x16xf32>
    %27 = arith.subf %23, %26 : vector<8x16xf32>
    %28 = math.exp %27 : vector<8x16xf32>
    %cst_20 = arith.constant dense<0.000000e+00> : vector<8xf32>
    %29 = vector.multi_reduction <add>, %28, %cst_20 [1] : vector<8x16xf32> to vector<8xf32>
    %30 = vector.shape_cast %29 : vector<8xf32> to vector<8x1xf32>
    %31 = vector.broadcast %30 : vector<8x1xf32> to vector<8x16xf32>
    %32 = arith.divf %28, %31 : vector<8x16xf32>
    %33 = arith.truncf %32 : vector<8x16xf32> to vector<8x16xbf16>
    %34 = vector.shape_cast %33 : vector<8x16xbf16> to vector<8x1x16xbf16>
    %cst_21 = arith.constant dense<0.000000e+00> : vector<8x1x128xf32>
    %35 = tpu.matmul %34, %2, %cst_21 {dimension_numbers = #tpu.dot_dimension_numbers<[2], [1], [1], [2], [0, 0, 0, 1, 1, 2], [0], [0]>} : vector<8x1x16xbf16>, vector<8x16x128xbf16>, vector<8x1x128xf32> -> vector<8x1x128xf32>
    %36 = vector.shape_cast %35 : vector<8x1x128xf32> to vector<8x128xf32>
    %c0_22 = arith.constant 0 : index
    %c0_23 = arith.constant 0 : index
    %37 = vector.load %arg8[%c0_22, %c0_23] : memref<128x128xbf16, #tpu.memory_space<vmem>>, vector<128x128xbf16>
    %cst_24 = arith.constant dense<0.000000e+00> : vector<8x128xf32>
    %38 = tpu.matmul %0, %37, %cst_24 {dimension_numbers = #tpu.dot_dimension_numbers<[1], [0], [0], [1], [0, 0, 1, 1], [], []>} : vector<8x128xbf16>, vector<128x128xbf16>, vector<8x128xf32> -> vector<8x128xf32>
    %39 = arith.truncf %36 : vector<8x128xf32> to vector<8x128xbf16>
    %c0_25 = arith.constant 0 : index
    %c0_26 = arith.constant 0 : index
    %40 = vector.load %arg9[%c0_25, %c0_26] : memref<128x128xbf16, #tpu.memory_space<vmem>>, vector<128x128xbf16>
    %cst_27 = arith.constant dense<0.000000e+00> : vector<8x128xf32>
    %41 = tpu.matmul %39, %40, %cst_27 {dimension_numbers = #tpu.dot_dimension_numbers<[1], [0], [0], [1], [0, 0, 1, 1], [], []>} : vector<8x128xbf16>, vector<128x128xbf16>, vector<8x128xf32> -> vector<8x128xf32>
    %42 = arith.addf %38, %41 : vector<8x128xf32>
    %43 = arith.truncf %42 : vector<8x128xf32> to vector<8x128xbf16>
    %44 = vector.shape_cast %43 : vector<8x128xbf16> to vector<8x128x1xbf16>
    %cst_28 = arith.constant dense<0.000000e+00> : vector<8x16x1xf32>
    %45 = tpu.matmul %3, %44, %cst_28 {dimension_numbers = #tpu.dot_dimension_numbers<[2], [1], [1], [2], [0, 0, 0, 1, 1, 2], [0], [0]>} : vector<8x16x128xbf16>, vector<8x128x1xbf16>, vector<8x16x1xf32> -> vector<8x16x1xf32>
    %46 = vector.shape_cast %45 : vector<8x16x1xf32> to vector<8x16xf32>
    %cst_29 = arith.constant 0.000000e+00 : f32
    %47 = vector.broadcast %cst_29 : f32 to vector<8x112xf32>
    %48 = tpu.concatenate %46, %47 in 1 : vector<8x16xf32>, vector<8x112xf32> -> vector<8x128xf32>
    %c0_30 = arith.constant 0 : index
    %c0_31 = arith.constant 0 : index
    %49 = vector.load %arg10[%c0_30, %c0_31] : memref<8x128xf32, #tpu.memory_space<vmem>>, vector<8x128xf32>
    tpu.vector_store %arg10[%c0_30, %c0_31], %48 {strides = array<i32>} : memref<8x128xf32, #tpu.memory_space<vmem>>, vector<8x128xf32>,
    return
  }
  func.func @transform_0(%arg0: i32) -> (i32, i32) {
    %c0_i32 = arith.constant 0 : i32
    %c0_i32_0 = arith.constant 0 : i32
    return %arg0, %c0_i32 : i32, i32
  }
  func.func @transform_1(%arg0: i32) -> (i32, i32, i32) {
    %c0_i32 = arith.constant 0 : i32
    %c0_i32_0 = arith.constant 0 : i32
    %c0_i32_1 = arith.constant 0 : i32
    return %arg0, %c0_i32, %c0_i32_0 : i32, i32, i32
  }
  func.func @transform_2(%arg0: i32) -> (i32, i32, i32) {
    %c0_i32 = arith.constant 0 : i32
    %c0_i32_0 = arith.constant 0 : i32
    %c0_i32_1 = arith.constant 0 : i32
    return %arg0, %c0_i32, %c0_i32_0 : i32, i32, i32
  }
  func.func @transform_3(%arg0: i32) -> (i32, i32, i32) {
    %c0_i32 = arith.constant 0 : i32
    %c0_i32_0 = arith.constant 0 : i32
    %c0_i32_1 = arith.constant 0 : i32
    return %arg0, %c0_i32, %c0_i32_0 : i32, i32, i32
  }
  func.func @transform_4(%arg0: i32) -> (i32, i32) {
    %c0_i32 = arith.constant 0 : i32
    %c0_i32_0 = arith.constant 0 : i32
    %c0_i32_1 = arith.constant 0 : i32
    return %c0_i32, %c0_i32_0 : i32, i32
  }
  func.func @transform_5(%arg0: i32) -> (i32, i32) {
    %c0_i32 = arith.constant 0 : i32
    %c0_i32_0 = arith.constant 0 : i32
    %c0_i32_1 = arith.constant 0 : i32
    return %c0_i32, %c0_i32_0 : i32, i32
  }
  func.func @transform_6(%arg0: i32) -> (i32, i32) {
    %c0_i32 = arith.constant 0 : i32
    %c0_i32_0 = arith.constant 0 : i32
    %c0_i32_1 = arith.constant 0 : i32
    return %c0_i32, %c0_i32_0 : i32, i32
  }
  func.func @transform_7(%arg0: i32) -> (i32, i32) {
    %c0_i32 = arith.constant 0 : i32
    %c0_i32_0 = arith.constant 0 : i32
    %c0_i32_1 = arith.constant 0 : i32
    return %c0_i32, %c0_i32_0 : i32, i32
  }
  func.func @transform_8(%arg0: i32) -> (i32, i32) {
    %c0_i32 = arith.constant 0 : i32
    %c0_i32_0 = arith.constant 0 : i32
    %c0_i32_1 = arith.constant 0 : i32
    return %c0_i32, %c0_i32_0 : i32, i32
  }
  func.func @transform_9(%arg0: i32) -> (i32, i32) {
    %c0_i32 = arith.constant 0 : i32
    %c0_i32_0 = arith.constant 0 : i32
    return %arg0, %c0_i32 : i32, i32
  }
}

module attributes {stable_mosaic.version = 11 : i64} {
  func.func @_fused_kernel(%arg0: i32, %arg1: memref<8x128xbf16, #tpu.memory_space<vmem>>, %arg2: memref<8x16x128xbf16, #tpu.memory_space<vmem>>, %arg3: memref<8x16x128xbf16, #tpu.memory_space<vmem>>, %arg4: memref<8x16x128xbf16, #tpu.memory_space<vmem>>, %arg5: memref<128x128xbf16, #tpu.memory_space<vmem>>, %arg6: memref<128x128xbf16, #tpu.memory_space<vmem>>, %arg7: memref<1x128xf32, #tpu.memory_space<vmem>>, %arg8: memref<128x128xbf16, #tpu.memory_space<vmem>>, %arg9: memref<128x128xbf16, #tpu.memory_space<vmem>>, %arg10: memref<8x128xf32, #tpu.memory_space<vmem>>) attributes {dimension_semantics = [#tpu.dimension_semantics<parallel>], iteration_bounds = array<i64: 1>, scalar_prefetch = 0 : i64, scratch_operands = 0 : i64, tpu.core_type = #tpu.core_type<tc>, window_params = [{transform_indices = @transform_0, window_bounds = array<i64: 8, 128>}, {transform_indices = @transform_1, window_bounds = array<i64: 8, 16, 128>}, {transform_indices = @transform_2, window_bounds = array<i64: 8, 16, 128>}, {transform_indices = @transform_3, window_bounds = array<i64: 8, 16, 128>}, {pipeline_mode = #tpu.pipeline_mode<synchronous>, transform_indices = @transform_4, window_bounds = array<i64: 128, 128>}, {pipeline_mode = #tpu.pipeline_mode<synchronous>, transform_indices = @transform_5, window_bounds = array<i64: 128, 128>}, {pipeline_mode = #tpu.pipeline_mode<synchronous>, transform_indices = @transform_6, window_bounds = array<i64: 1, 128>}, {pipeline_mode = #tpu.pipeline_mode<synchronous>, transform_indices = @transform_7, window_bounds = array<i64: 128, 128>}, {pipeline_mode = #tpu.pipeline_mode<synchronous>, transform_indices = @transform_8, window_bounds = array<i64: 128, 128>}, {transform_indices = @transform_9, window_bounds = array<i64: 8, 128>}]} {
    %c0 = arith.constant 0 : index
    %c0_0 = arith.constant 0 : index
    %0 = vector.load %arg1[%c0, %c0_0] : memref<8x128xbf16, #tpu.memory_space<vmem>>, vector<8x128xbf16>
    %c0_1 = arith.constant 0 : index
    %c0_2 = arith.constant 0 : index
    %c0_3 = arith.constant 0 : index
    %1 = vector.load %arg2[%c0_1, %c0_2, %c0_3] : memref<8x16x128xbf16, #tpu.memory_space<vmem>>, vector<8x16x128xbf16>
    %c0_4 = arith.constant 0 : index
    %c0_5 = arith.constant 0 : index
    %c0_6 = arith.constant 0 : index
    %2 = vector.load %arg3[%c0_4, %c0_5, %c0_6] : memref<8x16x128xbf16, #tpu.memory_space<vmem>>, vector<8x16x128xbf16>
    %c0_7 = arith.constant 0 : index
    %c0_8 = arith.constant 0 : index
    %c0_9 = arith.constant 0 : index
    %3 = vector.load %arg4[%c0_7, %c0_8, %c0_9] : memref<8x16x128xbf16, #tpu.memory_space<vmem>>, vector<8x16x128xbf16>
    %c0_10 = arith.constant 0 : index
    %c0_11 = arith.constant 0 : index
    %4 = vector.load %arg5[%c0_10, %c0_11] : memref<128x128xbf16, #tpu.memory_space<vmem>>, vector<128x128xbf16>
    %cst = arith.constant dense<0.000000e+00> : vector<8x128xf32>
    %5 = tpu.matmul %0, %4, %cst {dimension_numbers = #tpu.dot_dimension_numbers<[1], [0], [0], [1], [0, 0, 1, 1], [], []>} : vector<8x128xbf16>, vector<128x128xbf16>, vector<8x128xf32> -> vector<8x128xf32>
    %6 = vector.shape_cast %1 : vector<8x16x128xbf16> to vector<128x128xbf16>
    %c0_12 = arith.constant 0 : index
    %c0_13 = arith.constant 0 : index
    %7 = vector.load %arg6[%c0_12, %c0_13] : memref<128x128xbf16, #tpu.memory_space<vmem>>, vector<128x128xbf16>
    %cst_14 = arith.constant dense<0.000000e+00> : vector<128x128xf32>
    %8 = tpu.matmul %6, %7, %cst_14 {dimension_numbers = #tpu.dot_dimension_numbers<[1], [0], [0], [1], [0, 0, 1, 1], [], []>} : vector<128x128xbf16>, vector<128x128xbf16>, vector<128x128xf32> -> vector<128x128xf32>
    %9 = vector.shape_cast %8 : vector<128x128xf32> to vector<8x16x128xf32>
    %10 = vector.shape_cast %5 : vector<8x128xf32> to vector<8x1x128xf32>
    %11 = vector.broadcast %10 : vector<8x1x128xf32> to vector<8x16x128xf32>
    %12 = arith.addf %9, %11 : vector<8x16x128xf32>
    %13 = math.tanh %12 : vector<8x16x128xf32>
    %c0_15 = arith.constant 0 : index
    %c0_16 = arith.constant 0 : index
    %14 = vector.load %arg7[%c0_15, %c0_16] : memref<1x128xf32, #tpu.memory_space<vmem>>, vector<1x128xf32>
    %15 = vector.shape_cast %14 : vector<1x128xf32> to vector<1x1x128xf32>
    %16 = vector.broadcast %15 : vector<1x1x128xf32> to vector<8x16x128xf32>
    %17 = arith.mulf %13, %16 : vector<8x16x128xf32>
    %cst_17 = arith.constant dense<0.000000e+00> : vector<8x16xf32>
    %18 = vector.multi_reduction <add>, %17, %cst_17 [2] : vector<8x16x128xf32> to vector<8x16xf32>
    %19 = tpu.iota {dimensions = array<i32: 1>} : vector<8x16xi32>
    %c10_i32 = arith.constant 10 : i32
    %20 = vector.broadcast %c10_i32 : i32 to vector<8x16xi32>
    %21 = arith.cmpi slt, %19, %20 : vector<8x16xi32>
    %cst_18 = arith.constant -1.000000e+30 : f32
    %22 = vector.broadcast %cst_18 : f32 to vector<8x16xf32>
    %23 = arith.select %21, %18, %22 : vector<8x16xi1>, vector<8x16xf32>
    %cst_19 = arith.constant dense<0xFF800000> : vector<8xf32>
    %24 = vector.multi_reduction <maximumf>, %23, %cst_19 [1] : vector<8x16xf32> to vector<8xf32>
    %25 = vector.shape_cast %24 : vector<8xf32> to vector<8x1xf32>
    %26 = vector.broadcast %25 : vector<8x1xf32> to vector<8x16xf32>
    %27 = arith.subf %23, %26 : vector<8x16xf32>
    %28 = math.exp %27 : vector<8x16xf32>
    %cst_20 = arith.constant dense<0.000000e+00> : vector<8xf32>
    %29 = vector.multi_reduction <add>, %28, %cst_20 [1] : vector<8x16xf32> to vector<8xf32>
    %30 = vector.shape_cast %29 : vector<8xf32> to vector<8x1xf32>
    %31 = vector.broadcast %30 : vector<8x1xf32> to vector<8x16xf32>
    %32 = arith.divf %28, %31 : vector<8x16xf32>
    %33 = arith.truncf %32 : vector<8x16xf32> to vector<8x16xbf16>
    %34 = vector.shape_cast %33 : vector<8x16xbf16> to vector<8x1x16xbf16>
    %cst_21 = arith.constant dense<0.000000e+00> : vector<8x1x128xf32>
    %35 = tpu.matmul %34, %2, %cst_21 {dimension_numbers = #tpu.dot_dimension_numbers<[2], [1], [1], [2], [0, 0, 0, 1, 1, 2], [0], [0]>} : vector<8x1x16xbf16>, vector<8x16x128xbf16>, vector<8x1x128xf32> -> vector<8x1x128xf32>
    %36 = vector.shape_cast %35 : vector<8x1x128xf32> to vector<8x128xf32>
    %c0_22 = arith.constant 0 : index
    %c0_23 = arith.constant 0 : index
    %37 = vector.load %arg8[%c0_22, %c0_23] : memref<128x128xbf16, #tpu.memory_space<vmem>>, vector<128x128xbf16>
    %cst_24 = arith.constant dense<0.000000e+00> : vector<8x128xf32>
    %38 = tpu.matmul %0, %37, %cst_24 {dimension_numbers = #tpu.dot_dimension_numbers<[1], [0], [0], [1], [0, 0, 1, 1], [], []>} : vector<8x128xbf16>, vector<128x128xbf16>, vector<8x128xf32> -> vector<8x128xf32>
    %39 = arith.truncf %36 : vector<8x128xf32> to vector<8x128xbf16>
    %c0_25 = arith.constant 0 : index
    %c0_26 = arith.constant 0 : index
    %40 = vector.load %arg9[%c0_25, %c0_26] : memref<128x128xbf16, #tpu.memory_space<vmem>>, vector<128x128xbf16>
    %cst_27 = arith.constant dense<0.000000e+00> : vector<8x128xf32>
    %41 = tpu.matmul %39, %40, %cst_27 {dimension_numbers = #tpu.dot_dimension_numbers<[1], [0], [0], [1], [0, 0, 1, 1], [], []>} : vector<8x128xbf16>, vector<128x128xbf16>, vector<8x128xf32> -> vector<8x128xf32>
    %42 = arith.addf %38, %41 : vector<8x128xf32>
    %43 = arith.truncf %42 : vector<8x128xf32> to vector<8x128xbf16>
    %44 = vector.shape_cast %43 : vector<8x128xbf16> to vector<8x128x1xbf16>
    %cst_28 = arith.constant dense<0.000000e+00> : vector<8x16x1xf32>
    %45 = tpu.matmul %3, %44, %cst_28 {dimension_numbers = #tpu.dot_dimension_numbers<[2], [1], [1], [2], [0, 0, 0, 1, 1, 2], [0], [0]>} : vector<8x16x128xbf16>, vector<8x128x1xbf16>, vector<8x16x1xf32> -> vector<8x16x1xf32>
    %46 = vector.shape_cast %45 : vector<8x16x1xf32> to vector<8x16xf32>
    %cst_29 = arith.constant 0.000000e+00 : f32
    %47 = vector.broadcast %cst_29 : f32 to vector<8x112xf32>
    %48 = tpu.concatenate %46, %47 in 1 : vector<8x16xf32>, vector<8x112xf32> -> vector<8x128xf32>
    %c0_30 = arith.constant 0 : index
    %c0_31 = arith.constant 0 : index
    %49 = vector.load %arg10[%c0_30, %c0_31] : memref<8x128xf32, #tpu.memory_space<vmem>>, vector<8x128xf32>
    tpu.vector_store %arg10[%c0_30, %c0_31], %48 {strides = array<i32>} : memref<8x128xf32, #tpu.memory_space<vmem>>, vector<8x128xf32>,
    return
  }
  func.func @transform_0(%arg0: i32) -> (i32, i32) {
    %c0_i32 = arith.constant 0 : i32
    %c0_i32_0 = arith.constant 0 : i32
    return %arg0, %c0_i32 : i32, i32
  }
  func.func @transform_1(%arg0: i32) -> (i32, i32, i32) {
    %c0_i32 = arith.constant 0 : i32
    %c0_i32_0 = arith.constant 0 : i32
    %c0_i32_1 = arith.constant 0 : i32
    return %arg0, %c0_i32, %c0_i32_0 : i32, i32, i32
  }
  func.func @transform_2(%arg0: i32) -> (i32, i32, i32) {
    %c0_i32 = arith.constant 0 : i32
    %c0_i32_0 = arith.constant 0 : i32
    %c0_i32_1 = arith.constant 0 : i32
    return %arg0, %c0_i32, %c0_i32_0 : i32, i32, i32
  }
  func.func @transform_3(%arg0: i32) -> (i32, i32, i32) {
    %c0_i32 = arith.constant 0 : i32
    %c0_i32_0 = arith.constant 0 : i32
    %c0_i32_1 = arith.constant 0 : i32
    return %arg0, %c0_i32, %c0_i32_0 : i32, i32, i32
  }
  func.func @transform_4(%arg0: i32) -> (i32, i32) {
    %c0_i32 = arith.constant 0 : i32
    %c0_i32_0 = arith.constant 0 : i32
    %c0_i32_1 = arith.constant 0 : i32
    return %c0_i32, %c0_i32_0 : i32, i32
  }
  func.func @transform_5(%arg0: i32) -> (i32, i32) {
    %c0_i32 = arith.constant 0 : i32
    %c0_i32_0 = arith.constant 0 : i32
    %c0_i32_1 = arith.constant 0 : i32
    return %c0_i32, %c0_i32_0 : i32, i32
  }
  func.func @transform_6(%arg0: i32) -> (i32, i32) {
    %c0_i32 = arith.constant 0 : i32
    %c0_i32_0 = arith.constant 0 : i32
    %c0_i32_1 = arith.constant 0 : i32
    return %c0_i32, %c0_i32_0 : i32, i32
  }
  func.func @transform_7(%arg0: i32) -> (i32, i32) {
    %c0_i32 = arith.constant 0 : i32
    %c0_i32_0 = arith.constant 0 : i32
    %c0_i32_1 = arith.constant 0 : i32
    return %c0_i32, %c0_i32_0 : i32, i32
  }
  func.func @transform_8(%arg0: i32) -> (i32, i32) {
    %c0_i32 = arith.constant 0 : i32
    %c0_i32_0 = arith.constant 0 : i32
    %c0_i32_1 = arith.constant 0 : i32
    return %c0_i32, %c0_i32_0 : i32, i32
  }
  func.func @transform_9(%arg0: i32) -> (i32, i32) {
    %c0_i32 = arith.constant 0 : i32
    %c0_i32_0 = arith.constant 0 : i32
    return %arg0, %c0_i32 : i32, i32
  }
}

</mosaic_0001>

<bundles_post_ra>
// kernel: tpu_custom_call.1
= control target key start
LH: loop header
LB: loop body
LE: loop exit
PB: predicated region body
PF: predicated region fallthrough
CT: control target
= control target key end

     0   :  { %14 = vsyncpa [#allocation3], 0  ;;  %s3645_s0 = inlined_call_operand.hbm [shape: bf16[8,128], index: 0, kind: input, shape index: {}]   ;;  %s3646_s1 = inlined_call_operand.hbm [shape: bf16[8,16,128], index: 1, kind: input, shape index: {}]   ;;  %s3647_s2 = inlined_call_operand.hbm [shape: bf16[8,16,128], index: 2, kind: input, shape index: {}]   ;;  %s3648_s3 = inlined_call_operand.hbm [shape: bf16[8,16,128], index: 3, kind: input, shape index: {}]   ;;  %s3649_s4 = inlined_call_operand.hbm [shape: bf16[128,128], index: 4, kind: input, shape index: {}]   ;;  %s3650_s5 = inlined_call_operand.hbm [shape: bf16[128,128], index: 5, kind: input, shape index: {}]   ;;  %s3651_s6 = inlined_call_operand.vmem [shape: f32[1,128], index: 6, kind: input, shape index: {}]   ;;  %s3652_s7 = inlined_call_operand.hbm [shape: bf16[128,128], index: 7, kind: input, shape index: {}]   ;;  %s3653_s8 = inlined_call_operand.hbm [shape: bf16[128,128], index: 8, kind: input, shape index: {}]   ;;  %s3654_s9 = inlined_call_operand.hbm [shape: f32[8,128], index: 9, kind: output, shape index: {}]  }
   0x1   :  { %15 = vsyncpa [#allocation6], 0 }
   0x2   :  { %16 = vsyncpa [#allocation9], 0 }
   0x3   :  { %17 = vsyncpa [#allocation12], 0 }
   0x4   :  { %18 = vsyncpa [#allocation15], 0 }
   0x5   :  { %19 = vsyncpa [#allocation4], 0  ;;  %s3166_s30 = smov [#allocation5]   ;;  %s2956_s13 = scalar_lea.hbm %s3646_s1, 1024 }
   0x6   :  { %s35_s10 = sshll.u32 %s3166_s30, 4  ;;  %p2957_p0 = scmp.ne.s32.totalorder %s3646_s1, %s2956_s13  ;;  %s36_s10 = int_to_ptr.vmem [resolvable:$true] %s35_s10 }
   0x7   :  { %p2960_p1 = scmp.lt.u32.totalorder %s2956_s13, %s3646_s1 }
   0x9   :  { %p2962_p2 = pnand %p2960_p1, %p2957_p0 }
   0xb   :  { %2965 = shalt.err (!%p2962_p2)
}
   0xc   :  { %s2966_s18 = scalar_lea.vmem %s36_s10, 1024  ;;  %p2971_p4 = scmp.lt.s32.totalorder %s36_s10, %s36_s10 }
   0xd   :  { %p2967_p3 = scmp.ne.s32.totalorder %s36_s10, %s2966_s18  ;;  %p2972_p5 = scmp.lt.s32.totalorder %s2966_s18, %s2966_s18 }
   0xf   :  { %p2973_p6 = por %p2972_p5, %p2971_p4 }
  0x11   :  { %p2974_p7 = pnand %p2973_p6, %p2967_p3 }
  0x13   :  { %2977 = shalt.err (!%p2974_p7)
}
  0x14   :  { %s3167_s19 = smov 64   ;;  %s3168_s20 = smov 4  }
  0x15   :  { %41 = dma.hbm_to_vmem [thread:$0]  %s3646_s1, 1024, %s36_s10, [#allocation6], %s3167_s19, %s3167_s19, %s3168_s20  }
  0x16   :  { %s3169_s23 = smov [#allocation8]   ;;  %s3170_s25 = smov [#allocation11]  }
  0x17   :  { %s59_s24 = sshll.u32 %s3169_s23, 4  ;;  %s83_s26 = sshll.u32 %s3170_s25, 4  ;;  %s60_s24 = int_to_ptr.vmem [resolvable:$true] %s59_s24  ;;  %s84_s26 = int_to_ptr.vmem [resolvable:$true] %s83_s26 }
  0x18   :  { %s2978_s29 = scalar_lea.hbm %s3648_s3, 1024 }
  0x19   :  { %p2979_p8 = scmp.ne.s32.totalorder %s3648_s3, %s2978_s29  ;;  %p2982_p9 = scmp.lt.u32.totalorder %s2978_s29, %s3648_s3 }
  0x1b   :  { %p2984_p10 = pnand %p2982_p9, %p2979_p8 }
  0x1d   :  { %2987 = shalt.err (!%p2984_p10)
}
  0x1e   :  { %s2988_s1 = scalar_lea.vmem %s60_s24, 1024  ;;  %p2993_p12 = scmp.lt.s32.totalorder %s60_s24, %s60_s24 }
  0x1f   :  { %p2989_p11 = scmp.ne.s32.totalorder %s60_s24, %s2988_s1  ;;  %p2994_p13 = scmp.lt.s32.totalorder %s2988_s1, %s2988_s1 }
  0x21   :  { %p2995_p0 = por %p2994_p13, %p2993_p12 }
  0x23   :  { %p2996_p1 = pnand %p2995_p0, %p2989_p11 }
  0x25   :  { %2999 = shalt.err (!%p2996_p1)
}
  0x26   :  { %65 = dma.hbm_to_vmem [thread:$0]  %s3648_s3, 1024, %s60_s24, [#allocation9], %s3167_s19, %s3167_s19, %s3168_s20  }
  0x27   :  { %s3000_s17 = scalar_lea.hbm %s3650_s5, 1024 }
  0x28   :  { %p3001_p2 = scmp.ne.s32.totalorder %s3650_s5, %s3000_s17  ;;  %p3004_p3 = scmp.lt.u32.totalorder %s3000_s17, %s3650_s5 }
  0x2a   :  { %p3006_p4 = pnand %p3004_p3, %p3001_p2 }
  0x2c   :  { %3009 = shalt.err (!%p3006_p4)
}
  0x2d   :  { %s3010_s25 = scalar_lea.vmem %s84_s26, 1024  ;;  %p3015_p6 = scmp.lt.s32.totalorder %s84_s26, %s84_s26 }
  0x2e   :  { %p3011_p5 = scmp.ne.s32.totalorder %s84_s26, %s3010_s25  ;;  %p3016_p7 = scmp.lt.s32.totalorder %s3010_s25, %s3010_s25 }
  0x30   :  { %p3017_p8 = por %p3016_p7, %p3015_p6 }
  0x32   :  { %p3018_p9 = pnand %p3017_p8, %p3011_p5 }
  0x34   :  { %3021 = shalt.err (!%p3018_p9)
}
  0x35   :  { %89 = dma.hbm_to_vmem [thread:$0]  %s3650_s5, 1024, %s84_s26, [#allocation12], %s3167_s19, %s3167_s19, %s3168_s20  }
  0x36   :  { %s3171_s27 = smov [#allocation2]   ;;  %s3172_s29 = smov [#allocation7]  }
  0x37   :  { %s26_s28 = sshll.u32 %s3171_s27, 4  ;;  %s47_s30 = sshll.u32 %s3172_s29, 4  ;;  %s27_s28 = int_to_ptr.vmem [resolvable:$true] %s26_s28  ;;  %s48_s30 = int_to_ptr.vmem [resolvable:$true] %s47_s30 }
  0x38   :  { %s3022_s13 = scalar_lea.hbm %s3645_s0, 64 }
  0x39   :  { %p3023_p10 = scmp.ne.s32.totalorder %s3645_s0, %s3022_s13  ;;  %p3026_p11 = scmp.lt.u32.totalorder %s3022_s13, %s3645_s0 }
  0x3b   :  { %p3028_p12 = pnand %p3026_p11, %p3023_p10 }
  0x3d   :  { %3031 = shalt.err (!%p3028_p12)
}
  0x3e   :  { %s3032_s5 = scalar_lea.vmem %s27_s28, 64  ;;  %p3037_p0 = scmp.lt.s32.totalorder %s27_s28, %s27_s28 }
  0x3f   :  { %p3033_p13 = scmp.ne.s32.totalorder %s27_s28, %s3032_s5  ;;  %p3038_p1 = scmp.lt.s32.totalorder %s3032_s5, %s3032_s5 }
  0x41   :  { %p3039_p2 = por %p3038_p1, %p3037_p0 }
  0x43   :  { %p3040_p3 = pnand %p3039_p2, %p3033_p13 }
  0x45   :  { %3043 = shalt.err (!%p3040_p3)
}
  0x46   :  { %29 = dma.hbm_to_vmem [thread:$0]  %s3645_s0, 64, %s27_s28, [#allocation3]  }
  0x47   :  { %s3044_s21 = scalar_lea.hbm %s3647_s2, 1024 }
  0x48   :  { %p3045_p4 = scmp.ne.s32.totalorder %s3647_s2, %s3044_s21  ;;  %p3048_p5 = scmp.lt.u32.totalorder %s3044_s21, %s3647_s2 }
  0x4a   :  { %p3050_p6 = pnand %p3048_p5, %p3045_p4 }
  0x4c   :  { %3053 = shalt.err (!%p3050_p6)
}
  0x4d   :  { %s3054_s24 = scalar_lea.vmem %s48_s30, 1024  ;;  %p3059_p8 = scmp.lt.s32.totalorder %s48_s30, %s48_s30 }
  0x4e   :  { %p3055_p7 = scmp.ne.s32.totalorder %s48_s30, %s3054_s24  ;;  %p3060_p9 = scmp.lt.s32.totalorder %s3054_s24, %s3054_s24 }
  0x50   :  { %p3061_p10 = por %p3060_p9, %p3059_p8 }
  0x52   :  { %p3062_p11 = pnand %p3061_p10, %p3055_p7 }
  0x54   :  { %3065 = shalt.err (!%p3062_p11)
}
  0x55   :  { %53 = dma.hbm_to_vmem [thread:$0]  %s3647_s2, 1024, %s48_s30, [#allocation6], %s3167_s19, %s3167_s19, %s3168_s20  }
  0x56   :  { %s3173_s28 = smov [#allocation10]   ;;  %s3174_s11 = smov [#allocation13]  }
  0x57   :  { %s71_s29 = sshll.u32 %s3173_s28, 4  ;;  %s97_s12 = sshll.u32 %s3174_s11, 4  ;;  %s72_s29 = int_to_ptr.vmem [resolvable:$true] %s71_s29  ;;  %s98_s12 = int_to_ptr.vmem [resolvable:$true] %s97_s12 }
  0x58   :  { %s3066_s10 = scalar_lea.hbm %s3649_s4, 1024 }
  0x59   :  { %p3067_p12 = scmp.ne.s32.totalorder %s3649_s4, %s3066_s10  ;;  %p3070_p13 = scmp.lt.u32.totalorder %s3066_s10, %s3649_s4 }
  0x5b   :  { %p3072_p0 = pnand %p3070_p13, %p3067_p12 }
  0x5d   :  { %3075 = shalt.err (!%p3072_p0)
}
  0x5e   :  { %s3076_s2 = scalar_lea.vmem %s72_s29, 1024  ;;  %p3081_p2 = scmp.lt.s32.totalorder %s72_s29, %s72_s29 }
  0x5f   :  { %p3077_p1 = scmp.ne.s32.totalorder %s72_s29, %s3076_s2  ;;  %p3082_p3 = scmp.lt.s32.totalorder %s3076_s2, %s3076_s2 }
  0x61   :  { %p3083_p4 = por %p3082_p3, %p3081_p2 }
  0x63   :  { %p3084_p5 = pnand %p3083_p4, %p3077_p1 }
  0x65   :  { %3087 = shalt.err (!%p3084_p5)
}
  0x66   :  { %77 = dma.hbm_to_vmem [thread:$0]  %s3649_s4, 1024, %s72_s29, [#allocation9], %s3167_s19, %s3167_s19, %s3168_s20  }
  0x67   :  { %s3088_s21 = scalar_lea.hbm %s3652_s7, 1024 }
  0x68   :  { %p3089_p6 = scmp.ne.s32.totalorder %s3652_s7, %s3088_s21  ;;  %p3092_p7 = scmp.lt.u32.totalorder %s3088_s21, %s3652_s7 }
  0x6a   :  { %p3094_p8 = pnand %p3092_p7, %p3089_p6 }
  0x6c   :  { %3097 = shalt.err (!%p3094_p8)
}
  0x6d   :  { %s3098_s24 = scalar_lea.vmem %s98_s12, 1024  ;;  %p3103_p10 = scmp.lt.s32.totalorder %s98_s12, %s98_s12 }
  0x6e   :  { %p3099_p9 = scmp.ne.s32.totalorder %s98_s12, %s3098_s24  ;;  %p3104_p11 = scmp.lt.s32.totalorder %s3098_s24, %s3098_s24 }
  0x70   :  { %p3105_p12 = por %p3104_p11, %p3103_p10 }
  0x72   :  { %p3106_p13 = pnand %p3105_p12, %p3099_p9 }
  0x74   :  { %3109 = shalt.err (!%p3106_p13)
}
  0x75   :  { %103 = dma.hbm_to_vmem [thread:$0]  %s3652_s7, 1024, %s98_s12, [#allocation12], %s3167_s19, %s3167_s19, %s3168_s20  }
  0x76   :  { %s3175_s27 = smov [#allocation14]   ;;  %s3110_s13 = scalar_lea.hbm %s3653_s8, 1024 }
  0x77   :  { %s109_s28 = sshll.u32 %s3175_s27, 4  ;;  %p3111_p0 = scmp.ne.s32.totalorder %s3653_s8, %s3110_s13  ;;  %s110_s28 = int_to_ptr.vmem [resolvable:$true] %s109_s28 }
  0x78   :  { %p3114_p1 = scmp.lt.u32.totalorder %s3110_s13, %s3653_s8 }
  0x7a   :  { %p3116_p2 = pnand %p3114_p1, %p3111_p0 }
  0x7c   :  { %3119 = shalt.err (!%p3116_p2)
}
  0x7d   :  { %s3120_s5 = scalar_lea.vmem %s110_s28, 1024  ;;  %p3125_p4 = scmp.lt.s32.totalorder %s110_s28, %s110_s28 }
  0x7e   :  { %p3121_p3 = scmp.ne.s32.totalorder %s110_s28, %s3120_s5  ;;  %p3126_p5 = scmp.lt.s32.totalorder %s3120_s5, %s3120_s5 }
  0x80   :  { %p3127_p6 = por %p3126_p5, %p3125_p4 }
  0x82   :  { %p3128_p7 = pnand %p3127_p6, %p3121_p3 }
  0x84   :  { %3131 = shalt.err (!%p3128_p7)
}
  0x85   :  { %115 = dma.hbm_to_vmem [thread:$0]  %s3653_s8, 1024, %s110_s28, [#allocation15], %s3167_s19, %s3167_s19, %s3168_s20  }
  0x86   :  { %3154 = dma.done.wait [#allocation3], 64  }
  0x87   :  { %3155 = vsyncadd [#allocation3], 4294967232 }
  0x88   :  { %3156 = dma.done.wait [#allocation6], 2048  }
  0x89   :  { %3157 = vsyncadd [#allocation6], 4294965248 }
  0x8a   :  { %3158 = dma.done.wait [#allocation9], 2048  }
  0x8b   :  { %3159 = vsyncadd [#allocation9], 4294965248 }
  0x8c   :  { %3160 = dma.done.wait [#allocation12], 2048  }
  0x8d   :  { %3161 = vsyncadd [#allocation12], 4294965248 }
  0x8e   :  { %3162 = dma.done.wait [#allocation15], 1024  }
  0x8f   :  { %3163 = vsyncadd [#allocation15], 4294966272  ;;  %v3176_v0 = vmov 0.0   ;;  %vm3177_vm0 = vmmov 0   ;;  %v2864_v1 = vld [vmem:[#allocation10] sm:$0xff]   ;;  %v2866_v3 = vld [vmem:[#allocation10 + $0x8] sm:$0xff]   ;;  %v508_v28 = vlaneseq }
  0x90   :  { %2543 = vmatprep.subr.bf16.mxu0 %v3176_v0  ;;  %2559 = vmatprep.mubr.msk.bf16.mxu0 %vm3177_vm0, %v3176_v0  ;;  %v2865_v2 = vld [vmem:[#allocation11] sm:$0xff]   ;;  %v2867_v4 = vld [vmem:[#allocation11 + $0x8] sm:$0xff]   ;;  %v2869_v5 = vld [vmem:[#allocation11 + $0x10] sm:$0xff]   ;;  %v3178_v26 = vmov 1966171168   ;;  %vm708_vm1 = vcmask 130112  }
  0x91   :  { %2544 = vmatpush3.bf16.msra.mxu0 %v2864_v1  ;;  %2563 = vmatprep.subr.bf16.mxu1 %v2865_v2  ;;  %v2868_v6 = vld [vmem:[#allocation10 + $0x10] sm:$0xff]   ;;  %v2871_v7 = vld [vmem:[#allocation11 + $0x18] sm:$0xff]   ;;  %v2873_v9 = vld [vmem:[#allocation11 + $0x20] sm:$0xff]   ;;  %v506_v27 = vunpack.c.l.s4 %v3178_v26  ;;  %v3368_v30 = vshrl.u32 %v508_v28, 7  ;;  %vm773_vm2 = vcmask 1041409   ;;  %vm775_vm3 = vcmask 1042434  }
  0x92   :  { %2545 = vmatprep.subr.bf16.mxu0 %v3176_v0  ;;  %2564 = vmatpush3.bf16.msra.mxu1 %v2865_v2  ;;  %v2870_v8 = vld [vmem:[#allocation10 + $0x18] sm:$0xff]   ;;  %v2872_v10 = vld [vmem:[#allocation10 + $0x20] sm:$0xff]   ;;  %v2875_v11 = vld [vmem:[#allocation11 + $0x28] sm:$0xff]   ;;  %vm777_vm4 = vcmask 1043459   ;;  %vm779_vm5 = vcmask 1044484   ;;  %vm781_vm6 = vcmask 1045509  }
  0x93   :  { %2565 = vmatprep.subr.bf16.mxu1 %v2867_v4  ;;  %v2880_v12 = vld [vmem:[#allocation5] sm:$0xff]   ;;  %v2874_v13 = vld [vmem:[#allocation10 + $0x28] sm:$0xff]   ;;  %v2877_v14 = vld [vmem:[#allocation11 + $0x30] sm:$0xff]   ;;  %v507_v29 = vunpack.c.0.s8 %v506_v27  ;;  %v3375_v36 = vsub.s32 0, %v3368_v30  ;;  %vm783_vm7 = vcmask 1046534   ;;  %vm785_vm8 = vcmask 1047559  }
  0x94   :  { %2579 = vmatprep.mubr.bf16.mxu1 %v2880_v12  ;;  %v2876_v15 = vld [vmem:[#allocation10 + $0x30] sm:$0xff]   ;;  %v2878_v16 = vld [vmem:[#allocation10 + $0x38] sm:$0xff]   ;;  %v2881_v19 = vld [vmem:[#allocation5 + $0x8] sm:$0xff]   ;;  %vm789_vm10 = vcmask 130048  }
  0x95   :  { %2546 = vmatpush3.bf16.msra.mxu0 %v2866_v3  ;;  %v2879_v17 = vld [vmem:[#allocation11 + $0x38] sm:$0xff]   ;;  %v2882_v20 = vld [vmem:[#allocation5 + $0x10] sm:$0xff]   ;;  %v2884_v22 = vld [vmem:[#allocation5 + $0x20] sm:$0xff]   ;;  %v3371_v31 = vsub.s32 %v507_v29, %v3368_v30 }
  0x96   :  { %2547 = vmatprep.subr.bf16.mxu0 %v3176_v0  ;;  %2566 = vmatpush3.bf16.msra.mxu1 %v2867_v4  ;;  %v3358_v18 = vld [vmem:[#allocation2] sm:$0xf]  ;;  %v2885_v23 = vld [vmem:[#allocation5 + $0x28] sm:$0xff]   ;;  %v2886_v24 = vld [vmem:[#allocation5 + $0x30] sm:$0xff]  }
  0x97   :  { %2567 = vmatprep.subr.bf16.mxu1 %v2869_v5  ;;  %v2883_v21 = vld [vmem:[#allocation5 + $0x18] sm:$0xff]  }
  0x98   :  { %v2887_v25 = vld [vmem:[#allocation5 + $0x38] sm:$0xff]  }
  0x99   :  { %2548 = vmatpush3.bf16.msra.mxu0 %v2868_v6  ;;  %v3390_v6 = vld [vmem:[%s3651_s6] ss:$0 sm:$0xff]  ;;  %s3180_s6 = smov [#allocation16]  }
  0x9a   :  { %2549 = vmatprep.subr.bf16.mxu0 %v3176_v0  ;;  %2568 = vmatpush3.bf16.msra.mxu1 %v2869_v5  ;;  %s2330_s20 = sshll.u32 %s3180_s6, 4  ;;  %s2331_s20 = int_to_ptr.vmem [resolvable:$true] %s2330_s20 }
  0x9b   :  { %2569 = vmatprep.subr.bf16.mxu1 %v2871_v7  ;;  %s3132_s26 = scalar_lea.vmem %s2331_s20, 128  ;;  %p3137_p9 = scmp.lt.s32.totalorder %s2331_s20, %s2331_s20 }
  0x9c   :  { %p3133_p8 = scmp.ne.s32.totalorder %s2331_s20, %s3132_s26  ;;  %p3138_p10 = scmp.lt.s32.totalorder %s3132_s26, %s3132_s26 }
  0x9d   :  { %2550 = vmatpush3.bf16.msra.mxu0 %v2870_v8 }
  0x9e   :  { %2551 = vmatprep.subr.bf16.mxu0 %v3176_v0  ;;  %2570 = vmatpush3.bf16.msra.mxu1 %v2871_v7  ;;  %p3139_p11 = por %p3138_p10, %p3137_p9 }
  0x9f   :  { %2571 = vmatprep.subr.bf16.mxu1 %v2873_v9 }
  0xa0   :  { %p3140_p12 = pnand %p3139_p11, %p3133_p8 }
  0xa1   :  { %2552 = vmatpush3.bf16.msra.mxu0 %v2872_v10 }
  0xa2   :  { %2553 = vmatprep.subr.bf16.mxu0 %v3176_v0  ;;  %2572 = vmatpush3.bf16.msra.mxu1 %v2873_v9 }
  0xa3   :  { %2573 = vmatprep.subr.bf16.mxu1 %v2875_v11 }
  0xa5   :  { %2554 = vmatpush3.bf16.msra.mxu0 %v2874_v13 }
  0xa6   :  { %2555 = vmatprep.subr.bf16.mxu0 %v3176_v0  ;;  %2574 = vmatpush3.bf16.msra.mxu1 %v2875_v11 }
  0xa7   :  { %2575 = vmatprep.subr.bf16.mxu1 %v2877_v14 }
  0xa9   :  { %2556 = vmatpush3.bf16.msra.mxu0 %v2876_v15 }
  0xaa   :  { %2557 = vmatprep.subr.bf16.mxu0 %v3176_v0  ;;  %2576 = vmatpush3.bf16.msra.mxu1 %v2877_v14 }
  0xab   :  { %2577 = vmatprep.subr.bf16.mxu1 %v2879_v17 }
  0xad   :  { %2558 = vmatpush3.bf16.msra.mxu0 %v2878_v16 }
  0xae   :  { %2595 = vmatprep.subr.bf16.mxu0 %v3176_v0  ;;  %2578 = vmatpush3.bf16.msra.mxu1 %v2879_v17 }
  0xaf   :  { %2619 = vmatprep.subr.bf16.mxu1 %v3176_v0 }
  0xb0   :  { %2560 = vmatmul.mubr.bf16.vlgmr.msra.gmra.mrb[0].mxu0 %v3358_v18 }
  0xb1   :  { %2597 = vmatprep.mubr.msk.bf16.mxu0 %vm3177_vm0, %v3176_v0  ;;  %2580 = vmatmul.mubr.bf16.vlgmr.msra.gmra.mrb[0].mxu1 %v2881_v19 }
  0xb2   :  { %2583 = vmatprep.mubr.bf16.mxu1 %v2882_v20 }
  0xb9   :  { %2584 = vmatmul.mubr.bf16.gmra.mrb[4].mxu1 %v2883_v21 }
  0xba   :  { %2587 = vmatprep.mubr.bf16.mxu1 %v2884_v22 }
  0xc1   :  { %2588 = vmatmul.mubr.bf16.gmra.mrb[8].mxu1 %v2885_v23 }
  0xc2   :  { %2591 = vmatprep.mubr.bf16.mxu1 %v2886_v24 }
  0xc9   :  { %2592 = vmatmul.mubr.bf16.gmra.mrb[12].mxu1 %v2887_v25 }
  0xca   :  { %2621 = vmatprep.mubr.msk.bf16.mxu1 %vm3177_vm0, %v3176_v0 }
 0x183   :  { %v288_v32 = vpop.f32.mrb[0].mxu0 }
 0x184   :  { %v504_v33 = vcombine.high %v288_v32, %v288_v32  ;;  %v511_v34 = vrot.slane %v288_v32, %v3371_v31  ;;  %v2561_v35 = vpop.f32.mrb[1].mxu0  ;;  %v2581_v38 = vpop.f32.mrb[0].mxu1 }
 0x185   :  { %v291_v37 = vpop.f32.mrb[2].mxu0  ;;  %v440_v42 = vpop.f32.mrb[1].mxu1 }
 0x186   :  { %v519_v39 = vcombine.high %v511_v34, %v511_v34  ;;  %v527_v40 = vrot.slane %v511_v34, %v3371_v31  ;;  %v2562_v41 = vpop.f32.mrb[3].mxu0  ;;  %v518_v43 = vrot.slane %v504_v33, %v3371_v31  ;;  %v2582_v44 = vpop.f32.mrb[2].mxu1 }
 0x187   :  { %v443_v47 = vpop.f32.mrb[3].mxu1 }
 0x188   :  { %v541_v45 = vrot.slane %v519_v39, %v3371_v31  ;;  %v556_v46 = vrot.slane %v527_v40, %v3375_v36  ;;  %v549_v48 = vcombine.high %v527_v40, %v527_v40  ;;  %v520_v53 = vcombine.high %v518_v43, %v518_v43 }
 0x189   :  { %v534_v4 = vrot.slane %v518_v43, %v3371_v31 }
 0x18a   :  { %v560_v49 = vrot.slane %v541_v45, %v3375_v36  ;;  %v593_v50 = vadd.f32 %v556_v46, %v440_v42  ;;  %v594_v51 = vadd.f32 %v556_v46, %v443_v47  ;;  %v551_v52 = vcombine.high %v541_v45, %v541_v45 }
 0x18b   :  { %v564_v58 = vrot.slane %v549_v48, %v3375_v36  ;;  %v548_v2 = vrot.slane %v520_v53, %v3371_v31  ;;  %v572_v8 = vrot.slane %v534_v4, %v3375_v36  ;;  %v550_v23 = vcombine.high %v534_v4, %v534_v4 }
 0x18c   :  { %v595_v54 = vadd.f32 %v2581_v38, %v560_v49  ;;  %2920 = vtanh.f32 %v593_v50  ;;  %v596_v55 = vadd.f32 %v2582_v44, %v560_v49  ;;  %v568_v56 = vrot.slane %v551_v52, %v3375_v36  ;;  %v2585_v57 = vpop.f32.mrb[4].mxu1 }
 0x18d   :  { %2922 = vtanh.f32 %v594_v51  ;;  %v456_v60 = vpop.f32.mrb[5].mxu1  ;;  %v576_v5 = vrot.slane %v548_v2, %v3375_v36  ;;  %v552_v20 = vcombine.high %v548_v2, %v548_v2  ;;  %v580_v32 = vrot.slane %v550_v23, %v3375_v36 }
 0x18e   :  { %2924 = vtanh.f32 %v595_v54  ;;  %v599_v59 = vadd.f32 %v2585_v57, %v568_v56  ;;  %v597_v61 = vadd.f32 %v564_v58, %v456_v60  ;;  %v2586_v62 = vpop.f32.mrb[6].mxu1 }
 0x18f   :  { %2926 = vtanh.f32 %v596_v55  ;;  %v600_v63 = vadd.f32 %v2586_v62, %v568_v56  ;;  %v459_v1 = vpop.f32.mrb[7].mxu1  ;;  %v584_v27 = vrot.slane %v552_v20, %v3375_v36 }
 0x190   :  { %v598_v3 = vadd.f32 %v564_v58, %v459_v1  ;;  %2928 = vtanh.f32 %v597_v61 }
 0x191   :  { %2930 = vtanh.f32 %v600_v63 }
 0x192   :  { %2932 = vtanh.f32 %v599_v59 }
 0x193   :  { %2934 = vtanh.f32 %v598_v3 }
 0x194   :  { %v2589_v7 = vpop.f32.mrb[8].mxu1 }
 0x195   :  { %v603_v10 = vadd.f32 %v2589_v7, %v576_v5  ;;  %v472_v11 = vpop.f32.mrb[9].mxu1 }
 0x196   :  { %v2921_v9 = vpop.eup %2920  ;;  %v601_v13 = vadd.f32 %v572_v8, %v472_v11  ;;  %v2590_v14 = vpop.f32.mrb[10].mxu1 }
 0x197   :  { %v2923_v12 = vpop.eup %2922  ;;  %v632_v15 = vmul.f32 %v2921_v9, %v3390_v6  ;;  %v604_v17 = vadd.f32 %v2590_v14, %v576_v5  ;;  %v475_v19 = vpop.f32.mrb[11].mxu1  ;;  %2936 = vtanh.f32 %v603_v10 }
 0x198   :  { %v2925_v16 = vpop.eup %2924  ;;  %v602_v21 = vadd.f32 %v572_v8, %v475_v19  ;;  %v633_v25 = vmul.f32 %v2923_v12, %v3390_v6  ;;  %v681_v8 = vand.u32 127, %v508_v28 }
 0x199   :  { %648 = vadd.xlane.f32.xlu0 %v632_v15  ;;  %v634_v22 = vmul.f32 %v2925_v16, %v3390_v6  ;;  %v2927_v24 = vpop.eup %2926  ;;  %2938 = vtanh.f32 %v604_v17 }
 0x19a   :  { %v2929_v26 = vpop.eup %2928  ;;  %v635_v33 = vmul.f32 %v2927_v24, %v3390_v6  ;;  %2940 = vtanh.f32 %v601_v13  ;;  %v703_v10 = vadd.s32 4294967288, %v681_v8  ;;  %v3416_v15 = vsub.s32 %v681_v8, %v3368_v30 }
 0x19b   :  { %652 = vadd.xlane.f32.xlu1 %v634_v22  ;;  %v2931_v34 = vpop.eup %2930  ;;  %v636_v40 = vmul.f32 %v2929_v26, %v3390_v6  ;;  %2942 = vtanh.f32 %v602_v21  ;;  %vm682_vm9 = vcmp.lt.s32.totalorder %v681_v8, 10 }
 0x19c   :  { %v2593_v29 = vpop.f32.mrb[12].mxu1  ;;  %v2933_v41 = vpop.eup %2932  ;;  %v639_v45 = vmul.f32 %v2931_v34, %v3390_v6  ;;  %v3413_v13 = vsub.s32 %v703_v10, %v3368_v30 }
 0x19d   :  { %650 = vadd.xlane.f32.xlu0 %v633_v25  ;;  %v607_v35 = vadd.f32 %v2593_v29, %v584_v27  ;;  %v488_v37 = vpop.f32.mrb[13].mxu1  ;;  %v2935_v46 = vpop.eup %2934  ;;  %v638_v47 = vmul.f32 %v2933_v41, %v3390_v6 }
 0x19e   :  { %v605_v38 = vadd.f32 %v580_v32, %v488_v37  ;;  %v2594_v39 = vpop.f32.mrb[14].mxu1  ;;  %v637_v49 = vmul.f32 %v2935_v46, %v3390_v6 }
 0x19f   :  { %654 = vadd.xlane.f32.xlu1 %v635_v33  ;;  %v608_v42 = vadd.f32 %v2594_v39, %v584_v27  ;;  %v491_v43 = vpop.f32.mrb[15].mxu1 }
 0x1a0   :  { %v606_v44 = vadd.f32 %v580_v32, %v491_v43  ;;  %2944 = vtanh.f32 %v605_v38 }
 0x1a1   :  { %656 = vadd.xlane.f32.xlu0 %v636_v40  ;;  %v2937_v48 = vpop.eup %2936 }
 0x1a2   :  { %2946 = vtanh.f32 %v606_v44  ;;  %v642_v51 = vmul.f32 %v2937_v48, %v3390_v6 }
 0x1a3   :  { %662 = vadd.xlane.f32.xlu1 %v639_v45  ;;  %v2939_v50 = vpop.eup %2938  ;;  %2948 = vtanh.f32 %v607_v35 }
 0x1a4   :  { %v2941_v52 = vpop.eup %2940  ;;  %2950 = vtanh.f32 %v608_v42  ;;  %v643_v53 = vmul.f32 %v2939_v50, %v3390_v6 }
 0x1a5   :  { %660 = vadd.xlane.f32.xlu0 %v638_v47  ;;  %v2943_v54 = vpop.eup %2942  ;;  %v640_v55 = vmul.f32 %v2941_v52, %v3390_v6 }
 0x1a6   :  { %v641_v57 = vmul.f32 %v2943_v54, %v3390_v6 }
 0x1a7   :  { %658 = vadd.xlane.f32.xlu1 %v637_v49 }
 0x1a9   :  { %668 = vadd.xlane.f32.xlu0 %v642_v51 }
 0x1aa   :  { %v2945_v56 = vpop.eup %2944 }
 0x1ab   :  { %670 = vadd.xlane.f32.xlu1 %v643_v53  ;;  %v644_v59 = vmul.f32 %v2945_v56, %v3390_v6 }
 0x1ac   :  { %v2947_v58 = vpop.eup %2946 }
 0x1ad   :  { %664 = vadd.xlane.f32.xlu0 %v640_v55  ;;  %v2949_v60 = vpop.eup %2948  ;;  %v645_v61 = vmul.f32 %v2947_v58, %v3390_v6 }
 0x1ae   :  { %v2951_v62 = vpop.eup %2950  ;;  %v646_v63 = vmul.f32 %v2949_v60, %v3390_v6 }
 0x1af   :  { %666 = vadd.xlane.f32.xlu1 %v641_v57  ;;  %v647_v1 = vmul.f32 %v2951_v62, %v3390_v6 }
 0x1b1   :  { %672 = vadd.xlane.f32.xlu0 %v644_v59 }
 0x1b3   :  { %674 = vadd.xlane.f32.xlu1 %v645_v61 }
 0x1b5   :  { %676 = vadd.xlane.f32.xlu0 %v646_v63 }
 0x1b7   :  { %678 = vadd.xlane.f32.xlu1 %v647_v1  ;;  %v2888_v1 = vld [vmem:[#allocation7] sm:$0xff]  }
 0x1b8   :  { %2596 = vmatpush3.bf16.msra.mxu0 %v2888_v1 }
 0x1b9   :  { %2601 = vmatprep.subr.bf16.mxu0 %v3176_v0 }
 0x226   :  { %v649_v2 = vpop.xlane.xlu0 %648 }
 0x227   :  { %v702_v22 = vrot.slane %v649_v2, %v3416_v15  ;;  %v2889_v2 = vld [vmem:[#allocation7 + $0x20] sm:$0xff]  }
 0x228   :  { %v653_v3 = vpop.xlane.xlu1 %652  ;;  %2620 = vmatpush3.bf16.msra.mxu1 %v2889_v2 }
 0x229   :  { %v713_v19 = vrot.slane %v653_v3, %v3416_v15  ;;  %2631 = vmatprep.subr.bf16.mxu1 %v3176_v0 }
 0x22a   :  { %v651_v4 = vpop.xlane.xlu0 %650 }
 0x22b   :  { %v707_v28 = vrot.slane %v651_v4, %v3413_v13 }
 0x22c   :  { %v655_v5 = vpop.xlane.xlu1 %654 }
 0x22d   :  { %v717_v6 = vrot.slane %v655_v5, %v3413_v13  ;;  %v709_v26 = vsel %vm708_vm1, %v707_v28, %v702_v22  ;;  %v2891_v28 = vld [vmem:[#allocation7 + $0x30] sm:$0xff]  }
 0x22e   :  { %v657_v7 = vpop.xlane.xlu0 %656 }
 0x22f   :  { %v722_v20 = vrot.slane %v657_v7, %v3416_v15  ;;  %v718_v23 = vsel %vm708_vm1, %v717_v6, %v713_v19  ;;  %v2890_v6 = vld [vmem:[#allocation7 + $0x8] sm:$0xff]  }
 0x230   :  { %v663_v9 = vpop.xlane.xlu1 %662  ;;  %v774_v32 = vsel %vm773_vm2, %v718_v23, %v709_v26  ;;  %v2892_v23 = vld [vmem:[#allocation7 + $0x10] sm:$0xff]  }
 0x231   :  { %v735_v35 = vrot.slane %v663_v9, %v3413_v13 }
 0x232   :  { %v661_v11 = vpop.xlane.xlu0 %660 }
 0x233   :  { %v731_v27 = vrot.slane %v661_v11, %v3416_v15 }
 0x234   :  { %v659_v12 = vpop.xlane.xlu1 %658 }
 0x235   :  { %v726_v16 = vrot.slane %v659_v12, %v3413_v13  ;;  %v736_v40 = vsel %vm708_vm1, %v735_v35, %v731_v27  ;;  %v2893_v27 = vld [vmem:[#allocation7 + $0x18] sm:$0xff]  }
 0x236   :  { %v669_v14 = vpop.xlane.xlu0 %668 }
 0x237   :  { %v727_v24 = vsel %vm708_vm1, %v726_v16, %v722_v20  ;;  %v749_v46 = vrot.slane %v669_v14, %v3416_v15 }
 0x238   :  { %v671_v17 = vpop.xlane.xlu1 %670  ;;  %v776_v37 = vsel %vm775_vm3, %v727_v24, %v774_v32 }
 0x239   :  { %v753_v41 = vrot.slane %v671_v17, %v3413_v13  ;;  %v778_v43 = vsel %vm777_vm4, %v736_v40, %v776_v37 }
 0x23a   :  { %v665_v21 = vpop.xlane.xlu0 %664 }
 0x23b   :  { %v740_v33 = vrot.slane %v665_v21, %v3416_v15  ;;  %v754_v50 = vsel %vm708_vm1, %v753_v41, %v749_v46  ;;  %v2898_v46 = vld [vmem:[#allocation14 + $0x10] sm:$0xff]  }
 0x23c   :  { %v667_v25 = vpop.xlane.xlu1 %666 }
 0x23d   :  { %v744_v29 = vrot.slane %v667_v25, %v3413_v13 }
 0x23e   :  { %v673_v34 = vpop.xlane.xlu0 %672 }
 0x23f   :  { %v745_v38 = vsel %vm708_vm1, %v744_v29, %v740_v33  ;;  %v758_v44 = vrot.slane %v673_v34, %v3416_v15  ;;  %v2894_v34 = vld [vmem:[#allocation7 + $0x28] sm:$0xff]  }
 0x240   :  { %v675_v39 = vpop.xlane.xlu1 %674  ;;  %v780_v47 = vsel %vm779_vm5, %v745_v38, %v778_v43 }
 0x241   :  { %v762_v42 = vrot.slane %v675_v39, %v3413_v13  ;;  %v782_v53 = vsel %vm781_vm6, %v754_v50, %v780_v47  ;;  %v2895_v39 = vld [vmem:[#allocation7 + $0x38] sm:$0xff]   ;;  %v2902_v50 = vld [vmem:[#allocation14 + $0x30] sm:$0xff]  }
 0x242   :  { %v677_v45 = vpop.xlane.xlu0 %676  ;;  %v2899_v47 = vld [vmem:[#allocation14 + $0x18] sm:$0xff]  }
 0x243   :  { %v763_v48 = vsel %vm708_vm1, %v762_v42, %v758_v44  ;;  %v767_v51 = vrot.slane %v677_v45, %v3416_v15  ;;  %v2896_v44 = vld [vmem:[#allocation14] sm:$0xff]   ;;  %v2897_v45 = vld [vmem:[#allocation14 + $0x8] sm:$0xff]  }
 0x244   :  { %v679_v49 = vpop.xlane.xlu1 %678  ;;  %v784_v55 = vsel %vm783_vm7, %v763_v48, %v782_v53  ;;  %v2900_v48 = vld [vmem:[#allocation14 + $0x20] sm:$0xff]  }
 0x245   :  { %v771_v52 = vrot.slane %v679_v49, %v3413_v13  ;;  %v2901_v49 = vld [vmem:[#allocation14 + $0x28] sm:$0xff]  }
 0x247   :  { %v772_v54 = vsel %vm708_vm1, %v771_v52, %v767_v51  ;;  %v2903_v51 = vld [vmem:[#allocation14 + $0x38] sm:$0xff]  }
 0x248   :  { %v786_v56 = vsel %vm785_vm8, %v772_v54, %v784_v55 }
 0x249   :  { %v788_v57 = vsel %vm682_vm9, %v786_v56, -1e+30 }
 0x24a   :  { %v790_v58 = vsel %vm789_vm10, %v788_v57, -inf }
 0x24b   :  { %791 = vmax.xlane.f32.xlu0 %v790_v58 }
 0x2d8   :  { %v792_v59 = vpop.xlane.xlu0 %791 }
 0x2d9   :  { %v793_v60 = vsub.f32 %v788_v57, %v792_v59 }
 0x2db   :  { %v794_v61 = vmul.f32 1.442695, %v793_v60 }
 0x2dd   :  { %2952 = vpow2.f32 %v794_v61 }
 0x2e7   :  { %v2953_v62 = vpop.eup %2952 }
 0x2e8   :  { %v796_v63 = vsel %vm789_vm10, %v2953_v62, 0.0 }
 0x2e9   :  { %797 = vadd.xlane.f32.xlu1 %v796_v63 }
 0x376   :  { %v798_v3 = vpop.xlane.xlu1 %797 }
 0x377   :  { %2954 = vrcp.f32 %v798_v3 }
 0x381   :  { %v2955_v4 = vpop.eup %2954 }
 0x382   :  { %v800_v5 = vmul.f32 %v2955_v4, %v2953_v62 }
 0x384   :  { %v801_v7 = vpack.c.bf16 %v800_v5, %v800_v5 }
 0x386   :  { %v809_v8 = vrot.slane %v801_v7, %v3371_v31 }
 0x388   :  { %v810_v9 = vcombine.high %v809_v8, %v809_v8  ;;  %v817_v10 = vrot.slane %v809_v8, %v3371_v31 }
 0x38a   :  { %v824_v11 = vrot.slane %v810_v9, %v3371_v31  ;;  %v825_v12 = vcombine.high %v817_v10, %v817_v10  ;;  %v2368_v14 = vpack.i.b16 %v817_v10, %v817_v10  ;;  %v828_v19 = vunpack.i.h.s16 %v817_v10 }
 0x38c   :  { %v839_v16 = vrot.slane %v2368_v14, %v3375_v36  ;;  %v2378_v17 = vpack.i.b16 %v825_v12, %v825_v12  ;;  %v826_v21 = vcombine.high %v824_v11, %v824_v11  ;;  %v889_v31 = vpack.i.b16 %v828_v19, %v828_v19 }
 0x38d   :  { %v2373_v26 = vpack.i.b16 %v824_v11, %v824_v11  ;;  %v830_v32 = vunpack.i.h.s16 %v824_v11  ;;  %v832_v37 = vunpack.i.h.s16 %v825_v12 }
 0x38e   :  { %2598 = vmatmul.mubr.msk.bf16.vlgmr.msra.gmra.mrb[4].mxu0 %vm789_vm10, %v839_v16  ;;  %v1055_v20 = vrot.slane %v2378_v17, %v3375_v36  ;;  %v2383_v22 = vpack.i.b16 %v826_v21, %v826_v21  ;;  %v893_v24 = vrot.slane %v889_v31, %v3375_v36  ;;  %v834_v41 = vunpack.i.h.s16 %v826_v21 }
 0x38f   :  { %2602 = vmatpush3.bf16.msra.mxu0 %v2890_v6  ;;  %2603 = vmatprep.mubr.msk.bf16.mxu0 %vm3177_vm0, %v3176_v0  ;;  %v947_v29 = vrot.slane %v2373_v26, %v3375_v36  ;;  %v997_v33 = vpack.i.b16 %v830_v32, %v830_v32  ;;  %v1105_v38 = vpack.i.b16 %v832_v37, %v832_v37 }
 0x390   :  { %2622 = vmatmul.mubr.msk.bf16.vlgmr.msra.gmra.mrb[16].mxu1 %vm789_vm10, %v1055_v20  ;;  %2607 = vmatprep.subr.bf16.mxu0 %v3176_v0  ;;  %v1163_v25 = vrot.slane %v2383_v22, %v3375_v36  ;;  %v1213_v42 = vpack.i.b16 %v834_v41, %v834_v41 }
 0x391   :  { %2632 = vmatpush3.bf16.msra.mxu1 %v2891_v28  ;;  %2633 = vmatprep.mubr.msk.bf16.mxu1 %vm3177_vm0, %v3176_v0  ;;  %v1001_v35 = vrot.slane %v997_v33, %v3375_v36  ;;  %v1109_v40 = vrot.slane %v1105_v38, %v3375_v36 }
 0x392   :  { %2643 = vmatprep.subr.bf16.mxu1 %v3176_v0  ;;  %v1217_v43 = vrot.slane %v1213_v42, %v3375_v36 }
 0x396   :  { %2604 = vmatmul.mubr.msk.bf16.vlgmr.msra.gmra.mrb[8].mxu0 %vm789_vm10, %v893_v24 }
 0x397   :  { %2608 = vmatpush3.bf16.msra.mxu0 %v2892_v23  ;;  %2609 = vmatprep.mubr.msk.bf16.mxu0 %vm3177_vm0, %v3176_v0 }
 0x398   :  { %2634 = vmatmul.mubr.msk.bf16.vlgmr.msra.gmra.mrb[20].mxu1 %vm789_vm10, %v1163_v25  ;;  %2613 = vmatprep.subr.bf16.mxu0 %v3176_v0 }
 0x399   :  { %2659 = vmatprep.mubr.msk.bf16.mxu1 %vm3177_vm0, %v3176_v0  ;;  %2644 = vmatpush3.bf16.msra.mxu1 %v2896_v44 }
 0x39a   :  { %2645 = vmatprep.subr.bf16.mxu1 %v3176_v0 }
 0x39d   :  { %2646 = vmatpush3.bf16.msra.mxu1 %v2897_v45 }
 0x39e   :  { %2610 = vmatmul.mubr.msk.bf16.vlgmr.msra.gmra.mrb[12].mxu0 %vm789_vm10, %v947_v29  ;;  %2647 = vmatprep.subr.bf16.mxu1 %v3176_v0 }
 0x39f   :  { %2614 = vmatpush3.bf16.msra.mxu0 %v2893_v27  ;;  %2615 = vmatprep.mubr.msk.bf16.mxu0 %vm3177_vm0, %v3176_v0 }
 0x3a0   :  { %2625 = vmatprep.subr.bf16.mxu0 %v3176_v0 }
 0x3a1   :  { %2648 = vmatpush3.bf16.msra.mxu1 %v2898_v46 }
 0x3a2   :  { %2649 = vmatprep.subr.bf16.mxu1 %v3176_v0 }
 0x3a5   :  { %2650 = vmatpush3.bf16.msra.mxu1 %v2899_v47 }
 0x3a6   :  { %2616 = vmatmul.mubr.msk.bf16.vlgmr.msra.gmra.mrb[16].mxu0 %vm789_vm10, %v1001_v35  ;;  %2651 = vmatprep.subr.bf16.mxu1 %v3176_v0 }
 0x3a7   :  { %2626 = vmatpush3.bf16.msra.mxu0 %v2894_v34  ;;  %2627 = vmatprep.mubr.msk.bf16.mxu0 %vm3177_vm0, %v3176_v0 }
 0x3a8   :  { %2637 = vmatprep.subr.bf16.mxu0 %v3176_v0 }
 0x3a9   :  { %2652 = vmatpush3.bf16.msra.mxu1 %v2900_v48 }
 0x3aa   :  { %2653 = vmatprep.subr.bf16.mxu1 %v3176_v0 }
 0x3ad   :  { %2654 = vmatpush3.bf16.msra.mxu1 %v2901_v49 }
 0x3ae   :  { %2628 = vmatmul.mubr.msk.bf16.vlgmr.msra.gmra.mrb[20].mxu0 %vm789_vm10, %v1109_v40  ;;  %2655 = vmatprep.subr.bf16.mxu1 %v3176_v0 }
 0x3af   :  { %2638 = vmatpush3.bf16.msra.mxu0 %v2895_v39  ;;  %2639 = vmatprep.mubr.msk.bf16.mxu0 %vm3177_vm0, %v3176_v0 }
 0x3b0   :  { %2683 = vmatprep.subr.bf16.mxu0 %v3176_v0 }
 0x3b1   :  { %2656 = vmatpush3.bf16.msra.mxu1 %v2902_v50 }
 0x3b2   :  { %2657 = vmatprep.subr.bf16.mxu1 %v3176_v0 }
 0x3b5   :  { %2658 = vmatpush3.bf16.msra.mxu1 %v2903_v51 }
 0x3b6   :  { %2640 = vmatmul.mubr.msk.bf16.vlgmr.msra.gmra.mrb[24].mxu0 %vm789_vm10, %v1217_v43  ;;  %2663 = vmatprep.subr.bf16.mxu1 %v3176_v0 }
 0x3b7   :  { %2699 = vmatprep.mubr.msk.bf16.mxu0 %vm3177_vm0, %v3176_v0 }
 0x461   :  { %v883_v52 = vpop.f32.mrb[4].mxu0 }
 0x462   :  { %v2599_v53 = vpop.f32.mrb[5].mxu0  ;;  %v1283_v61 = vpack.c.bf16 %v883_v52, %v883_v52 }
 0x463   :  { %v886_v54 = vpop.f32.mrb[6].mxu0  ;;  %v1099_v55 = vpop.f32.mrb[16].mxu1 }
 0x464   :  { %v2600_v56 = vpop.f32.mrb[7].mxu0  ;;  %v2623_v57 = vpop.f32.mrb[17].mxu1  ;;  %v1315_v8 = vunpack.c.l.b16 %v1283_v61  ;;  %v1287_v20 = vpack.c.bf16 %v1099_v55, %v1099_v55  ;;  %v2908_v61 = vld [vmem:[#allocation13 + $0x20] sm:$0xff]  }
 0x465   :  { %v1102_v58 = vpop.f32.mrb[18].mxu1  ;;  %v2904_v56 = vld [vmem:[#allocation13] sm:$0xff]  }
 0x466   :  { %v2624_v59 = vpop.f32.mrb[19].mxu1  ;;  %v1319_v24 = vunpack.c.l.b16 %v1287_v20  ;;  %v2905_v58 = vld [vmem:[#allocation13 + $0x8] sm:$0xff]  }
 0x467   :  { %v2906_v59 = vld [vmem:[#allocation13 + $0x10] sm:$0xff]  }
 0x468   :  { %v1329_v32 = vrot.slane %v1319_v24, 4 }
 0x469   :  { %v937_v60 = vpop.f32.mrb[8].mxu0 }
 0x46a   :  { %v1284_v62 = vpack.c.bf16 %v937_v60, %v937_v60  ;;  %v2605_v63 = vpop.f32.mrb[9].mxu0  ;;  %v2907_v60 = vld [vmem:[#allocation13 + $0x18] sm:$0xff]  }
 0x46b   :  { %v940_v1 = vpop.f32.mrb[10].mxu0  ;;  %v1207_v2 = vpop.f32.mrb[20].mxu1  ;;  %v2910_v63 = vld [vmem:[#allocation13 + $0x30] sm:$0xff]  }
 0x46c   :  { %v1316_v3 = vunpack.c.l.b16 %v1284_v62  ;;  %v2606_v4 = vpop.f32.mrb[11].mxu0  ;;  %v2635_v5 = vpop.f32.mrb[21].mxu1  ;;  %v1289_v33 = vpack.c.bf16 %v1207_v2, %v1207_v2  ;;  %v2909_v62 = vld [vmem:[#allocation13 + $0x28] sm:$0xff]   ;;  %v2911_v1 = vld [vmem:[#allocation13 + $0x38] sm:$0xff]  }
 0x46d   :  { %v1210_v7 = vpop.f32.mrb[22].mxu1 }
 0x46e   :  { %v1323_v9 = vrot.slane %v1316_v3, 7  ;;  %v2636_v10 = vpop.f32.mrb[23].mxu1  ;;  %v1321_v40 = vunpack.c.l.b16 %v1289_v33 }
 0x470   :  { %v1324_v11 = vsel %vm773_vm2, %v1323_v9, %v1315_v8  ;;  %v1333_v45 = vrot.slane %v1321_v40, 2 }
 0x471   :  { %v991_v12 = vpop.f32.mrb[12].mxu0 }
 0x472   :  { %v1285_v14 = vpack.c.bf16 %v991_v12, %v991_v12  ;;  %v2611_v6 = vpop.f32.mrb[13].mxu0  ;;  %v1594_v12 = vsub.s32 1, %v3368_v30 }
 0x473   :  { %v994_v16 = vpop.f32.mrb[14].mxu0 }
 0x474   :  { %v1317_v17 = vunpack.c.l.b16 %v1285_v14  ;;  %v2612_v19 = vpop.f32.mrb[15].mxu0 }
 0x475   :  { %v1734_v19 = vsub.s32 3, %v3368_v30 }
 0x476   :  { %v1325_v28 = vrot.slane %v1317_v17, 6 }
 0x478   :  { %v1326_v21 = vsel %vm775_vm3, %v1325_v28, %v1324_v11 }
 0x479   :  { %v1045_v31 = vpop.f32.mrb[16].mxu0 }
 0x47a   :  { %v1286_v22 = vpack.c.bf16 %v1045_v31, %v1045_v31  ;;  %v2617_v23 = vpop.f32.mrb[17].mxu0 }
 0x47b   :  { %v1048_v25 = vpop.f32.mrb[18].mxu0 }
 0x47c   :  { %v1318_v26 = vunpack.c.l.b16 %v1286_v22  ;;  %v2618_v27 = vpop.f32.mrb[19].mxu0 }
 0x47e   :  { %v1327_v29 = vrot.slane %v1318_v26, 5 }
 0x480   :  { %v1328_v34 = vsel %vm777_vm4, %v1327_v29, %v1326_v21 }
 0x481   :  { %v1153_v35 = vpop.f32.mrb[20].mxu0  ;;  %v1330_v37 = vsel %vm779_vm5, %v1329_v32, %v1328_v34 }
 0x482   :  { %v1288_v38 = vpack.c.bf16 %v1153_v35, %v1153_v35  ;;  %v2629_v39 = vpop.f32.mrb[21].mxu0 }
 0x483   :  { %v1156_v41 = vpop.f32.mrb[22].mxu0  ;;  %v2912_v39 = vld [vmem:[#allocation8] sm:$0xff]  }
 0x484   :  { %v1320_v42 = vunpack.c.l.b16 %v1288_v38  ;;  %v2630_v43 = vpop.f32.mrb[23].mxu0 }
 0x486   :  { %v1331_v44 = vrot.slane %v1320_v42, 3 }
 0x488   :  { %v1332_v46 = vsel %vm781_vm6, %v1331_v44, %v1330_v37 }
 0x489   :  { %v1261_v47 = vpop.f32.mrb[24].mxu0  ;;  %v1334_v48 = vsel %vm783_vm7, %v1333_v45, %v1332_v46 }
 0x48a   :  { %v1290_v49 = vpack.c.bf16 %v1261_v47, %v1261_v47  ;;  %v2641_v50 = vpop.f32.mrb[25].mxu0 }
 0x48b   :  { %v1264_v51 = vpop.f32.mrb[26].mxu0 }
 0x48c   :  { %v1322_v52 = vunpack.c.l.b16 %v1290_v49  ;;  %v2642_v53 = vpop.f32.mrb[27].mxu0 }
 0x48e   :  { %v1335_v54 = vrot.slane %v1322_v52, 1 }
 0x490   :  { %v1336_v55 = vsel %vm785_vm8, %v1335_v54, %v1334_v48  ;;  %v2913_v54 = vld [vmem:[#allocation8 + $0x10] sm:$0xff]  }
 0x491   :  { %v1337_v57 = vpack.c.b16 %v1336_v55, %v1336_v55 }
 0x493   :  { %2660 = vmatmul.mubr.bf16.vlgmr.msra.gmra.mrb[24].mxu1 %v1337_v57  ;;  %v2914_v57 = vld [vmem:[#allocation8 + $0x8] sm:$0xff]  }
 0x494   :  { %2664 = vmatpush3.bf16.msra.mxu1 %v2904_v56  ;;  %2679 = vmatprep.mubr.msk.bf16.mxu1 %vm3177_vm0, %v3176_v0 }
 0x495   :  { %2665 = vmatprep.subr.bf16.mxu1 %v3176_v0 }
 0x498   :  { %2666 = vmatpush3.bf16.msra.mxu1 %v2905_v58 }
 0x499   :  { %2667 = vmatprep.subr.bf16.mxu1 %v3176_v0 }
 0x49c   :  { %2668 = vmatpush3.bf16.msra.mxu1 %v2906_v59 }
 0x49d   :  { %2669 = vmatprep.subr.bf16.mxu1 %v3176_v0 }
 0x4a0   :  { %2670 = vmatpush3.bf16.msra.mxu1 %v2907_v60 }
 0x4a1   :  { %2671 = vmatprep.subr.bf16.mxu1 %v3176_v0 }
 0x4a4   :  { %2672 = vmatpush3.bf16.msra.mxu1 %v2908_v61 }
 0x4a5   :  { %2673 = vmatprep.subr.bf16.mxu1 %v3176_v0 }
 0x4a8   :  { %2674 = vmatpush3.bf16.msra.mxu1 %v2909_v62 }
 0x4a9   :  { %2675 = vmatprep.subr.bf16.mxu1 %v3176_v0 }
 0x4ac   :  { %2676 = vmatpush3.bf16.msra.mxu1 %v2910_v63 }
 0x4ad   :  { %2677 = vmatprep.subr.bf16.mxu1 %v3176_v0 }
 0x4b0   :  { %2678 = vmatpush3.bf16.msra.mxu1 %v2911_v1 }
 0x4b1   :  { %2723 = vmatprep.subr.bf16.mxu1 %v3176_v0 }
 0x4b3   :  { %2680 = vmatmul.mubr.bf16.vlgmr.msra.gmra.mrb[24].mxu1 %v3358_v18 }
 0x4b4   :  { %2739 = vmatprep.mubr.msk.bf16.mxu1 %vm3177_vm0, %v3176_v0 }
 0x586   :  { %v1509_v2 = vpop.f32.mrb[24].mxu1 }
 0x587   :  { %v1515_v3 = vpack.c.bf16 %v1509_v2, %v1509_v2  ;;  %v2681_v4 = vpop.f32.mrb[25].mxu1 }
 0x588   :  { %v1512_v5 = vpop.f32.mrb[26].mxu1 }
 0x589   :  { %v1517_v7 = vpack.i.b16 %v1515_v3, %v1515_v3  ;;  %v2682_v8 = vpop.f32.mrb[27].mxu1  ;;  %v1554_v10 = vshrl.u32 %v1515_v3, 16 }
 0x58a   :  { %v2915_v8 = vld [vmem:[#allocation8 + $0x20] sm:$0xff]  }
 0x58b   :  { %v1522_v9 = vrot.slane %v1517_v7, %v3375_v36  ;;  %v1555_v11 = vpack.i.b16 %v1554_v10, %v1554_v10  ;;  %v1595_v14 = vrot.slane %v1517_v7, %v1594_v12  ;;  %v1735_v28 = vrot.slane %v1517_v7, %v1734_v19 }
 0x58d   :  { %1528 = vbcast.lane.c.b16.xlu1 %v1522_v9, 272  ;;  %1524 = vbcast.lane.c.b16.xlu0 %v1522_v9, 256  ;;  %v1560_v18 = vrot.slane %v1555_v11, %v3375_v36  ;;  %v1630_v6 = vrot.slane %v1555_v11, %v1594_v12  ;;  %v1664_v36 = vsub.s32 2, %v3368_v30  ;;  %v1770_v20 = vrot.slane %v1555_v11, %v1734_v19 }
 0x58f   :  { %v1665_v16 = vrot.slane %v1517_v7, %v1664_v36  ;;  %v1700_v17 = vrot.slane %v1555_v11, %v1664_v36  ;;  %v2916_v11 = vld [vmem:[#allocation8 + $0x18] sm:$0xff]  }
 0x591   :  { %1532 = vbcast.lane.c.b16.xlu1 %v1522_v9, 288  ;;  %1540 = vbcast.lane.c.b16.xlu0 %v1522_v9, 320 }
 0x595   :  { %1536 = vbcast.lane.c.b16.xlu1 %v1522_v9, 304  ;;  %1548 = vbcast.lane.c.b16.xlu0 %v1522_v9, 352 }
 0x599   :  { %1544 = vbcast.lane.c.b16.xlu1 %v1522_v9, 336  ;;  %1562 = vbcast.lane.c.b16.xlu0 %v1560_v18, 256 }
 0x59d   :  { %1552 = vbcast.lane.c.b16.xlu1 %v1522_v9, 368  ;;  %1570 = vbcast.lane.c.b16.xlu0 %v1560_v18, 288 }
 0x5a1   :  { %1566 = vbcast.lane.c.b16.xlu1 %v1560_v18, 272  ;;  %1578 = vbcast.lane.c.b16.xlu0 %v1560_v18, 320 }
 0x5a5   :  { %1574 = vbcast.lane.c.b16.xlu1 %v1560_v18, 304  ;;  %1586 = vbcast.lane.c.b16.xlu0 %v1560_v18, 352 }
 0x5a9   :  { %1582 = vbcast.lane.c.b16.xlu1 %v1560_v18, 336  ;;  %1597 = vbcast.lane.c.b16.xlu0 %v1595_v14, 256 }
 0x5ad   :  { %1590 = vbcast.lane.c.b16.xlu1 %v1560_v18, 368  ;;  %1601 = vbcast.lane.c.b16.xlu0 %v1595_v14, 272 }
 0x5b1   :  { %1632 = vbcast.lane.c.b16.xlu1 %v1630_v6, 256  ;;  %1605 = vbcast.lane.c.b16.xlu0 %v1595_v14, 288 }
 0x5b5   :  { %1636 = vbcast.lane.c.b16.xlu1 %v1630_v6, 272  ;;  %1609 = vbcast.lane.c.b16.xlu0 %v1595_v14, 304 }
 0x5b9   :  { %1640 = vbcast.lane.c.b16.xlu1 %v1630_v6, 288  ;;  %1613 = vbcast.lane.c.b16.xlu0 %v1595_v14, 320 }
 0x5bd   :  { %1644 = vbcast.lane.c.b16.xlu1 %v1630_v6, 304  ;;  %1617 = vbcast.lane.c.b16.xlu0 %v1595_v14, 336 }
 0x5c1   :  { %1648 = vbcast.lane.c.b16.xlu1 %v1630_v6, 320  ;;  %1621 = vbcast.lane.c.b16.xlu0 %v1595_v14, 352 }
 0x5c5   :  { %1652 = vbcast.lane.c.b16.xlu1 %v1630_v6, 336  ;;  %1625 = vbcast.lane.c.b16.xlu0 %v1595_v14, 368 }
 0x5c9   :  { %1656 = vbcast.lane.c.b16.xlu1 %v1630_v6, 352  ;;  %1667 = vbcast.lane.c.b16.xlu0 %v1665_v16, 256 }
 0x5cd   :  { %1660 = vbcast.lane.c.b16.xlu1 %v1630_v6, 368  ;;  %1671 = vbcast.lane.c.b16.xlu0 %v1665_v16, 272 }
 0x5d1   :  { %1702 = vbcast.lane.c.b16.xlu1 %v1700_v17, 256  ;;  %1675 = vbcast.lane.c.b16.xlu0 %v1665_v16, 288 }
 0x5d5   :  { %1706 = vbcast.lane.c.b16.xlu1 %v1700_v17, 272  ;;  %1679 = vbcast.lane.c.b16.xlu0 %v1665_v16, 304 }
 0x5d9   :  { %1710 = vbcast.lane.c.b16.xlu1 %v1700_v17, 288  ;;  %1683 = vbcast.lane.c.b16.xlu0 %v1665_v16, 320 }
 0x5dd   :  { %1714 = vbcast.lane.c.b16.xlu1 %v1700_v17, 304  ;;  %1687 = vbcast.lane.c.b16.xlu0 %v1665_v16, 336 }
 0x5e1   :  { %1718 = vbcast.lane.c.b16.xlu1 %v1700_v17, 320  ;;  %1691 = vbcast.lane.c.b16.xlu0 %v1665_v16, 352 }
 0x5e5   :  { %1722 = vbcast.lane.c.b16.xlu1 %v1700_v17, 336  ;;  %1695 = vbcast.lane.c.b16.xlu0 %v1665_v16, 368 }
 0x5e9   :  { %1726 = vbcast.lane.c.b16.xlu1 %v1700_v17, 352  ;;  %1737 = vbcast.lane.c.b16.xlu0 %v1735_v28, 256 }
 0x5ed   :  { %1730 = vbcast.lane.c.b16.xlu1 %v1700_v17, 368  ;;  %1741 = vbcast.lane.c.b16.xlu0 %v1735_v28, 272 }
 0x5f1   :  { %1772 = vbcast.lane.c.b16.xlu1 %v1770_v20, 256  ;;  %1745 = vbcast.lane.c.b16.xlu0 %v1735_v28, 288 }
 0x5f5   :  { %1776 = vbcast.lane.c.b16.xlu1 %v1770_v20, 272  ;;  %1749 = vbcast.lane.c.b16.xlu0 %v1735_v28, 304 }
 0x5f9   :  { %1780 = vbcast.lane.c.b16.xlu1 %v1770_v20, 288  ;;  %1753 = vbcast.lane.c.b16.xlu0 %v1735_v28, 320 }
 0x5fd   :  { %1784 = vbcast.lane.c.b16.xlu1 %v1770_v20, 304  ;;  %1757 = vbcast.lane.c.b16.xlu0 %v1735_v28, 336 }
 0x5ff   :  { %v1529_v21 = vpop.permute.xlu1 %1528  ;;  %v1525_v31 = vpop.permute.xlu0 %1524 }
 0x600   :  { %2684 = vmatpush3.bf16.msra.mxu0 %v1525_v31 }
 0x601   :  { %1788 = vbcast.lane.c.b16.xlu1 %v1770_v20, 320  ;;  %1761 = vbcast.lane.c.b16.xlu0 %v1735_v28, 352 }
 0x602   :  { %2685 = vmatprep.subr.bf16.mxu0 %v3176_v0 }
 0x603   :  { %v1533_v30 = vpop.permute.xlu1 %1532  ;;  %v1541_v22 = vpop.permute.xlu0 %1540 }
 0x604   :  { %2686 = vmatpush3.bf16.msra.mxu0 %v1529_v21  ;;  %v3179_v21 = vmov 0  }
 0x605   :  { %1792 = vbcast.lane.c.b16.xlu1 %v1770_v20, 336  ;;  %1765 = vbcast.lane.c.b16.xlu0 %v1735_v28, 368 }
 0x606   :  { %2687 = vmatprep.subr.bf16.mxu0 %v3176_v0  ;;  %2862 = vset.pattern.permute.xlu0 %v3179_v21 }
 0x607   :  { %v1537_v23 = vpop.permute.xlu1 %1536  ;;  %v1549_v24 = vpop.permute.xlu0 %1548  ;;  %2863 = vset.pattern.permute.xlu1 %v3179_v21 }
 0x608   :  { %2688 = vmatpush3.bf16.msra.mxu0 %v1533_v30 }
 0x609   :  { %1796 = vbcast.lane.c.b16.xlu1 %v1770_v20, 352  ;;  %2689 = vmatprep.subr.bf16.mxu0 %v3176_v0 }
 0x60b   :  { %v1545_v25 = vpop.permute.xlu1 %1544  ;;  %v1563_v26 = vpop.permute.xlu0 %1562 }
 0x60c   :  { %2690 = vmatpush3.bf16.msra.mxu0 %v1537_v23  ;;  %v2918_v23 = vld [vmem:[#allocation8 + $0x28] sm:$0xff]  }
 0x60d   :  { %1800 = vbcast.lane.c.b16.xlu1 %v1770_v20, 368  ;;  %2691 = vmatprep.subr.bf16.mxu0 %v3176_v0 }
 0x60f   :  { %v1553_v27 = vpop.permute.xlu1 %1552  ;;  %v1571_v29 = vpop.permute.xlu0 %1570 }
 0x610   :  { %2692 = vmatpush3.bf16.msra.mxu0 %v1541_v22  ;;  %v2917_v22 = vld [vmem:[#allocation8 + $0x30] sm:$0xff]  }
 0x611   :  { %2693 = vmatprep.subr.bf16.mxu0 %v3176_v0 }
 0x613   :  { %v1567_v32 = vpop.permute.xlu1 %1566  ;;  %v1579_v33 = vpop.permute.xlu0 %1578 }
 0x614   :  { %2694 = vmatpush3.bf16.msra.mxu0 %v1545_v25 }
 0x615   :  { %2695 = vmatprep.subr.bf16.mxu0 %v3176_v0 }
 0x617   :  { %v1575_v34 = vpop.permute.xlu1 %1574  ;;  %v1587_v35 = vpop.permute.xlu0 %1586 }
 0x618   :  { %2696 = vmatpush3.bf16.msra.mxu0 %v1549_v24 }
 0x619   :  { %2697 = vmatprep.subr.bf16.mxu0 %v3176_v0 }
 0x61b   :  { %v1583_v37 = vpop.permute.xlu1 %1582  ;;  %v1598_v38 = vpop.permute.xlu0 %1597 }
 0x61c   :  { %2698 = vmatpush3.bf16.msra.mxu0 %v1553_v27  ;;  %2724 = vmatpush3.bf16.msra.mxu1 %v1598_v38 }
 0x61d   :  { %2703 = vmatprep.subr.bf16.mxu0 %v3176_v0  ;;  %2725 = vmatprep.subr.bf16.mxu1 %v3176_v0 }
 0x61f   :  { %v1591_v40 = vpop.permute.xlu1 %1590  ;;  %2700 = vmatmul.mubr.bf16.vlgmr.msra.gmra.mrb[28].mxu0 %v2912_v39  ;;  %v1602_v41 = vpop.permute.xlu0 %1601 }
 0x620   :  { %2704 = vmatpush3.bf16.msra.mxu0 %v1563_v26  ;;  %2726 = vmatpush3.bf16.msra.mxu1 %v1602_v41 }
 0x621   :  { %2705 = vmatprep.subr.bf16.mxu0 %v3176_v0  ;;  %2727 = vmatprep.subr.bf16.mxu1 %v3176_v0 }
 0x622   :  { %2719 = vmatprep.mubr.msk.bf16.mxu0 %vm3177_vm0, %v3176_v0 }
 0x623   :  { %v1633_v42 = vpop.permute.xlu1 %1632  ;;  %v1606_v43 = vpop.permute.xlu0 %1605 }
 0x624   :  { %2706 = vmatpush3.bf16.msra.mxu0 %v1567_v32  ;;  %2728 = vmatpush3.bf16.msra.mxu1 %v1606_v43 }
 0x625   :  { %2707 = vmatprep.subr.bf16.mxu0 %v3176_v0  ;;  %2729 = vmatprep.subr.bf16.mxu1 %v3176_v0 }
 0x627   :  { %v1637_v44 = vpop.permute.xlu1 %1636  ;;  %v1610_v45 = vpop.permute.xlu0 %1609 }
 0x628   :  { %2708 = vmatpush3.bf16.msra.mxu0 %v1571_v29  ;;  %2730 = vmatpush3.bf16.msra.mxu1 %v1610_v45 }
 0x629   :  { %2709 = vmatprep.subr.bf16.mxu0 %v3176_v0  ;;  %2731 = vmatprep.subr.bf16.mxu1 %v3176_v0 }
 0x62b   :  { %v1641_v46 = vpop.permute.xlu1 %1640  ;;  %v1614_v47 = vpop.permute.xlu0 %1613 }
 0x62c   :  { %2710 = vmatpush3.bf16.msra.mxu0 %v1575_v34  ;;  %2732 = vmatpush3.bf16.msra.mxu1 %v1614_v47 }
 0x62d   :  { %2711 = vmatprep.subr.bf16.mxu0 %v3176_v0  ;;  %2733 = vmatprep.subr.bf16.mxu1 %v3176_v0 }
 0x62f   :  { %v1645_v48 = vpop.permute.xlu1 %1644  ;;  %v1618_v49 = vpop.permute.xlu0 %1617 }
 0x630   :  { %2712 = vmatpush3.bf16.msra.mxu0 %v1579_v33  ;;  %2734 = vmatpush3.bf16.msra.mxu1 %v1618_v49  ;;  %v2919_v33 = vld [vmem:[#allocation8 + $0x38] sm:$0xff]  }
 0x631   :  { %2713 = vmatprep.subr.bf16.mxu0 %v3176_v0  ;;  %2735 = vmatprep.subr.bf16.mxu1 %v3176_v0 }
 0x633   :  { %v1649_v50 = vpop.permute.xlu1 %1648  ;;  %v1622_v51 = vpop.permute.xlu0 %1621 }
 0x634   :  { %2714 = vmatpush3.bf16.msra.mxu0 %v1583_v37  ;;  %2736 = vmatpush3.bf16.msra.mxu1 %v1622_v51 }
 0x635   :  { %2715 = vmatprep.subr.bf16.mxu0 %v3176_v0  ;;  %2737 = vmatprep.subr.bf16.mxu1 %v3176_v0 }
 0x637   :  { %v1653_v52 = vpop.permute.xlu1 %1652  ;;  %v1626_v53 = vpop.permute.xlu0 %1625 }
 0x638   :  { %2716 = vmatpush3.bf16.msra.mxu0 %v1587_v35  ;;  %2738 = vmatpush3.bf16.msra.mxu1 %v1626_v53 }
 0x639   :  { %2717 = vmatprep.subr.bf16.mxu0 %v3176_v0  ;;  %2763 = vmatprep.subr.bf16.mxu1 %v3176_v0 }
 0x63b   :  { %v1657_v55 = vpop.permute.xlu1 %1656  ;;  %2740 = vmatmul.mubr.bf16.vlgmr.msra.gmra.mrb[28].mxu1 %v2913_v54  ;;  %v1668_v56 = vpop.permute.xlu0 %1667 }
 0x63c   :  { %2718 = vmatpush3.bf16.msra.mxu0 %v1591_v40  ;;  %2764 = vmatpush3.bf16.msra.mxu1 %v1668_v56 }
 0x63d   :  { %2743 = vmatprep.subr.bf16.mxu0 %v3176_v0  ;;  %2765 = vmatprep.subr.bf16.mxu1 %v3176_v0 }
 0x63e   :  { %2779 = vmatprep.mubr.msk.bf16.mxu1 %vm3177_vm0, %v3176_v0 }
 0x63f   :  { %v1661_v58 = vpop.permute.xlu1 %1660  ;;  %2720 = vmatmul.mubr.bf16.vlgmr.msra.gmra.mrb[32].mxu0 %v2914_v57  ;;  %v1672_v59 = vpop.permute.xlu0 %1671 }
 0x640   :  { %2744 = vmatpush3.bf16.msra.mxu0 %v1633_v42  ;;  %2766 = vmatpush3.bf16.msra.mxu1 %v1672_v59 }
 0x641   :  { %2745 = vmatprep.subr.bf16.mxu0 %v3176_v0  ;;  %2767 = vmatprep.subr.bf16.mxu1 %v3176_v0 }
 0x642   :  { %2759 = vmatprep.mubr.msk.bf16.mxu0 %vm3177_vm0, %v3176_v0 }
 0x643   :  { %v1703_v60 = vpop.permute.xlu1 %1702  ;;  %v1676_v61 = vpop.permute.xlu0 %1675 }
 0x644   :  { %2746 = vmatpush3.bf16.msra.mxu0 %v1637_v44  ;;  %2768 = vmatpush3.bf16.msra.mxu1 %v1676_v61 }
 0x645   :  { %2747 = vmatprep.subr.bf16.mxu0 %v3176_v0  ;;  %2769 = vmatprep.subr.bf16.mxu1 %v3176_v0 }
 0x647   :  { %v1707_v62 = vpop.permute.xlu1 %1706  ;;  %v1680_v63 = vpop.permute.xlu0 %1679 }
 0x648   :  { %2748 = vmatpush3.bf16.msra.mxu0 %v1641_v46  ;;  %2770 = vmatpush3.bf16.msra.mxu1 %v1680_v63 }
 0x649   :  { %2749 = vmatprep.subr.bf16.mxu0 %v3176_v0  ;;  %2771 = vmatprep.subr.bf16.mxu1 %v3176_v0 }
 0x64b   :  { %v1684_v1 = vpop.permute.xlu0 %1683  ;;  %v1711_v2 = vpop.permute.xlu1 %1710 }
 0x64c   :  { %2750 = vmatpush3.bf16.msra.mxu0 %v1645_v48  ;;  %2772 = vmatpush3.bf16.msra.mxu1 %v1684_v1 }
 0x64d   :  { %2751 = vmatprep.subr.bf16.mxu0 %v3176_v0  ;;  %2773 = vmatprep.subr.bf16.mxu1 %v3176_v0 }
 0x64f   :  { %v1688_v3 = vpop.permute.xlu0 %1687  ;;  %v1715_v4 = vpop.permute.xlu1 %1714 }
 0x650   :  { %2752 = vmatpush3.bf16.msra.mxu0 %v1649_v50  ;;  %2774 = vmatpush3.bf16.msra.mxu1 %v1688_v3 }
 0x651   :  { %2753 = vmatprep.subr.bf16.mxu0 %v3176_v0  ;;  %2775 = vmatprep.subr.bf16.mxu1 %v3176_v0 }
 0x653   :  { %v1692_v5 = vpop.permute.xlu0 %1691  ;;  %v1719_v9 = vpop.permute.xlu1 %1718 }
 0x654   :  { %2754 = vmatpush3.bf16.msra.mxu0 %v1653_v52  ;;  %2776 = vmatpush3.bf16.msra.mxu1 %v1692_v5 }
 0x655   :  { %2755 = vmatprep.subr.bf16.mxu0 %v3176_v0  ;;  %2777 = vmatprep.subr.bf16.mxu1 %v3176_v0 }
 0x657   :  { %v1696_v7 = vpop.permute.xlu0 %1695  ;;  %v1723_v18 = vpop.permute.xlu1 %1722 }
 0x658   :  { %2756 = vmatpush3.bf16.msra.mxu0 %v1657_v55  ;;  %2778 = vmatpush3.bf16.msra.mxu1 %v1696_v7 }
 0x659   :  { %2757 = vmatprep.subr.bf16.mxu0 %v3176_v0  ;;  %2803 = vmatprep.subr.bf16.mxu1 %v3176_v0 }
 0x65b   :  { %2780 = vmatmul.mubr.bf16.vlgmr.msra.gmra.mrb[32].mxu1 %v2915_v8  ;;  %v1738_v10 = vpop.permute.xlu0 %1737  ;;  %v1727_v6 = vpop.permute.xlu1 %1726 }
 0x65c   :  { %2758 = vmatpush3.bf16.msra.mxu0 %v1661_v58  ;;  %2804 = vmatpush3.bf16.msra.mxu1 %v1738_v10 }
 0x65d   :  { %2783 = vmatprep.subr.bf16.mxu0 %v3176_v0  ;;  %2805 = vmatprep.subr.bf16.mxu1 %v3176_v0 }
 0x65e   :  { %2819 = vmatprep.mubr.msk.bf16.mxu1 %vm3177_vm0, %v3176_v0 }
 0x65f   :  { %2760 = vmatmul.mubr.bf16.vlgmr.msra.gmra.mrb[36].mxu0 %v2916_v11  ;;  %v1742_v12 = vpop.permute.xlu0 %1741  ;;  %v1731_v16 = vpop.permute.xlu1 %1730 }
 0x660   :  { %2784 = vmatpush3.bf16.msra.mxu0 %v1703_v60  ;;  %2806 = vmatpush3.bf16.msra.mxu1 %v1742_v12 }
 0x661   :  { %2785 = vmatprep.subr.bf16.mxu0 %v3176_v0  ;;  %2807 = vmatprep.subr.bf16.mxu1 %v3176_v0 }
 0x662   :  { %2799 = vmatprep.mubr.msk.bf16.mxu0 %vm3177_vm0, %v3176_v0 }
 0x663   :  { %v1746_v14 = vpop.permute.xlu0 %1745  ;;  %v1773_v28 = vpop.permute.xlu1 %1772 }
 0x664   :  { %2786 = vmatpush3.bf16.msra.mxu0 %v1707_v62  ;;  %2808 = vmatpush3.bf16.msra.mxu1 %v1746_v14 }
 0x665   :  { %2787 = vmatprep.subr.bf16.mxu0 %v3176_v0  ;;  %2809 = vmatprep.subr.bf16.mxu1 %v3176_v0 }
 0x667   :  { %v1750_v36 = vpop.permute.xlu0 %1749  ;;  %v1777_v31 = vpop.permute.xlu1 %1776 }
 0x668   :  { %2788 = vmatpush3.bf16.msra.mxu0 %v1711_v2  ;;  %2810 = vmatpush3.bf16.msra.mxu1 %v1750_v36 }
 0x669   :  { %2789 = vmatprep.subr.bf16.mxu0 %v3176_v0  ;;  %2811 = vmatprep.subr.bf16.mxu1 %v3176_v0 }
 0x66b   :  { %v1754_v17 = vpop.permute.xlu0 %1753  ;;  %v1781_v24 = vpop.permute.xlu1 %1780 }
 0x66c   :  { %2790 = vmatpush3.bf16.msra.mxu0 %v1715_v4  ;;  %2812 = vmatpush3.bf16.msra.mxu1 %v1754_v17 }
 0x66d   :  { %2791 = vmatprep.subr.bf16.mxu0 %v3176_v0  ;;  %2813 = vmatprep.subr.bf16.mxu1 %v3176_v0 }
 0x66f   :  { %v1758_v19 = vpop.permute.xlu0 %1757  ;;  %v1785_v25 = vpop.permute.xlu1 %1784 }
 0x670   :  { %2792 = vmatpush3.bf16.msra.mxu0 %v1719_v9  ;;  %2814 = vmatpush3.bf16.msra.mxu1 %v1758_v19 }
 0x671   :  { %2793 = vmatprep.subr.bf16.mxu0 %v3176_v0  ;;  %2815 = vmatprep.subr.bf16.mxu1 %v3176_v0 }
 0x673   :  { %v1762_v20 = vpop.permute.xlu0 %1761  ;;  %v1789_v26 = vpop.permute.xlu1 %1788 }
 0x674   :  { %2794 = vmatpush3.bf16.msra.mxu0 %v1723_v18  ;;  %2816 = vmatpush3.bf16.msra.mxu1 %v1762_v20 }
 0x675   :  { %2795 = vmatprep.subr.bf16.mxu0 %v3176_v0  ;;  %2817 = vmatprep.subr.bf16.mxu1 %v3176_v0 }
 0x677   :  { %v1766_v30 = vpop.permute.xlu0 %1765  ;;  %v1793_v27 = vpop.permute.xlu1 %1792 }
 0x678   :  { %2796 = vmatpush3.bf16.msra.mxu0 %v1727_v6  ;;  %2818 = vmatpush3.bf16.msra.mxu1 %v1766_v30 }
 0x679   :  { %2797 = vmatprep.subr.bf16.mxu0 %v3176_v0 }
 0x67b   :  { %2820 = vmatmul.mubr.bf16.vlgmr.msra.gmra.mrb[36].mxu1 %v2917_v22  ;;  %v1797_v29 = vpop.permute.xlu1 %1796 }
 0x67c   :  { %2798 = vmatpush3.bf16.msra.mxu0 %v1731_v16 }
 0x67d   :  { %2823 = vmatprep.subr.bf16.mxu0 %v3176_v0 }
 0x67f   :  { %2800 = vmatmul.mubr.bf16.vlgmr.msra.gmra.mrb[40].mxu0 %v2918_v23  ;;  %v1801_v32 = vpop.permute.xlu1 %1800 }
 0x680   :  { %2824 = vmatpush3.bf16.msra.mxu0 %v1773_v28  ;;  %2839 = vmatprep.mubr.msk.bf16.mxu0 %vm3177_vm0, %v3176_v0 }
 0x681   :  { %2825 = vmatprep.subr.bf16.mxu0 %v3176_v0 }
 0x684   :  { %2826 = vmatpush3.bf16.msra.mxu0 %v1777_v31 }
 0x685   :  { %2827 = vmatprep.subr.bf16.mxu0 %v3176_v0 }
 0x688   :  { %2828 = vmatpush3.bf16.msra.mxu0 %v1781_v24 }
 0x689   :  { %2829 = vmatprep.subr.bf16.mxu0 %v3176_v0 }
 0x68c   :  { %2830 = vmatpush3.bf16.msra.mxu0 %v1785_v25 }
 0x68d   :  { %2831 = vmatprep.subr.bf16.mxu0 %v3176_v0 }
 0x690   :  { %2832 = vmatpush3.bf16.msra.mxu0 %v1789_v26 }
 0x691   :  { %2833 = vmatprep.subr.bf16.mxu0 %v3176_v0 }
 0x694   :  { %2834 = vmatpush3.bf16.msra.mxu0 %v1793_v27 }
 0x695   :  { %2835 = vmatprep.subr.bf16.mxu0 %v3176_v0 }
 0x698   :  { %2836 = vmatpush3.bf16.msra.mxu0 %v1797_v29 }
 0x699   :  { %2837 = vmatprep.subr.bf16.mxu0 %v3176_v0 }
 0x69c   :  { %2838 = vmatpush3.bf16.msra.mxu0 %v1801_v32 }
 0x69f   :  { %2840 = vmatmul.mubr.bf16.vlgmr.msra.gmra.mrb[44].mxu0 %v2919_v33 }
 0x6f2   :  { %v1842_v34 = vpop.f32.mrb[28].mxu0 }
 0x6f3   :  { %v2701_v35 = vpop.f32.mrb[29].mxu0  ;;  %2195 = vperm.xlu0 %2862, %v1842_v34  }
 0x6f4   :  { %v1845_v37 = vpop.f32.mrb[30].mxu0 }
 0x6f5   :  { %v2702_v38 = vpop.f32.mrb[31].mxu0 }
 0x70e   :  { %v1936_v39 = vpop.f32.mrb[28].mxu1 }
 0x70f   :  { %2207 = vperm.xlu1 %2863, %v1936_v39   ;;  %v2741_v40 = vpop.f32.mrb[29].mxu1 }
 0x710   :  { %v1939_v41 = vpop.f32.mrb[30].mxu1 }
 0x711   :  { %2210 = vperm.xlu0 %2862, %v1939_v41   ;;  %v2742_v42 = vpop.f32.mrb[31].mxu1 }
 0x712   :  { %v1889_v43 = vpop.f32.mrb[32].mxu0 }
 0x713   :  { %2198 = vperm.xlu1 %2863, %v1845_v37   ;;  %v2721_v44 = vpop.f32.mrb[33].mxu0 }
 0x714   :  { %v1892_v45 = vpop.f32.mrb[34].mxu0 }
 0x715   :  { %2204 = vperm.xlu0 %2862, %v1892_v45   ;;  %v2722_v0 = vpop.f32.mrb[35].mxu0 }
 0x717   :  { %2201 = vperm.xlu1 %2863, %v1889_v43  }
 0x72e   :  { %v2030_v46 = vpop.f32.mrb[32].mxu1 }
 0x72f   :  { %v2781_v47 = vpop.f32.mrb[33].mxu1  ;;  %2219 = vperm.xlu1 %2863, %v2030_v46  }
 0x730   :  { %v2033_v48 = vpop.f32.mrb[34].mxu1 }
 0x731   :  { %2222 = vperm.xlu0 %2862, %v2033_v48   ;;  %v2782_v49 = vpop.f32.mrb[35].mxu1 }
 0x732   :  { %v1983_v50 = vpop.f32.mrb[36].mxu0 }
 0x733   :  { %v2761_v51 = vpop.f32.mrb[37].mxu0  ;;  %2213 = vperm.xlu1 %2863, %v1983_v50  }
 0x734   :  { %v1986_v52 = vpop.f32.mrb[38].mxu0 }
 0x735   :  { %2216 = vperm.xlu0 %2862, %v1986_v52   ;;  %v2762_v53 = vpop.f32.mrb[39].mxu0 }
 0x74e   :  { %v2124_v54 = vpop.f32.mrb[36].mxu1 }
 0x74f   :  { %v2821_v55 = vpop.f32.mrb[37].mxu1  ;;  %2231 = vperm.xlu1 %2863, %v2124_v54  }
 0x750   :  { %v2127_v56 = vpop.f32.mrb[38].mxu1 }
 0x751   :  { %2234 = vperm.xlu0 %2862, %v2127_v56   ;;  %v2822_v57 = vpop.f32.mrb[39].mxu1 }
 0x752   :  { %v2077_v58 = vpop.f32.mrb[40].mxu0 }
 0x753   :  { %v2801_v59 = vpop.f32.mrb[41].mxu0  ;;  %2225 = vperm.xlu1 %2863, %v2077_v58  }
 0x754   :  { %v2080_v60 = vpop.f32.mrb[42].mxu0 }
 0x755   :  { %2228 = vperm.xlu0 %2862, %v2080_v60   ;;  %v2802_v61 = vpop.f32.mrb[43].mxu0 }
 0x772   :  { %v2171_v62 = vpop.f32.mrb[44].mxu0  ;;  %v2196_v4 = vpop.permute.xlu0 %2195 }
 0x773   :  { %2237 = vperm.xlu1 %2863, %v2171_v62   ;;  %v2841_v63 = vpop.f32.mrb[45].mxu0  ;;  %v2245_v20 = vrot.slane %v2196_v4, %v3416_v15 }
 0x774   :  { %v2174_v1 = vpop.f32.mrb[46].mxu0 }
 0x775   :  { %2240 = vperm.xlu0 %2862, %v2174_v1   ;;  %v2842_v2 = vpop.f32.mrb[47].mxu0 }
 0x78e   :  { %v2208_v3 = vpop.permute.xlu1 %2207 }
 0x78f   :  { %v2263_v19 = vrot.slane %v2208_v3, %v3416_v15 }
 0x790   :  { %v2211_v5 = vpop.permute.xlu0 %2210 }
 0x791   :  { %v2267_v28 = vrot.slane %v2211_v5, %v3413_v13 }
 0x792   :  { %v2199_v7 = vpop.permute.xlu1 %2198 }
 0x793   :  { %v2249_v16 = vrot.slane %v2199_v7, %v3413_v13  ;;  %v2268_v25 = vsel %vm708_vm1, %v2267_v28, %v2263_v19 }
 0x794   :  { %v2205_v8 = vpop.permute.xlu0 %2204 }
 0x795   :  { %v2258_v17 = vrot.slane %v2205_v8, %v3413_v13  ;;  %v2250_v24 = vsel %vm708_vm1, %v2249_v16, %v2245_v20 }
 0x796   :  { %v2202_v9 = vpop.permute.xlu1 %2201 }
 0x797   :  { %v2254_v36 = vrot.slane %v2202_v9, %v3416_v15 }
 0x799   :  { %v2259_v21 = vsel %vm708_vm1, %v2258_v17, %v2254_v36 }
 0x79a   :  { %v2314_v26 = vsel %vm773_vm2, %v2259_v21, %v2250_v24 }
 0x79b   :  { %v2315_v35 = vsel %vm775_vm3, %v2268_v25, %v2314_v26 }
 0x7ae   :  { %v2220_v10 = vpop.permute.xlu1 %2219 }
 0x7af   :  { %v2281_v27 = vrot.slane %v2220_v10, %v3416_v15 }
 0x7b0   :  { %v2223_v11 = vpop.permute.xlu0 %2222 }
 0x7b1   :  { %v2285_v29 = vrot.slane %v2223_v11, %v3413_v13 }
 0x7b2   :  { %v2214_v18 = vpop.permute.xlu1 %2213 }
 0x7b3   :  { %v2272_v31 = vrot.slane %v2214_v18, %v3416_v15  ;;  %v2286_v37 = vsel %vm708_vm1, %v2285_v29, %v2281_v27 }
 0x7b4   :  { %v2217_v12 = vpop.permute.xlu0 %2216 }
 0x7b5   :  { %v2276_v30 = vrot.slane %v2217_v12, %v3413_v13 }
 0x7b7   :  { %v2277_v32 = vsel %vm708_vm1, %v2276_v30, %v2272_v31 }
 0x7b8   :  { %v2316_v38 = vsel %vm777_vm4, %v2277_v32, %v2315_v35 }
 0x7b9   :  { %v2317_v43 = vsel %vm779_vm5, %v2286_v37, %v2316_v38 }
 0x7ce   :  { %v2232_v14 = vpop.permute.xlu1 %2231 }
 0x7cf   :  { %v2299_v39 = vrot.slane %v2232_v14, %v3416_v15 }
 0x7d0   :  { %v2235_v6 = vpop.permute.xlu0 %2234 }
 0x7d1   :  { %v2303_v40 = vrot.slane %v2235_v6, %v3413_v13 }
 0x7d2   :  { %v2226_v22 = vpop.permute.xlu1 %2225 }
 0x7d3   :  { %v2290_v33 = vrot.slane %v2226_v22, %v3416_v15  ;;  %v2304_v44 = vsel %vm708_vm1, %v2303_v40, %v2299_v39 }
 0x7d4   :  { %v2229_v23 = vpop.permute.xlu0 %2228 }
 0x7d5   :  { %v2294_v34 = vrot.slane %v2229_v23, %v3413_v13 }
 0x7d7   :  { %v2295_v41 = vsel %vm708_vm1, %v2294_v34, %v2290_v33 }
 0x7d8   :  { %v2318_v45 = vsel %vm781_vm6, %v2295_v41, %v2317_v43 }
 0x7d9   :  { %v2319_v49 = vsel %vm783_vm7, %v2304_v44, %v2318_v45 }
 0x7f2   :  { %v2238_v42 = vpop.permute.xlu1 %2237 }
 0x7f3   :  { %v2308_v46 = vrot.slane %v2238_v42, %v3416_v15 }
 0x7f4   :  { %v2241_v0 = vpop.permute.xlu0 %2240 }
 0x7f5   :  { %v2312_v47 = vrot.slane %v2241_v0, %v3413_v13 }
 0x7f7   :  { %v2313_v48 = vsel %vm708_vm1, %v2312_v47, %v2308_v46 }
 0x7f8   :  { %v2320_v50 = vsel %vm785_vm8, %v2313_v48, %v2319_v49 }
 0x7f9   :  { %v2322_v51 = vsel %vm789_vm10, %v2320_v50, 0.0 }
 0x7fa   :  { %2323 = vst [vmem:[#allocation16] sm:$0xff] %v2322_v51 }
 0x7fb   :  { %3143 = shalt.err (!%p3140_p12)
}
 0x7fc   :  { %s3144_s16 = scalar_lea.hbm %s3654_s9, 128 }
 0x7fd   :  { %p3145_p13 = scmp.ne.s32.totalorder %s3654_s9, %s3144_s16  ;;  %p3148_p0 = scmp.lt.u32.totalorder %s3144_s16, %s3654_s9 }
 0x7ff   :  { %p3150_p1 = pnand %p3148_p0, %p3145_p13 }
 0x801   :  { %3153 = shalt.err (!%p3150_p1)
}
 0x802   :  { %2333 = dma.vmem_to_hbm [thread:$0]  %s2331_s20, 128, %s3654_s9, [#allocation4]  }
 0x803   :  { %3164 = dma.done.wait [#allocation4], 128  }
 0x804   :  { %3165 = vsyncadd [#allocation4], 4294967168 }
 0x805   :  { %2337 = vsyncpa [#allocation3], 1 }
 0x806   :  { %2338 = vsyncpa [#allocation6], 1 }
 0x807   :  { %2339 = vsyncpa [#allocation9], 1 }
 0x808   :  { %2340 = vsyncpa [#allocation12], 1 }
 0x809   :  { %2341 = vsyncpa [#allocation15], 1 }
 0x80a   :  { %2342 = vsyncpa [#allocation4], 1 }

// kernel: tpu_custom_call.1
= control target key start
LH: loop header
LB: loop body
LE: loop exit
PB: predicated region body
PF: predicated region fallthrough
CT: control target
= control target key end

     0   :  { %14 = vsyncpa [#allocation3], 0  ;;  %s3645_s0 = inlined_call_operand.hbm [shape: bf16[8,128], index: 0, kind: input, shape index: {}]   ;;  %s3646_s1 = inlined_call_operand.hbm [shape: bf16[8,16,128], index: 1, kind: input, shape index: {}]   ;;  %s3647_s2 = inlined_call_operand.hbm [shape: bf16[8,16,128], index: 2, kind: input, shape index: {}]   ;;  %s3648_s3 = inlined_call_operand.hbm [shape: bf16[8,16,128], index: 3, kind: input, shape index: {}]   ;;  %s3649_s4 = inlined_call_operand.hbm [shape: bf16[128,128], index: 4, kind: input, shape index: {}]   ;;  %s3650_s5 = inlined_call_operand.hbm [shape: bf16[128,128], index: 5, kind: input, shape index: {}]   ;;  %s3651_s6 = inlined_call_operand.vmem [shape: f32[1,128], index: 6, kind: input, shape index: {}]   ;;  %s3652_s7 = inlined_call_operand.hbm [shape: bf16[128,128], index: 7, kind: input, shape index: {}]   ;;  %s3653_s8 = inlined_call_operand.hbm [shape: bf16[128,128], index: 8, kind: input, shape index: {}]   ;;  %s3654_s9 = inlined_call_operand.hbm [shape: f32[8,128], index: 9, kind: output, shape index: {}]  }
   0x1   :  { %15 = vsyncpa [#allocation6], 0 }
   0x2   :  { %16 = vsyncpa [#allocation9], 0 }
   0x3   :  { %17 = vsyncpa [#allocation12], 0 }
   0x4   :  { %18 = vsyncpa [#allocation15], 0 }
   0x5   :  { %19 = vsyncpa [#allocation4], 0  ;;  %s3166_s30 = smov [#allocation5]   ;;  %s2956_s13 = scalar_lea.hbm %s3646_s1, 1024 }
   0x6   :  { %s35_s10 = sshll.u32 %s3166_s30, 4  ;;  %p2957_p0 = scmp.ne.s32.totalorder %s3646_s1, %s2956_s13  ;;  %s36_s10 = int_to_ptr.vmem [resolvable:$true] %s35_s10 }
   0x7   :  { %p2960_p1 = scmp.lt.u32.totalorder %s2956_s13, %s3646_s1 }
   0x9   :  { %p2962_p2 = pnand %p2960_p1, %p2957_p0 }
   0xb   :  { %2965 = shalt.err (!%p2962_p2)
}
   0xc   :  { %s2966_s18 = scalar_lea.vmem %s36_s10, 1024  ;;  %p2971_p4 = scmp.lt.s32.totalorder %s36_s10, %s36_s10 }
   0xd   :  { %p2967_p3 = scmp.ne.s32.totalorder %s36_s10, %s2966_s18  ;;  %p2972_p5 = scmp.lt.s32.totalorder %s2966_s18, %s2966_s18 }
   0xf   :  { %p2973_p6 = por %p2972_p5, %p2971_p4 }
  0x11   :  { %p2974_p7 = pnand %p2973_p6, %p2967_p3 }
  0x13   :  { %2977 = shalt.err (!%p2974_p7)
}
  0x14   :  { %s3167_s19 = smov 64   ;;  %s3168_s20 = smov 4  }
  0x15   :  { %41 = dma.hbm_to_vmem [thread:$0]  %s3646_s1, 1024, %s36_s10, [#allocation6], %s3167_s19, %s3167_s19, %s3168_s20  }
  0x16   :  { %s3169_s23 = smov [#allocation8]   ;;  %s3170_s25 = smov [#allocation11]  }
  0x17   :  { %s59_s24 = sshll.u32 %s3169_s23, 4  ;;  %s83_s26 = sshll.u32 %s3170_s25, 4  ;;  %s60_s24 = int_to_ptr.vmem [resolvable:$true] %s59_s24  ;;  %s84_s26 = int_to_ptr.vmem [resolvable:$true] %s83_s26 }
  0x18   :  { %s2978_s29 = scalar_lea.hbm %s3648_s3, 1024 }
  0x19   :  { %p2979_p8 = scmp.ne.s32.totalorder %s3648_s3, %s2978_s29  ;;  %p2982_p9 = scmp.lt.u32.totalorder %s2978_s29, %s3648_s3 }
  0x1b   :  { %p2984_p10 = pnand %p2982_p9, %p2979_p8 }
  0x1d   :  { %2987 = shalt.err (!%p2984_p10)
}
  0x1e   :  { %s2988_s1 = scalar_lea.vmem %s60_s24, 1024  ;;  %p2993_p12 = scmp.lt.s32.totalorder %s60_s24, %s60_s24 }
  0x1f   :  { %p2989_p11 = scmp.ne.s32.totalorder %s60_s24, %s2988_s1  ;;  %p2994_p13 = scmp.lt.s32.totalorder %s2988_s1, %s2988_s1 }
  0x21   :  { %p2995_p0 = por %p2994_p13, %p2993_p12 }
  0x23   :  { %p2996_p1 = pnand %p2995_p0, %p2989_p11 }
  0x25   :  { %2999 = shalt.err (!%p2996_p1)
}
  0x26   :  { %65 = dma.hbm_to_vmem [thread:$0]  %s3648_s3, 1024, %s60_s24, [#allocation9], %s3167_s19, %s3167_s19, %s3168_s20  }
  0x27   :  { %s3000_s17 = scalar_lea.hbm %s3650_s5, 1024 }
  0x28   :  { %p3001_p2 = scmp.ne.s32.totalorder %s3650_s5, %s3000_s17  ;;  %p3004_p3 = scmp.lt.u32.totalorder %s3000_s17, %s3650_s5 }
  0x2a   :  { %p3006_p4 = pnand %p3004_p3, %p3001_p2 }
  0x2c   :  { %3009 = shalt.err (!%p3006_p4)
}
  0x2d   :  { %s3010_s25 = scalar_lea.vmem %s84_s26, 1024  ;;  %p3015_p6 = scmp.lt.s32.totalorder %s84_s26, %s84_s26 }
  0x2e   :  { %p3011_p5 = scmp.ne.s32.totalorder %s84_s26, %s3010_s25  ;;  %p3016_p7 = scmp.lt.s32.totalorder %s3010_s25, %s3010_s25 }
  0x30   :  { %p3017_p8 = por %p3016_p7, %p3015_p6 }
  0x32   :  { %p3018_p9 = pnand %p3017_p8, %p3011_p5 }
  0x34   :  { %3021 = shalt.err (!%p3018_p9)
}
  0x35   :  { %89 = dma.hbm_to_vmem [thread:$0]  %s3650_s5, 1024, %s84_s26, [#allocation12], %s3167_s19, %s3167_s19, %s3168_s20  }
  0x36   :  { %s3171_s27 = smov [#allocation2]   ;;  %s3172_s29 = smov [#allocation7]  }
  0x37   :  { %s26_s28 = sshll.u32 %s3171_s27, 4  ;;  %s47_s30 = sshll.u32 %s3172_s29, 4  ;;  %s27_s28 = int_to_ptr.vmem [resolvable:$true] %s26_s28  ;;  %s48_s30 = int_to_ptr.vmem [resolvable:$true] %s47_s30 }
  0x38   :  { %s3022_s13 = scalar_lea.hbm %s3645_s0, 64 }
  0x39   :  { %p3023_p10 = scmp.ne.s32.totalorder %s3645_s0, %s3022_s13  ;;  %p3026_p11 = scmp.lt.u32.totalorder %s3022_s13, %s3645_s0 }
  0x3b   :  { %p3028_p12 = pnand %p3026_p11, %p3023_p10 }
  0x3d   :  { %3031 = shalt.err (!%p3028_p12)
}
  0x3e   :  { %s3032_s5 = scalar_lea.vmem %s27_s28, 64  ;;  %p3037_p0 = scmp.lt.s32.totalorder %s27_s28, %s27_s28 }
  0x3f   :  { %p3033_p13 = scmp.ne.s32.totalorder %s27_s28, %s3032_s5  ;;  %p3038_p1 = scmp.lt.s32.totalorder %s3032_s5, %s3032_s5 }
  0x41   :  { %p3039_p2 = por %p3038_p1, %p3037_p0 }
  0x43   :  { %p3040_p3 = pnand %p3039_p2, %p3033_p13 }
  0x45   :  { %3043 = shalt.err (!%p3040_p3)
}
  0x46   :  { %29 = dma.hbm_to_vmem [thread:$0]  %s3645_s0, 64, %s27_s28, [#allocation3]  }
  0x47   :  { %s3044_s21 = scalar_lea.hbm %s3647_s2, 1024 }
  0x48   :  { %p3045_p4 = scmp.ne.s32.totalorder %s3647_s2, %s3044_s21  ;;  %p3048_p5 = scmp.lt.u32.totalorder %s3044_s21, %s3647_s2 }
  0x4a   :  { %p3050_p6 = pnand %p3048_p5, %p3045_p4 }
  0x4c   :  { %3053 = shalt.err (!%p3050_p6)
}
  0x4d   :  { %s3054_s24 = scalar_lea.vmem %s48_s30, 1024  ;;  %p3059_p8 = scmp.lt.s32.totalorder %s48_s30, %s48_s30 }
  0x4e   :  { %p3055_p7 = scmp.ne.s32.totalorder %s48_s30, %s3054_s24  ;;  %p3060_p9 = scmp.lt.s32.totalorder %s3054_s24, %s3054_s24 }
  0x50   :  { %p3061_p10 = por %p3060_p9, %p3059_p8 }
  0x52   :  { %p3062_p11 = pnand %p3061_p10, %p3055_p7 }
  0x54   :  { %3065 = shalt.err (!%p3062_p11)
}
  0x55   :  { %53 = dma.hbm_to_vmem [thread:$0]  %s3647_s2, 1024, %s48_s30, [#allocation6], %s3167_s19, %s3167_s19, %s3168_s20  }
  0x56   :  { %s3173_s28 = smov [#allocation10]   ;;  %s3174_s11 = smov [#allocation13]  }
  0x57   :  { %s71_s29 = sshll.u32 %s3173_s28, 4  ;;  %s97_s12 = sshll.u32 %s3174_s11, 4  ;;  %s72_s29 = int_to_ptr.vmem [resolvable:$true] %s71_s29  ;;  %s98_s12 = int_to_ptr.vmem [resolvable:$true] %s97_s12 }
  0x58   :  { %s3066_s10 = scalar_lea.hbm %s3649_s4, 1024 }
  0x59   :  { %p3067_p12 = scmp.ne.s32.totalorder %s3649_s4, %s3066_s10  ;;  %p3070_p13 = scmp.lt.u32.totalorder %s3066_s10, %s3649_s4 }
  0x5b   :  { %p3072_p0 = pnand %p3070_p13, %p3067_p12 }
  0x5d   :  { %3075 = shalt.err (!%p3072_p0)
}
  0x5e   :  { %s3076_s2 = scalar_lea.vmem %s72_s29, 1024  ;;  %p3081_p2 = scmp.lt.s32.totalorder %s72_s29, %s72_s29 }
  0x5f   :  { %p3077_p1 = scmp.ne.s32.totalorder %s72_s29, %s3076_s2  ;;  %p3082_p3 = scmp.lt.s32.totalorder %s3076_s2, %s3076_s2 }
  0x61   :  { %p3083_p4 = por %p3082_p3, %p3081_p2 }
  0x63   :  { %p3084_p5 = pnand %p3083_p4, %p3077_p1 }
  0x65   :  { %3087 = shalt.err (!%p3084_p5)
}
  0x66   :  { %77 = dma.hbm_to_vmem [thread:$0]  %s3649_s4, 1024, %s72_s29, [#allocation9], %s3167_s19, %s3167_s19, %s3168_s20  }
  0x67   :  { %s3088_s21 = scalar_lea.hbm %s3652_s7, 1024 }
  0x68   :  { %p3089_p6 = scmp.ne.s32.totalorder %s3652_s7, %s3088_s21  ;;  %p3092_p7 = scmp.lt.u32.totalorder %s3088_s21, %s3652_s7 }
  0x6a   :  { %p3094_p8 = pnand %p3092_p7, %p3089_p6 }
  0x6c   :  { %3097 = shalt.err (!%p3094_p8)
}
  0x6d   :  { %s3098_s24 = scalar_lea.vmem %s98_s12, 1024  ;;  %p3103_p10 = scmp.lt.s32.totalorder %s98_s12, %s98_s12 }
  0x6e   :  { %p3099_p9 = scmp.ne.s32.totalorder %s98_s12, %s3098_s24  ;;  %p3104_p11 = scmp.lt.s32.totalorder %s3098_s24, %s3098_s24 }
  0x70   :  { %p3105_p12 = por %p3104_p11, %p3103_p10 }
  0x72   :  { %p3106_p13 = pnand %p3105_p12, %p3099_p9 }
  0x74   :  { %3109 = shalt.err (!%p3106_p13)
}
  0x75   :  { %103 = dma.hbm_to_vmem [thread:$0]  %s3652_s7, 1024, %s98_s12, [#allocation12], %s3167_s19, %s3167_s19, %s3168_s20  }
  0x76   :  { %s3175_s27 = smov [#allocation14]   ;;  %s3110_s13 = scalar_lea.hbm %s3653_s8, 1024 }
  0x77   :  { %s109_s28 = sshll.u32 %s3175_s27, 4  ;;  %p3111_p0 = scmp.ne.s32.totalorder %s3653_s8, %s3110_s13  ;;  %s110_s28 = int_to_ptr.vmem [resolvable:$true] %s109_s28 }
  0x78   :  { %p3114_p1 = scmp.lt.u32.totalorder %s3110_s13, %s3653_s8 }
  0x7a   :  { %p3116_p2 = pnand %p3114_p1, %p3111_p0 }
  0x7c   :  { %3119 = shalt.err (!%p3116_p2)
}
  0x7d   :  { %s3120_s5 = scalar_lea.vmem %s110_s28, 1024  ;;  %p3125_p4 = scmp.lt.s32.totalorder %s110_s28, %s110_s28 }
  0x7e   :  { %p3121_p3 = scmp.ne.s32.totalorder %s110_s28, %s3120_s5  ;;  %p3126_p5 = scmp.lt.s32.totalorder %s3120_s5, %s3120_s5 }
  0x80   :  { %p3127_p6 = por %p3126_p5, %p3125_p4 }
  0x82   :  { %p3128_p7 = pnand %p3127_p6, %p3121_p3 }
  0x84   :  { %3131 = shalt.err (!%p3128_p7)
}
  0x85   :  { %115 = dma.hbm_to_vmem [thread:$0]  %s3653_s8, 1024, %s110_s28, [#allocation15], %s3167_s19, %s3167_s19, %s3168_s20  }
  0x86   :  { %3154 = dma.done.wait [#allocation3], 64  }
  0x87   :  { %3155 = vsyncadd [#allocation3], 4294967232 }
  0x88   :  { %3156 = dma.done.wait [#allocation6], 2048  }
  0x89   :  { %3157 = vsyncadd [#allocation6], 4294965248 }
  0x8a   :  { %3158 = dma.done.wait [#allocation9], 2048  }
  0x8b   :  { %3159 = vsyncadd [#allocation9], 4294965248 }
  0x8c   :  { %3160 = dma.done.wait [#allocation12], 2048  }
  0x8d   :  { %3161 = vsyncadd [#allocation12], 4294965248 }
  0x8e   :  { %3162 = dma.done.wait [#allocation15], 1024  }
  0x8f   :  { %3163 = vsyncadd [#allocation15], 4294966272  ;;  %v3176_v0 = vmov 0.0   ;;  %vm3177_vm0 = vmmov 0   ;;  %v2864_v1 = vld [vmem:[#allocation10] sm:$0xff]   ;;  %v2866_v3 = vld [vmem:[#allocation10 + $0x8] sm:$0xff]   ;;  %v508_v28 = vlaneseq }
  0x90   :  { %2543 = vmatprep.subr.bf16.mxu0 %v3176_v0  ;;  %2559 = vmatprep.mubr.msk.bf16.mxu0 %vm3177_vm0, %v3176_v0  ;;  %v2865_v2 = vld [vmem:[#allocation11] sm:$0xff]   ;;  %v2867_v4 = vld [vmem:[#allocation11 + $0x8] sm:$0xff]   ;;  %v2869_v5 = vld [vmem:[#allocation11 + $0x10] sm:$0xff]   ;;  %v3178_v26 = vmov 1966171168   ;;  %vm708_vm1 = vcmask 130112  }
  0x91   :  { %2544 = vmatpush3.bf16.msra.mxu0 %v2864_v1  ;;  %2563 = vmatprep.subr.bf16.mxu1 %v2865_v2  ;;  %v2868_v6 = vld [vmem:[#allocation10 + $0x10] sm:$0xff]   ;;  %v2871_v7 = vld [vmem:[#allocation11 + $0x18] sm:$0xff]   ;;  %v2873_v9 = vld [vmem:[#allocation11 + $0x20] sm:$0xff]   ;;  %v506_v27 = vunpack.c.l.s4 %v3178_v26  ;;  %v3368_v30 = vshrl.u32 %v508_v28, 7  ;;  %vm773_vm2 = vcmask 1041409   ;;  %vm775_vm3 = vcmask 1042434  }
  0x92   :  { %2545 = vmatprep.subr.bf16.mxu0 %v3176_v0  ;;  %2564 = vmatpush3.bf16.msra.mxu1 %v2865_v2  ;;  %v2870_v8 = vld [vmem:[#allocation10 + $0x18] sm:$0xff]   ;;  %v2872_v10 = vld [vmem:[#allocation10 + $0x20] sm:$0xff]   ;;  %v2875_v11 = vld [vmem:[#allocation11 + $0x28] sm:$0xff]   ;;  %vm777_vm4 = vcmask 1043459   ;;  %vm779_vm5 = vcmask 1044484   ;;  %vm781_vm6 = vcmask 1045509  }
  0x93   :  { %2565 = vmatprep.subr.bf16.mxu1 %v2867_v4  ;;  %v2880_v12 = vld [vmem:[#allocation5] sm:$0xff]   ;;  %v2874_v13 = vld [vmem:[#allocation10 + $0x28] sm:$0xff]   ;;  %v2877_v14 = vld [vmem:[#allocation11 + $0x30] sm:$0xff]   ;;  %v507_v29 = vunpack.c.0.s8 %v506_v27  ;;  %v3375_v36 = vsub.s32 0, %v3368_v30  ;;  %vm783_vm7 = vcmask 1046534   ;;  %vm785_vm8 = vcmask 1047559  }
  0x94   :  { %2579 = vmatprep.mubr.bf16.mxu1 %v2880_v12  ;;  %v2876_v15 = vld [vmem:[#allocation10 + $0x30] sm:$0xff]   ;;  %v2878_v16 = vld [vmem:[#allocation10 + $0x38] sm:$0xff]   ;;  %v2881_v19 = vld [vmem:[#allocation5 + $0x8] sm:$0xff]   ;;  %vm789_vm10 = vcmask 130048  }
  0x95   :  { %2546 = vmatpush3.bf16.msra.mxu0 %v2866_v3  ;;  %v2879_v17 = vld [vmem:[#allocation11 + $0x38] sm:$0xff]   ;;  %v2882_v20 = vld [vmem:[#allocation5 + $0x10] sm:$0xff]   ;;  %v2884_v22 = vld [vmem:[#allocation5 + $0x20] sm:$0xff]   ;;  %v3371_v31 = vsub.s32 %v507_v29, %v3368_v30 }
  0x96   :  { %2547 = vmatprep.subr.bf16.mxu0 %v3176_v0  ;;  %2566 = vmatpush3.bf16.msra.mxu1 %v2867_v4  ;;  %v3358_v18 = vld [vmem:[#allocation2] sm:$0xf]  ;;  %v2885_v23 = vld [vmem:[#allocation5 + $0x28] sm:$0xff]   ;;  %v2886_v24 = vld [vmem:[#allocation5 + $0x30] sm:$0xff]  }
  0x97   :  { %2567 = vmatprep.subr.bf16.mxu1 %v2869_v5  ;;  %v2883_v21 = vld [vmem:[#allocation5 + $0x18] sm:$0xff]  }
  0x98   :  { %v2887_v25 = vld [vmem:[#allocation5 + $0x38] sm:$0xff]  }
  0x99   :  { %2548 = vmatpush3.bf16.msra.mxu0 %v2868_v6  ;;  %v3390_v6 = vld [vmem:[%s3651_s6] ss:$0 sm:$0xff]  ;;  %s3180_s6 = smov [#allocation16]  }
  0x9a   :  { %2549 = vmatprep.subr.bf16.mxu0 %v3176_v0  ;;  %2568 = vmatpush3.bf16.msra.mxu1 %v2869_v5  ;;  %s2330_s20 = sshll.u32 %s3180_s6, 4  ;;  %s2331_s20 = int_to_ptr.vmem [resolvable:$true] %s2330_s20 }
  0x9b   :  { %2569 = vmatprep.subr.bf16.mxu1 %v2871_v7  ;;  %s3132_s26 = scalar_lea.vmem %s2331_s20, 128  ;;  %p3137_p9 = scmp.lt.s32.totalorder %s2331_s20, %s2331_s20 }
  0x9c   :  { %p3133_p8 = scmp.ne.s32.totalorder %s2331_s20, %s3132_s26  ;;  %p3138_p10 = scmp.lt.s32.totalorder %s3132_s26, %s3132_s26 }
  0x9d   :  { %2550 = vmatpush3.bf16.msra.mxu0 %v2870_v8 }
  0x9e   :  { %2551 = vmatprep.subr.bf16.mxu0 %v3176_v0  ;;  %2570 = vmatpush3.bf16.msra.mxu1 %v2871_v7  ;;  %p3139_p11 = por %p3138_p10, %p3137_p9 }
  0x9f   :  { %2571 = vmatprep.subr.bf16.mxu1 %v2873_v9 }
  0xa0   :  { %p3140_p12 = pnand %p3139_p11, %p3133_p8 }
  0xa1   :  { %2552 = vmatpush3.bf16.msra.mxu0 %v2872_v10 }
  0xa2   :  { %2553 = vmatprep.subr.bf16.mxu0 %v3176_v0  ;;  %2572 = vmatpush3.bf16.msra.mxu1 %v2873_v9 }
  0xa3   :  { %2573 = vmatprep.subr.bf16.mxu1 %v2875_v11 }
  0xa5   :  { %2554 = vmatpush3.bf16.msra.mxu0 %v2874_v13 }
  0xa6   :  { %2555 = vmatprep.subr.bf16.mxu0 %v3176_v0  ;;  %2574 = vmatpush3.bf16.msra.mxu1 %v2875_v11 }
  0xa7   :  { %2575 = vmatprep.subr.bf16.mxu1 %v2877_v14 }
  0xa9   :  { %2556 = vmatpush3.bf16.msra.mxu0 %v2876_v15 }
  0xaa   :  { %2557 = vmatprep.subr.bf16.mxu0 %v3176_v0  ;;  %2576 = vmatpush3.bf16.msra.mxu1 %v2877_v14 }
  0xab   :  { %2577 = vmatprep.subr.bf16.mxu1 %v2879_v17 }
  0xad   :  { %2558 = vmatpush3.bf16.msra.mxu0 %v2878_v16 }
  0xae   :  { %2595 = vmatprep.subr.bf16.mxu0 %v3176_v0  ;;  %2578 = vmatpush3.bf16.msra.mxu1 %v2879_v17 }
  0xaf   :  { %2619 = vmatprep.subr.bf16.mxu1 %v3176_v0 }
  0xb0   :  { %2560 = vmatmul.mubr.bf16.vlgmr.msra.gmra.mrb[0].mxu0 %v3358_v18 }
  0xb1   :  { %2597 = vmatprep.mubr.msk.bf16.mxu0 %vm3177_vm0, %v3176_v0  ;;  %2580 = vmatmul.mubr.bf16.vlgmr.msra.gmra.mrb[0].mxu1 %v2881_v19 }
  0xb2   :  { %2583 = vmatprep.mubr.bf16.mxu1 %v2882_v20 }
  0xb9   :  { %2584 = vmatmul.mubr.bf16.gmra.mrb[4].mxu1 %v2883_v21 }
  0xba   :  { %2587 = vmatprep.mubr.bf16.mxu1 %v2884_v22 }
  0xc1   :  { %2588 = vmatmul.mubr.bf16.gmra.mrb[8].mxu1 %v2885_v23 }
  0xc2   :  { %2591 = vmatprep.mubr.bf16.mxu1 %v2886_v24 }
  0xc9   :  { %2592 = vmatmul.mubr.bf16.gmra.mrb[12].mxu1 %v2887_v25 }
  0xca   :  { %2621 = vmatprep.mubr.msk.bf16.mxu1 %vm3177_vm0, %v3176_v0 }
 0x183   :  { %v288_v32 = vpop.f32.mrb[0].mxu0 }
 0x184   :  { %v504_v33 = vcombine.high %v288_v32, %v288_v32  ;;  %v511_v34 = vrot.slane %v288_v32, %v3371_v31  ;;  %v2561_v35 = vpop.f32.mrb[1].mxu0  ;;  %v2581_v38 = vpop.f32.mrb[0].mxu1 }
 0x185   :  { %v291_v37 = vpop.f32.mrb[2].mxu0  ;;  %v440_v42 = vpop.f32.mrb[1].mxu1 }
 0x186   :  { %v519_v39 = vcombine.high %v511_v34, %v511_v34  ;;  %v527_v40 = vrot.slane %v511_v34, %v3371_v31  ;;  %v2562_v41 = vpop.f32.mrb[3].mxu0  ;;  %v518_v43 = vrot.slane %v504_v33, %v3371_v31  ;;  %v2582_v44 = vpop.f32.mrb[2].mxu1 }
 0x187   :  { %v443_v47 = vpop.f32.mrb[3].mxu1 }
 0x188   :  { %v541_v45 = vrot.slane %v519_v39, %v3371_v31  ;;  %v556_v46 = vrot.slane %v527_v40, %v3375_v36  ;;  %v549_v48 = vcombine.high %v527_v40, %v527_v40  ;;  %v520_v53 = vcombine.high %v518_v43, %v518_v43 }
 0x189   :  { %v534_v4 = vrot.slane %v518_v43, %v3371_v31 }
 0x18a   :  { %v560_v49 = vrot.slane %v541_v45, %v3375_v36  ;;  %v593_v50 = vadd.f32 %v556_v46, %v440_v42  ;;  %v594_v51 = vadd.f32 %v556_v46, %v443_v47  ;;  %v551_v52 = vcombine.high %v541_v45, %v541_v45 }
 0x18b   :  { %v564_v58 = vrot.slane %v549_v48, %v3375_v36  ;;  %v548_v2 = vrot.slane %v520_v53, %v3371_v31  ;;  %v572_v8 = vrot.slane %v534_v4, %v3375_v36  ;;  %v550_v23 = vcombine.high %v534_v4, %v534_v4 }
 0x18c   :  { %v595_v54 = vadd.f32 %v2581_v38, %v560_v49  ;;  %2920 = vtanh.f32 %v593_v50  ;;  %v596_v55 = vadd.f32 %v2582_v44, %v560_v49  ;;  %v568_v56 = vrot.slane %v551_v52, %v3375_v36  ;;  %v2585_v57 = vpop.f32.mrb[4].mxu1 }
 0x18d   :  { %2922 = vtanh.f32 %v594_v51  ;;  %v456_v60 = vpop.f32.mrb[5].mxu1  ;;  %v576_v5 = vrot.slane %v548_v2, %v3375_v36  ;;  %v552_v20 = vcombine.high %v548_v2, %v548_v2  ;;  %v580_v32 = vrot.slane %v550_v23, %v3375_v36 }
 0x18e   :  { %2924 = vtanh.f32 %v595_v54  ;;  %v599_v59 = vadd.f32 %v2585_v57, %v568_v56  ;;  %v597_v61 = vadd.f32 %v564_v58, %v456_v60  ;;  %v2586_v62 = vpop.f32.mrb[6].mxu1 }
 0x18f   :  { %2926 = vtanh.f32 %v596_v55  ;;  %v600_v63 = vadd.f32 %v2586_v62, %v568_v56  ;;  %v459_v1 = vpop.f32.mrb[7].mxu1  ;;  %v584_v27 = vrot.slane %v552_v20, %v3375_v36 }
 0x190   :  { %v598_v3 = vadd.f32 %v564_v58, %v459_v1  ;;  %2928 = vtanh.f32 %v597_v61 }
 0x191   :  { %2930 = vtanh.f32 %v600_v63 }
 0x192   :  { %2932 = vtanh.f32 %v599_v59 }
 0x193   :  { %2934 = vtanh.f32 %v598_v3 }
 0x194   :  { %v2589_v7 = vpop.f32.mrb[8].mxu1 }
 0x195   :  { %v603_v10 = vadd.f32 %v2589_v7, %v576_v5  ;;  %v472_v11 = vpop.f32.mrb[9].mxu1 }
 0x196   :  { %v2921_v9 = vpop.eup %2920  ;;  %v601_v13 = vadd.f32 %v572_v8, %v472_v11  ;;  %v2590_v14 = vpop.f32.mrb[10].mxu1 }
 0x197   :  { %v2923_v12 = vpop.eup %2922  ;;  %v632_v15 = vmul.f32 %v2921_v9, %v3390_v6  ;;  %v604_v17 = vadd.f32 %v2590_v14, %v576_v5  ;;  %v475_v19 = vpop.f32.mrb[11].mxu1  ;;  %2936 = vtanh.f32 %v603_v10 }
 0x198   :  { %v2925_v16 = vpop.eup %2924  ;;  %v602_v21 = vadd.f32 %v572_v8, %v475_v19  ;;  %v633_v25 = vmul.f32 %v2923_v12, %v3390_v6  ;;  %v681_v8 = vand.u32 127, %v508_v28 }
 0x199   :  { %648 = vadd.xlane.f32.xlu0 %v632_v15  ;;  %v634_v22 = vmul.f32 %v2925_v16, %v3390_v6  ;;  %v2927_v24 = vpop.eup %2926  ;;  %2938 = vtanh.f32 %v604_v17 }
 0x19a   :  { %v2929_v26 = vpop.eup %2928  ;;  %v635_v33 = vmul.f32 %v2927_v24, %v3390_v6  ;;  %2940 = vtanh.f32 %v601_v13  ;;  %v703_v10 = vadd.s32 4294967288, %v681_v8  ;;  %v3416_v15 = vsub.s32 %v681_v8, %v3368_v30 }
 0x19b   :  { %652 = vadd.xlane.f32.xlu1 %v634_v22  ;;  %v2931_v34 = vpop.eup %2930  ;;  %v636_v40 = vmul.f32 %v2929_v26, %v3390_v6  ;;  %2942 = vtanh.f32 %v602_v21  ;;  %vm682_vm9 = vcmp.lt.s32.totalorder %v681_v8, 10 }
 0x19c   :  { %v2593_v29 = vpop.f32.mrb[12].mxu1  ;;  %v2933_v41 = vpop.eup %2932  ;;  %v639_v45 = vmul.f32 %v2931_v34, %v3390_v6  ;;  %v3413_v13 = vsub.s32 %v703_v10, %v3368_v30 }
 0x19d   :  { %650 = vadd.xlane.f32.xlu0 %v633_v25  ;;  %v607_v35 = vadd.f32 %v2593_v29, %v584_v27  ;;  %v488_v37 = vpop.f32.mrb[13].mxu1  ;;  %v2935_v46 = vpop.eup %2934  ;;  %v638_v47 = vmul.f32 %v2933_v41, %v3390_v6 }
 0x19e   :  { %v605_v38 = vadd.f32 %v580_v32, %v488_v37  ;;  %v2594_v39 = vpop.f32.mrb[14].mxu1  ;;  %v637_v49 = vmul.f32 %v2935_v46, %v3390_v6 }
 0x19f   :  { %654 = vadd.xlane.f32.xlu1 %v635_v33  ;;  %v608_v42 = vadd.f32 %v2594_v39, %v584_v27  ;;  %v491_v43 = vpop.f32.mrb[15].mxu1 }
 0x1a0   :  { %v606_v44 = vadd.f32 %v580_v32, %v491_v43  ;;  %2944 = vtanh.f32 %v605_v38 }
 0x1a1   :  { %656 = vadd.xlane.f32.xlu0 %v636_v40  ;;  %v2937_v48 = vpop.eup %2936 }
 0x1a2   :  { %2946 = vtanh.f32 %v606_v44  ;;  %v642_v51 = vmul.f32 %v2937_v48, %v3390_v6 }
 0x1a3   :  { %662 = vadd.xlane.f32.xlu1 %v639_v45  ;;  %v2939_v50 = vpop.eup %2938  ;;  %2948 = vtanh.f32 %v607_v35 }
 0x1a4   :  { %v2941_v52 = vpop.eup %2940  ;;  %2950 = vtanh.f32 %v608_v42  ;;  %v643_v53 = vmul.f32 %v2939_v50, %v3390_v6 }
 0x1a5   :  { %660 = vadd.xlane.f32.xlu0 %v638_v47  ;;  %v2943_v54 = vpop.eup %2942  ;;  %v640_v55 = vmul.f32 %v2941_v52, %v3390_v6 }
 0x1a6   :  { %v641_v57 = vmul.f32 %v2943_v54, %v3390_v6 }
 0x1a7   :  { %658 = vadd.xlane.f32.xlu1 %v637_v49 }
 0x1a9   :  { %668 = vadd.xlane.f32.xlu0 %v642_v51 }
 0x1aa   :  { %v2945_v56 = vpop.eup %2944 }
 0x1ab   :  { %670 = vadd.xlane.f32.xlu1 %v643_v53  ;;  %v644_v59 = vmul.f32 %v2945_v56, %v3390_v6 }
 0x1ac   :  { %v2947_v58 = vpop.eup %2946 }
 0x1ad   :  { %664 = vadd.xlane.f32.xlu0 %v640_v55  ;;  %v2949_v60 = vpop.eup %2948  ;;  %v645_v61 = vmul.f32 %v2947_v58, %v3390_v6 }
 0x1ae   :  { %v2951_v62 = vpop.eup %2950  ;;  %v646_v63 = vmul.f32 %v2949_v60, %v3390_v6 }
 0x1af   :  { %666 = vadd.xlane.f32.xlu1 %v641_v57  ;;  %v647_v1 = vmul.f32 %v2951_v62, %v3390_v6 }
 0x1b1   :  { %672 = vadd.xlane.f32.xlu0 %v644_v59 }
 0x1b3   :  { %674 = vadd.xlane.f32.xlu1 %v645_v61 }
 0x1b5   :  { %676 = vadd.xlane.f32.xlu0 %v646_v63 }
 0x1b7   :  { %678 = vadd.xlane.f32.xlu1 %v647_v1  ;;  %v2888_v1 = vld [vmem:[#allocation7] sm:$0xff]  }
 0x1b8   :  { %2596 = vmatpush3.bf16.msra.mxu0 %v2888_v1 }
 0x1b9   :  { %2601 = vmatprep.subr.bf16.mxu0 %v3176_v0 }
 0x226   :  { %v649_v2 = vpop.xlane.xlu0 %648 }
 0x227   :  { %v702_v22 = vrot.slane %v649_v2, %v3416_v15  ;;  %v2889_v2 = vld [vmem:[#allocation7 + $0x20] sm:$0xff]  }
 0x228   :  { %v653_v3 = vpop.xlane.xlu1 %652  ;;  %2620 = vmatpush3.bf16.msra.mxu1 %v2889_v2 }
 0x229   :  { %v713_v19 = vrot.slane %v653_v3, %v3416_v15  ;;  %2631 = vmatprep.subr.bf16.mxu1 %v3176_v0 }
 0x22a   :  { %v651_v4 = vpop.xlane.xlu0 %650 }
 0x22b   :  { %v707_v28 = vrot.slane %v651_v4, %v3413_v13 }
 0x22c   :  { %v655_v5 = vpop.xlane.xlu1 %654 }
 0x22d   :  { %v717_v6 = vrot.slane %v655_v5, %v3413_v13  ;;  %v709_v26 = vsel %vm708_vm1, %v707_v28, %v702_v22  ;;  %v2891_v28 = vld [vmem:[#allocation7 + $0x30] sm:$0xff]  }
 0x22e   :  { %v657_v7 = vpop.xlane.xlu0 %656 }
 0x22f   :  { %v722_v20 = vrot.slane %v657_v7, %v3416_v15  ;;  %v718_v23 = vsel %vm708_vm1, %v717_v6, %v713_v19  ;;  %v2890_v6 = vld [vmem:[#allocation7 + $0x8] sm:$0xff]  }
 0x230   :  { %v663_v9 = vpop.xlane.xlu1 %662  ;;  %v774_v32 = vsel %vm773_vm2, %v718_v23, %v709_v26  ;;  %v2892_v23 = vld [vmem:[#allocation7 + $0x10] sm:$0xff]  }
 0x231   :  { %v735_v35 = vrot.slane %v663_v9, %v3413_v13 }
 0x232   :  { %v661_v11 = vpop.xlane.xlu0 %660 }
 0x233   :  { %v731_v27 = vrot.slane %v661_v11, %v3416_v15 }
 0x234   :  { %v659_v12 = vpop.xlane.xlu1 %658 }
 0x235   :  { %v726_v16 = vrot.slane %v659_v12, %v3413_v13  ;;  %v736_v40 = vsel %vm708_vm1, %v735_v35, %v731_v27  ;;  %v2893_v27 = vld [vmem:[#allocation7 + $0x18] sm:$0xff]  }
 0x236   :  { %v669_v14 = vpop.xlane.xlu0 %668 }
 0x237   :  { %v727_v24 = vsel %vm708_vm1, %v726_v16, %v722_v20  ;;  %v749_v46 = vrot.slane %v669_v14, %v3416_v15 }
 0x238   :  { %v671_v17 = vpop.xlane.xlu1 %670  ;;  %v776_v37 = vsel %vm775_vm3, %v727_v24, %v774_v32 }
 0x239   :  { %v753_v41 = vrot.slane %v671_v17, %v3413_v13  ;;  %v778_v43 = vsel %vm777_vm4, %v736_v40, %v776_v37 }
 0x23a   :  { %v665_v21 = vpop.xlane.xlu0 %664 }
 0x23b   :  { %v740_v33 = vrot.slane %v665_v21, %v3416_v15  ;;  %v754_v50 = vsel %vm708_vm1, %v753_v41, %v749_v46  ;;  %v2898_v46 = vld [vmem:[#allocation14 + $0x10] sm:$0xff]  }
 0x23c   :  { %v667_v25 = vpop.xlane.xlu1 %666 }
 0x23d   :  { %v744_v29 = vrot.slane %v667_v25, %v3413_v13 }
 0x23e   :  { %v673_v34 = vpop.xlane.xlu0 %672 }
 0x23f   :  { %v745_v38 = vsel %vm708_vm1, %v744_v29, %v740_v33  ;;  %v758_v44 = vrot.slane %v673_v34, %v3416_v15  ;;  %v2894_v34 = vld [vmem:[#allocation7 + $0x28] sm:$0xff]  }
 0x240   :  { %v675_v39 = vpop.xlane.xlu1 %674  ;;  %v780_v47 = vsel %vm779_vm5, %v745_v38, %v778_v43 }
 0x241   :  { %v762_v42 = vrot.slane %v675_v39, %v3413_v13  ;;  %v782_v53 = vsel %vm781_vm6, %v754_v50, %v780_v47  ;;  %v2895_v39 = vld [vmem:[#allocation7 + $0x38] sm:$0xff]   ;;  %v2902_v50 = vld [vmem:[#allocation14 + $0x30] sm:$0xff]  }
 0x242   :  { %v677_v45 = vpop.xlane.xlu0 %676  ;;  %v2899_v47 = vld [vmem:[#allocation14 + $0x18] sm:$0xff]  }
 0x243   :  { %v763_v48 = vsel %vm708_vm1, %v762_v42, %v758_v44  ;;  %v767_v51 = vrot.slane %v677_v45, %v3416_v15  ;;  %v2896_v44 = vld [vmem:[#allocation14] sm:$0xff]   ;;  %v2897_v45 = vld [vmem:[#allocation14 + $0x8] sm:$0xff]  }
 0x244   :  { %v679_v49 = vpop.xlane.xlu1 %678  ;;  %v784_v55 = vsel %vm783_vm7, %v763_v48, %v782_v53  ;;  %v2900_v48 = vld [vmem:[#allocation14 + $0x20] sm:$0xff]  }
 0x245   :  { %v771_v52 = vrot.slane %v679_v49, %v3413_v13  ;;  %v2901_v49 = vld [vmem:[#allocation14 + $0x28] sm:$0xff]  }
 0x247   :  { %v772_v54 = vsel %vm708_vm1, %v771_v52, %v767_v51  ;;  %v2903_v51 = vld [vmem:[#allocation14 + $0x38] sm:$0xff]  }
 0x248   :  { %v786_v56 = vsel %vm785_vm8, %v772_v54, %v784_v55 }
 0x249   :  { %v788_v57 = vsel %vm682_vm9, %v786_v56, -1e+30 }
 0x24a   :  { %v790_v58 = vsel %vm789_vm10, %v788_v57, -inf }
 0x24b   :  { %791 = vmax.xlane.f32.xlu0 %v790_v58 }
 0x2d8   :  { %v792_v59 = vpop.xlane.xlu0 %791 }
 0x2d9   :  { %v793_v60 = vsub.f32 %v788_v57, %v792_v59 }
 0x2db   :  { %v794_v61 = vmul.f32 1.442695, %v793_v60 }
 0x2dd   :  { %2952 = vpow2.f32 %v794_v61 }
 0x2e7   :  { %v2953_v62 = vpop.eup %2952 }
 0x2e8   :  { %v796_v63 = vsel %vm789_vm10, %v2953_v62, 0.0 }
 0x2e9   :  { %797 = vadd.xlane.f32.xlu1 %v796_v63 }
 0x376   :  { %v798_v3 = vpop.xlane.xlu1 %797 }
 0x377   :  { %2954 = vrcp.f32 %v798_v3 }
 0x381   :  { %v2955_v4 = vpop.eup %2954 }
 0x382   :  { %v800_v5 = vmul.f32 %v2955_v4, %v2953_v62 }
 0x384   :  { %v801_v7 = vpack.c.bf16 %v800_v5, %v800_v5 }
 0x386   :  { %v809_v8 = vrot.slane %v801_v7, %v3371_v31 }
 0x388   :  { %v810_v9 = vcombine.high %v809_v8, %v809_v8  ;;  %v817_v10 = vrot.slane %v809_v8, %v3371_v31 }
 0x38a   :  { %v824_v11 = vrot.slane %v810_v9, %v3371_v31  ;;  %v825_v12 = vcombine.high %v817_v10, %v817_v10  ;;  %v2368_v14 = vpack.i.b16 %v817_v10, %v817_v10  ;;  %v828_v19 = vunpack.i.h.s16 %v817_v10 }
 0x38c   :  { %v839_v16 = vrot.slane %v2368_v14, %v3375_v36  ;;  %v2378_v17 = vpack.i.b16 %v825_v12, %v825_v12  ;;  %v826_v21 = vcombine.high %v824_v11, %v824_v11  ;;  %v889_v31 = vpack.i.b16 %v828_v19, %v828_v19 }
 0x38d   :  { %v2373_v26 = vpack.i.b16 %v824_v11, %v824_v11  ;;  %v830_v32 = vunpack.i.h.s16 %v824_v11  ;;  %v832_v37 = vunpack.i.h.s16 %v825_v12 }
 0x38e   :  { %2598 = vmatmul.mubr.msk.bf16.vlgmr.msra.gmra.mrb[4].mxu0 %vm789_vm10, %v839_v16  ;;  %v1055_v20 = vrot.slane %v2378_v17, %v3375_v36  ;;  %v2383_v22 = vpack.i.b16 %v826_v21, %v826_v21  ;;  %v893_v24 = vrot.slane %v889_v31, %v3375_v36  ;;  %v834_v41 = vunpack.i.h.s16 %v826_v21 }
 0x38f   :  { %2602 = vmatpush3.bf16.msra.mxu0 %v2890_v6  ;;  %2603 = vmatprep.mubr.msk.bf16.mxu0 %vm3177_vm0, %v3176_v0  ;;  %v947_v29 = vrot.slane %v2373_v26, %v3375_v36  ;;  %v997_v33 = vpack.i.b16 %v830_v32, %v830_v32  ;;  %v1105_v38 = vpack.i.b16 %v832_v37, %v832_v37 }
 0x390   :  { %2622 = vmatmul.mubr.msk.bf16.vlgmr.msra.gmra.mrb[16].mxu1 %vm789_vm10, %v1055_v20  ;;  %2607 = vmatprep.subr.bf16.mxu0 %v3176_v0  ;;  %v1163_v25 = vrot.slane %v2383_v22, %v3375_v36  ;;  %v1213_v42 = vpack.i.b16 %v834_v41, %v834_v41 }
 0x391   :  { %2632 = vmatpush3.bf16.msra.mxu1 %v2891_v28  ;;  %2633 = vmatprep.mubr.msk.bf16.mxu1 %vm3177_vm0, %v3176_v0  ;;  %v1001_v35 = vrot.slane %v997_v33, %v3375_v36  ;;  %v1109_v40 = vrot.slane %v1105_v38, %v3375_v36 }
 0x392   :  { %2643 = vmatprep.subr.bf16.mxu1 %v3176_v0  ;;  %v1217_v43 = vrot.slane %v1213_v42, %v3375_v36 }
 0x396   :  { %2604 = vmatmul.mubr.msk.bf16.vlgmr.msra.gmra.mrb[8].mxu0 %vm789_vm10, %v893_v24 }
 0x397   :  { %2608 = vmatpush3.bf16.msra.mxu0 %v2892_v23  ;;  %2609 = vmatprep.mubr.msk.bf16.mxu0 %vm3177_vm0, %v3176_v0 }
 0x398   :  { %2634 = vmatmul.mubr.msk.bf16.vlgmr.msra.gmra.mrb[20].mxu1 %vm789_vm10, %v1163_v25  ;;  %2613 = vmatprep.subr.bf16.mxu0 %v3176_v0 }
 0x399   :  { %2659 = vmatprep.mubr.msk.bf16.mxu1 %vm3177_vm0, %v3176_v0  ;;  %2644 = vmatpush3.bf16.msra.mxu1 %v2896_v44 }
 0x39a   :  { %2645 = vmatprep.subr.bf16.mxu1 %v3176_v0 }
 0x39d   :  { %2646 = vmatpush3.bf16.msra.mxu1 %v2897_v45 }
 0x39e   :  { %2610 = vmatmul.mubr.msk.bf16.vlgmr.msra.gmra.mrb[12].mxu0 %vm789_vm10, %v947_v29  ;;  %2647 = vmatprep.subr.bf16.mxu1 %v3176_v0 }
 0x39f   :  { %2614 = vmatpush3.bf16.msra.mxu0 %v2893_v27  ;;  %2615 = vmatprep.mubr.msk.bf16.mxu0 %vm3177_vm0, %v3176_v0 }
 0x3a0   :  { %2625 = vmatprep.subr.bf16.mxu0 %v3176_v0 }
 0x3a1   :  { %2648 = vmatpush3.bf16.msra.mxu1 %v2898_v46 }
 0x3a2   :  { %2649 = vmatprep.subr.bf16.mxu1 %v3176_v0 }
 0x3a5   :  { %2650 = vmatpush3.bf16.msra.mxu1 %v2899_v47 }
 0x3a6   :  { %2616 = vmatmul.mubr.msk.bf16.vlgmr.msra.gmra.mrb[16].mxu0 %vm789_vm10, %v1001_v35  ;;  %2651 = vmatprep.subr.bf16.mxu1 %v3176_v0 }
 0x3a7   :  { %2626 = vmatpush3.bf16.msra.mxu0 %v2894_v34  ;;  %2627 = vmatprep.mubr.msk.bf16.mxu0 %vm3177_vm0, %v3176_v0 }
 0x3a8   :  { %2637 = vmatprep.subr.bf16.mxu0 %v3176_v0 }
 0x3a9   :  { %2652 = vmatpush3.bf16.msra.mxu1 %v2900_v48 }
 0x3aa   :  { %2653 = vmatprep.subr.bf16.mxu1 %v3176_v0 }
 0x3ad   :  { %2654 = vmatpush3.bf16.msra.mxu1 %v2901_v49 }
 0x3ae   :  { %2628 = vmatmul.mubr.msk.bf16.vlgmr.msra.gmra.mrb[20].mxu0 %vm789_vm10, %v1109_v40  ;;  %2655 = vmatprep.subr.bf16.mxu1 %v3176_v0 }
 0x3af   :  { %2638 = vmatpush3.bf16.msra.mxu0 %v2895_v39  ;;  %2639 = vmatprep.mubr.msk.bf16.mxu0 %vm3177_vm0, %v3176_v0 }
 0x3b0   :  { %2683 = vmatprep.subr.bf16.mxu0 %v3176_v0 }
 0x3b1   :  { %2656 = vmatpush3.bf16.msra.mxu1 %v2902_v50 }
 0x3b2   :  { %2657 = vmatprep.subr.bf16.mxu1 %v3176_v0 }
 0x3b5   :  { %2658 = vmatpush3.bf16.msra.mxu1 %v2903_v51 }
 0x3b6   :  { %2640 = vmatmul.mubr.msk.bf16.vlgmr.msra.gmra.mrb[24].mxu0 %vm789_vm10, %v1217_v43  ;;  %2663 = vmatprep.subr.bf16.mxu1 %v3176_v0 }
 0x3b7   :  { %2699 = vmatprep.mubr.msk.bf16.mxu0 %vm3177_vm0, %v3176_v0 }
 0x461   :  { %v883_v52 = vpop.f32.mrb[4].mxu0 }
 0x462   :  { %v2599_v53 = vpop.f32.mrb[5].mxu0  ;;  %v1283_v61 = vpack.c.bf16 %v883_v52, %v883_v52 }
 0x463   :  { %v886_v54 = vpop.f32.mrb[6].mxu0  ;;  %v1099_v55 = vpop.f32.mrb[16].mxu1 }
 0x464   :  { %v2600_v56 = vpop.f32.mrb[7].mxu0  ;;  %v2623_v57 = vpop.f32.mrb[17].mxu1  ;;  %v1315_v8 = vunpack.c.l.b16 %v1283_v61  ;;  %v1287_v20 = vpack.c.bf16 %v1099_v55, %v1099_v55  ;;  %v2908_v61 = vld [vmem:[#allocation13 + $0x20] sm:$0xff]  }
 0x465   :  { %v1102_v58 = vpop.f32.mrb[18].mxu1  ;;  %v2904_v56 = vld [vmem:[#allocation13] sm:$0xff]  }
 0x466   :  { %v2624_v59 = vpop.f32.mrb[19].mxu1  ;;  %v1319_v24 = vunpack.c.l.b16 %v1287_v20  ;;  %v2905_v58 = vld [vmem:[#allocation13 + $0x8] sm:$0xff]  }
 0x467   :  { %v2906_v59 = vld [vmem:[#allocation13 + $0x10] sm:$0xff]  }
 0x468   :  { %v1329_v32 = vrot.slane %v1319_v24, 4 }
 0x469   :  { %v937_v60 = vpop.f32.mrb[8].mxu0 }
 0x46a   :  { %v1284_v62 = vpack.c.bf16 %v937_v60, %v937_v60  ;;  %v2605_v63 = vpop.f32.mrb[9].mxu0  ;;  %v2907_v60 = vld [vmem:[#allocation13 + $0x18] sm:$0xff]  }
 0x46b   :  { %v940_v1 = vpop.f32.mrb[10].mxu0  ;;  %v1207_v2 = vpop.f32.mrb[20].mxu1  ;;  %v2910_v63 = vld [vmem:[#allocation13 + $0x30] sm:$0xff]  }
 0x46c   :  { %v1316_v3 = vunpack.c.l.b16 %v1284_v62  ;;  %v2606_v4 = vpop.f32.mrb[11].mxu0  ;;  %v2635_v5 = vpop.f32.mrb[21].mxu1  ;;  %v1289_v33 = vpack.c.bf16 %v1207_v2, %v1207_v2  ;;  %v2909_v62 = vld [vmem:[#allocation13 + $0x28] sm:$0xff]   ;;  %v2911_v1 = vld [vmem:[#allocation13 + $0x38] sm:$0xff]  }
 0x46d   :  { %v1210_v7 = vpop.f32.mrb[22].mxu1 }
 0x46e   :  { %v1323_v9 = vrot.slane %v1316_v3, 7  ;;  %v2636_v10 = vpop.f32.mrb[23].mxu1  ;;  %v1321_v40 = vunpack.c.l.b16 %v1289_v33 }
 0x470   :  { %v1324_v11 = vsel %vm773_vm2, %v1323_v9, %v1315_v8  ;;  %v1333_v45 = vrot.slane %v1321_v40, 2 }
 0x471   :  { %v991_v12 = vpop.f32.mrb[12].mxu0 }
 0x472   :  { %v1285_v14 = vpack.c.bf16 %v991_v12, %v991_v12  ;;  %v2611_v6 = vpop.f32.mrb[13].mxu0  ;;  %v1594_v12 = vsub.s32 1, %v3368_v30 }
 0x473   :  { %v994_v16 = vpop.f32.mrb[14].mxu0 }
 0x474   :  { %v1317_v17 = vunpack.c.l.b16 %v1285_v14  ;;  %v2612_v19 = vpop.f32.mrb[15].mxu0 }
 0x475   :  { %v1734_v19 = vsub.s32 3, %v3368_v30 }
 0x476   :  { %v1325_v28 = vrot.slane %v1317_v17, 6 }
 0x478   :  { %v1326_v21 = vsel %vm775_vm3, %v1325_v28, %v1324_v11 }
 0x479   :  { %v1045_v31 = vpop.f32.mrb[16].mxu0 }
 0x47a   :  { %v1286_v22 = vpack.c.bf16 %v1045_v31, %v1045_v31  ;;  %v2617_v23 = vpop.f32.mrb[17].mxu0 }
 0x47b   :  { %v1048_v25 = vpop.f32.mrb[18].mxu0 }
 0x47c   :  { %v1318_v26 = vunpack.c.l.b16 %v1286_v22  ;;  %v2618_v27 = vpop.f32.mrb[19].mxu0 }
 0x47e   :  { %v1327_v29 = vrot.slane %v1318_v26, 5 }
 0x480   :  { %v1328_v34 = vsel %vm777_vm4, %v1327_v29, %v1326_v21 }
 0x481   :  { %v1153_v35 = vpop.f32.mrb[20].mxu0  ;;  %v1330_v37 = vsel %vm779_vm5, %v1329_v32, %v1328_v34 }
 0x482   :  { %v1288_v38 = vpack.c.bf16 %v1153_v35, %v1153_v35  ;;  %v2629_v39 = vpop.f32.mrb[21].mxu0 }
 0x483   :  { %v1156_v41 = vpop.f32.mrb[22].mxu0  ;;  %v2912_v39 = vld [vmem:[#allocation8] sm:$0xff]  }
 0x484   :  { %v1320_v42 = vunpack.c.l.b16 %v1288_v38  ;;  %v2630_v43 = vpop.f32.mrb[23].mxu0 }
 0x486   :  { %v1331_v44 = vrot.slane %v1320_v42, 3 }
 0x488   :  { %v1332_v46 = vsel %vm781_vm6, %v1331_v44, %v1330_v37 }
 0x489   :  { %v1261_v47 = vpop.f32.mrb[24].mxu0  ;;  %v1334_v48 = vsel %vm783_vm7, %v1333_v45, %v1332_v46 }
 0x48a   :  { %v1290_v49 = vpack.c.bf16 %v1261_v47, %v1261_v47  ;;  %v2641_v50 = vpop.f32.mrb[25].mxu0 }
 0x48b   :  { %v1264_v51 = vpop.f32.mrb[26].mxu0 }
 0x48c   :  { %v1322_v52 = vunpack.c.l.b16 %v1290_v49  ;;  %v2642_v53 = vpop.f32.mrb[27].mxu0 }
 0x48e   :  { %v1335_v54 = vrot.slane %v1322_v52, 1 }
 0x490   :  { %v1336_v55 = vsel %vm785_vm8, %v1335_v54, %v1334_v48  ;;  %v2913_v54 = vld [vmem:[#allocation8 + $0x10] sm:$0xff]  }
 0x491   :  { %v1337_v57 = vpack.c.b16 %v1336_v55, %v1336_v55 }
 0x493   :  { %2660 = vmatmul.mubr.bf16.vlgmr.msra.gmra.mrb[24].mxu1 %v1337_v57  ;;  %v2914_v57 = vld [vmem:[#allocation8 + $0x8] sm:$0xff]  }
 0x494   :  { %2664 = vmatpush3.bf16.msra.mxu1 %v2904_v56  ;;  %2679 = vmatprep.mubr.msk.bf16.mxu1 %vm3177_vm0, %v3176_v0 }
 0x495   :  { %2665 = vmatprep.subr.bf16.mxu1 %v3176_v0 }
 0x498   :  { %2666 = vmatpush3.bf16.msra.mxu1 %v2905_v58 }
 0x499   :  { %2667 = vmatprep.subr.bf16.mxu1 %v3176_v0 }
 0x49c   :  { %2668 = vmatpush3.bf16.msra.mxu1 %v2906_v59 }
 0x49d   :  { %2669 = vmatprep.subr.bf16.mxu1 %v3176_v0 }
 0x4a0   :  { %2670 = vmatpush3.bf16.msra.mxu1 %v2907_v60 }
 0x4a1   :  { %2671 = vmatprep.subr.bf16.mxu1 %v3176_v0 }
 0x4a4   :  { %2672 = vmatpush3.bf16.msra.mxu1 %v2908_v61 }
 0x4a5   :  { %2673 = vmatprep.subr.bf16.mxu1 %v3176_v0 }
 0x4a8   :  { %2674 = vmatpush3.bf16.msra.mxu1 %v2909_v62 }
 0x4a9   :  { %2675 = vmatprep.subr.bf16.mxu1 %v3176_v0 }
 0x4ac   :  { %2676 = vmatpush3.bf16.msra.mxu1 %v2910_v63 }
 0x4ad   :  { %2677 = vmatprep.subr.bf16.mxu1 %v3176_v0 }
 0x4b0   :  { %2678 = vmatpush3.bf16.msra.mxu1 %v2911_v1 }
 0x4b1   :  { %2723 = vmatprep.subr.bf16.mxu1 %v3176_v0 }
 0x4b3   :  { %2680 = vmatmul.mubr.bf16.vlgmr.msra.gmra.mrb[24].mxu1 %v3358_v18 }
 0x4b4   :  { %2739 = vmatprep.mubr.msk.bf16.mxu1 %vm3177_vm0, %v3176_v0 }
 0x586   :  { %v1509_v2 = vpop.f32.mrb[24].mxu1 }
 0x587   :  { %v1515_v3 = vpack.c.bf16 %v1509_v2, %v1509_v2  ;;  %v2681_v4 = vpop.f32.mrb[25].mxu1 }
 0x588   :  { %v1512_v5 = vpop.f32.mrb[26].mxu1 }
 0x589   :  { %v1517_v7 = vpack.i.b16 %v1515_v3, %v1515_v3  ;;  %v2682_v8 = vpop.f32.mrb[27].mxu1  ;;  %v1554_v10 = vshrl.u32 %v1515_v3, 16 }
 0x58a   :  { %v2915_v8 = vld [vmem:[#allocation8 + $0x20] sm:$0xff]  }
 0x58b   :  { %v1522_v9 = vrot.slane %v1517_v7, %v3375_v36  ;;  %v1555_v11 = vpack.i.b16 %v1554_v10, %v1554_v10  ;;  %v1595_v14 = vrot.slane %v1517_v7, %v1594_v12  ;;  %v1735_v28 = vrot.slane %v1517_v7, %v1734_v19 }
 0x58d   :  { %1528 = vbcast.lane.c.b16.xlu1 %v1522_v9, 272  ;;  %1524 = vbcast.lane.c.b16.xlu0 %v1522_v9, 256  ;;  %v1560_v18 = vrot.slane %v1555_v11, %v3375_v36  ;;  %v1630_v6 = vrot.slane %v1555_v11, %v1594_v12  ;;  %v1664_v36 = vsub.s32 2, %v3368_v30  ;;  %v1770_v20 = vrot.slane %v1555_v11, %v1734_v19 }
 0x58f   :  { %v1665_v16 = vrot.slane %v1517_v7, %v1664_v36  ;;  %v1700_v17 = vrot.slane %v1555_v11, %v1664_v36  ;;  %v2916_v11 = vld [vmem:[#allocation8 + $0x18] sm:$0xff]  }
 0x591   :  { %1532 = vbcast.lane.c.b16.xlu1 %v1522_v9, 288  ;;  %1540 = vbcast.lane.c.b16.xlu0 %v1522_v9, 320 }
 0x595   :  { %1536 = vbcast.lane.c.b16.xlu1 %v1522_v9, 304  ;;  %1548 = vbcast.lane.c.b16.xlu0 %v1522_v9, 352 }
 0x599   :  { %1544 = vbcast.lane.c.b16.xlu1 %v1522_v9, 336  ;;  %1562 = vbcast.lane.c.b16.xlu0 %v1560_v18, 256 }
 0x59d   :  { %1552 = vbcast.lane.c.b16.xlu1 %v1522_v9, 368  ;;  %1570 = vbcast.lane.c.b16.xlu0 %v1560_v18, 288 }
 0x5a1   :  { %1566 = vbcast.lane.c.b16.xlu1 %v1560_v18, 272  ;;  %1578 = vbcast.lane.c.b16.xlu0 %v1560_v18, 320 }
 0x5a5   :  { %1574 = vbcast.lane.c.b16.xlu1 %v1560_v18, 304  ;;  %1586 = vbcast.lane.c.b16.xlu0 %v1560_v18, 352 }
 0x5a9   :  { %1582 = vbcast.lane.c.b16.xlu1 %v1560_v18, 336  ;;  %1597 = vbcast.lane.c.b16.xlu0 %v1595_v14, 256 }
 0x5ad   :  { %1590 = vbcast.lane.c.b16.xlu1 %v1560_v18, 368  ;;  %1601 = vbcast.lane.c.b16.xlu0 %v1595_v14, 272 }
 0x5b1   :  { %1632 = vbcast.lane.c.b16.xlu1 %v1630_v6, 256  ;;  %1605 = vbcast.lane.c.b16.xlu0 %v1595_v14, 288 }
 0x5b5   :  { %1636 = vbcast.lane.c.b16.xlu1 %v1630_v6, 272  ;;  %1609 = vbcast.lane.c.b16.xlu0 %v1595_v14, 304 }
 0x5b9   :  { %1640 = vbcast.lane.c.b16.xlu1 %v1630_v6, 288  ;;  %1613 = vbcast.lane.c.b16.xlu0 %v1595_v14, 320 }
 0x5bd   :  { %1644 = vbcast.lane.c.b16.xlu1 %v1630_v6, 304  ;;  %1617 = vbcast.lane.c.b16.xlu0 %v1595_v14, 336 }
 0x5c1   :  { %1648 = vbcast.lane.c.b16.xlu1 %v1630_v6, 320  ;;  %1621 = vbcast.lane.c.b16.xlu0 %v1595_v14, 352 }
 0x5c5   :  { %1652 = vbcast.lane.c.b16.xlu1 %v1630_v6, 336  ;;  %1625 = vbcast.lane.c.b16.xlu0 %v1595_v14, 368 }
 0x5c9   :  { %1656 = vbcast.lane.c.b16.xlu1 %v1630_v6, 352  ;;  %1667 = vbcast.lane.c.b16.xlu0 %v1665_v16, 256 }
 0x5cd   :  { %1660 = vbcast.lane.c.b16.xlu1 %v1630_v6, 368  ;;  %1671 = vbcast.lane.c.b16.xlu0 %v1665_v16, 272 }
 0x5d1   :  { %1702 = vbcast.lane.c.b16.xlu1 %v1700_v17, 256  ;;  %1675 = vbcast.lane.c.b16.xlu0 %v1665_v16, 288 }
 0x5d5   :  { %1706 = vbcast.lane.c.b16.xlu1 %v1700_v17, 272  ;;  %1679 = vbcast.lane.c.b16.xlu0 %v1665_v16, 304 }
 0x5d9   :  { %1710 = vbcast.lane.c.b16.xlu1 %v1700_v17, 288  ;;  %1683 = vbcast.lane.c.b16.xlu0 %v1665_v16, 320 }
 0x5dd   :  { %1714 = vbcast.lane.c.b16.xlu1 %v1700_v17, 304  ;;  %1687 = vbcast.lane.c.b16.xlu0 %v1665_v16, 336 }
 0x5e1   :  { %1718 = vbcast.lane.c.b16.xlu1 %v1700_v17, 320  ;;  %1691 = vbcast.lane.c.b16.xlu0 %v1665_v16, 352 }
 0x5e5   :  { %1722 = vbcast.lane.c.b16.xlu1 %v1700_v17, 336  ;;  %1695 = vbcast.lane.c.b16.xlu0 %v1665_v16, 368 }
 0x5e9   :  { %1726 = vbcast.lane.c.b16.xlu1 %v1700_v17, 352  ;;  %1737 = vbcast.lane.c.b16.xlu0 %v1735_v28, 256 }
 0x5ed   :  { %1730 = vbcast.lane.c.b16.xlu1 %v1700_v17, 368  ;;  %1741 = vbcast.lane.c.b16.xlu0 %v1735_v28, 272 }
 0x5f1   :  { %1772 = vbcast.lane.c.b16.xlu1 %v1770_v20, 256  ;;  %1745 = vbcast.lane.c.b16.xlu0 %v1735_v28, 288 }
 0x5f5   :  { %1776 = vbcast.lane.c.b16.xlu1 %v1770_v20, 272  ;;  %1749 = vbcast.lane.c.b16.xlu0 %v1735_v28, 304 }
 0x5f9   :  { %1780 = vbcast.lane.c.b16.xlu1 %v1770_v20, 288  ;;  %1753 = vbcast.lane.c.b16.xlu0 %v1735_v28, 320 }
 0x5fd   :  { %1784 = vbcast.lane.c.b16.xlu1 %v1770_v20, 304  ;;  %1757 = vbcast.lane.c.b16.xlu0 %v1735_v28, 336 }
 0x5ff   :  { %v1529_v21 = vpop.permute.xlu1 %1528  ;;  %v1525_v31 = vpop.permute.xlu0 %1524 }
 0x600   :  { %2684 = vmatpush3.bf16.msra.mxu0 %v1525_v31 }
 0x601   :  { %1788 = vbcast.lane.c.b16.xlu1 %v1770_v20, 320  ;;  %1761 = vbcast.lane.c.b16.xlu0 %v1735_v28, 352 }
 0x602   :  { %2685 = vmatprep.subr.bf16.mxu0 %v3176_v0 }
 0x603   :  { %v1533_v30 = vpop.permute.xlu1 %1532  ;;  %v1541_v22 = vpop.permute.xlu0 %1540 }
 0x604   :  { %2686 = vmatpush3.bf16.msra.mxu0 %v1529_v21  ;;  %v3179_v21 = vmov 0  }
 0x605   :  { %1792 = vbcast.lane.c.b16.xlu1 %v1770_v20, 336  ;;  %1765 = vbcast.lane.c.b16.xlu0 %v1735_v28, 368 }
 0x606   :  { %2687 = vmatprep.subr.bf16.mxu0 %v3176_v0  ;;  %2862 = vset.pattern.permute.xlu0 %v3179_v21 }
 0x607   :  { %v1537_v23 = vpop.permute.xlu1 %1536  ;;  %v1549_v24 = vpop.permute.xlu0 %1548  ;;  %2863 = vset.pattern.permute.xlu1 %v3179_v21 }
 0x608   :  { %2688 = vmatpush3.bf16.msra.mxu0 %v1533_v30 }
 0x609   :  { %1796 = vbcast.lane.c.b16.xlu1 %v1770_v20, 352  ;;  %2689 = vmatprep.subr.bf16.mxu0 %v3176_v0 }
 0x60b   :  { %v1545_v25 = vpop.permute.xlu1 %1544  ;;  %v1563_v26 = vpop.permute.xlu0 %1562 }
 0x60c   :  { %2690 = vmatpush3.bf16.msra.mxu0 %v1537_v23  ;;  %v2918_v23 = vld [vmem:[#allocation8 + $0x28] sm:$0xff]  }
 0x60d   :  { %1800 = vbcast.lane.c.b16.xlu1 %v1770_v20, 368  ;;  %2691 = vmatprep.subr.bf16.mxu0 %v3176_v0 }
 0x60f   :  { %v1553_v27 = vpop.permute.xlu1 %1552  ;;  %v1571_v29 = vpop.permute.xlu0 %1570 }
 0x610   :  { %2692 = vmatpush3.bf16.msra.mxu0 %v1541_v22  ;;  %v2917_v22 = vld [vmem:[#allocation8 + $0x30] sm:$0xff]  }
 0x611   :  { %2693 = vmatprep.subr.bf16.mxu0 %v3176_v0 }
 0x613   :  { %v1567_v32 = vpop.permute.xlu1 %1566  ;;  %v1579_v33 = vpop.permute.xlu0 %1578 }
 0x614   :  { %2694 = vmatpush3.bf16.msra.mxu0 %v1545_v25 }
 0x615   :  { %2695 = vmatprep.subr.bf16.mxu0 %v3176_v0 }
 0x617   :  { %v1575_v34 = vpop.permute.xlu1 %1574  ;;  %v1587_v35 = vpop.permute.xlu0 %1586 }
 0x618   :  { %2696 = vmatpush3.bf16.msra.mxu0 %v1549_v24 }
 0x619   :  { %2697 = vmatprep.subr.bf16.mxu0 %v3176_v0 }
 0x61b   :  { %v1583_v37 = vpop.permute.xlu1 %1582  ;;  %v1598_v38 = vpop.permute.xlu0 %1597 }
 0x61c   :  { %2698 = vmatpush3.bf16.msra.mxu0 %v1553_v27  ;;  %2724 = vmatpush3.bf16.msra.mxu1 %v1598_v38 }
 0x61d   :  { %2703 = vmatprep.subr.bf16.mxu0 %v3176_v0  ;;  %2725 = vmatprep.subr.bf16.mxu1 %v3176_v0 }
 0x61f   :  { %v1591_v40 = vpop.permute.xlu1 %1590  ;;  %2700 = vmatmul.mubr.bf16.vlgmr.msra.gmra.mrb[28].mxu0 %v2912_v39  ;;  %v1602_v41 = vpop.permute.xlu0 %1601 }
 0x620   :  { %2704 = vmatpush3.bf16.msra.mxu0 %v1563_v26  ;;  %2726 = vmatpush3.bf16.msra.mxu1 %v1602_v41 }
 0x621   :  { %2705 = vmatprep.subr.bf16.mxu0 %v3176_v0  ;;  %2727 = vmatprep.subr.bf16.mxu1 %v3176_v0 }
 0x622   :  { %2719 = vmatprep.mubr.msk.bf16.mxu0 %vm3177_vm0, %v3176_v0 }
 0x623   :  { %v1633_v42 = vpop.permute.xlu1 %1632  ;;  %v1606_v43 = vpop.permute.xlu0 %1605 }
 0x624   :  { %2706 = vmatpush3.bf16.msra.mxu0 %v1567_v32  ;;  %2728 = vmatpush3.bf16.msra.mxu1 %v1606_v43 }
 0x625   :  { %2707 = vmatprep.subr.bf16.mxu0 %v3176_v0  ;;  %2729 = vmatprep.subr.bf16.mxu1 %v3176_v0 }
 0x627   :  { %v1637_v44 = vpop.permute.xlu1 %1636  ;;  %v1610_v45 = vpop.permute.xlu0 %1609 }
 0x628   :  { %2708 = vmatpush3.bf16.msra.mxu0 %v1571_v29  ;;  %2730 = vmatpush3.bf16.msra.mxu1 %v1610_v45 }
 0x629   :  { %2709 = vmatprep.subr.bf16.mxu0 %v3176_v0  ;;  %2731 = vmatprep.subr.bf16.mxu1 %v3176_v0 }
 0x62b   :  { %v1641_v46 = vpop.permute.xlu1 %1640  ;;  %v1614_v47 = vpop.permute.xlu0 %1613 }
 0x62c   :  { %2710 = vmatpush3.bf16.msra.mxu0 %v1575_v34  ;;  %2732 = vmatpush3.bf16.msra.mxu1 %v1614_v47 }
 0x62d   :  { %2711 = vmatprep.subr.bf16.mxu0 %v3176_v0  ;;  %2733 = vmatprep.subr.bf16.mxu1 %v3176_v0 }
 0x62f   :  { %v1645_v48 = vpop.permute.xlu1 %1644  ;;  %v1618_v49 = vpop.permute.xlu0 %1617 }
 0x630   :  { %2712 = vmatpush3.bf16.msra.mxu0 %v1579_v33  ;;  %2734 = vmatpush3.bf16.msra.mxu1 %v1618_v49  ;;  %v2919_v33 = vld [vmem:[#allocation8 + $0x38] sm:$0xff]  }
 0x631   :  { %2713 = vmatprep.subr.bf16.mxu0 %v3176_v0  ;;  %2735 = vmatprep.subr.bf16.mxu1 %v3176_v0 }
 0x633   :  { %v1649_v50 = vpop.permute.xlu1 %1648  ;;  %v1622_v51 = vpop.permute.xlu0 %1621 }
 0x634   :  { %2714 = vmatpush3.bf16.msra.mxu0 %v1583_v37  ;;  %2736 = vmatpush3.bf16.msra.mxu1 %v1622_v51 }
 0x635   :  { %2715 = vmatprep.subr.bf16.mxu0 %v3176_v0  ;;  %2737 = vmatprep.subr.bf16.mxu1 %v3176_v0 }
 0x637   :  { %v1653_v52 = vpop.permute.xlu1 %1652  ;;  %v1626_v53 = vpop.permute.xlu0 %1625 }
 0x638   :  { %2716 = vmatpush3.bf16.msra.mxu0 %v1587_v35  ;;  %2738 = vmatpush3.bf16.msra.mxu1 %v1626_v53 }
 0x639   :  { %2717 = vmatprep.subr.bf16.mxu0 %v3176_v0  ;;  %2763 = vmatprep.subr.bf16.mxu1 %v3176_v0 }
 0x63b   :  { %v1657_v55 = vpop.permute.xlu1 %1656  ;;  %2740 = vmatmul.mubr.bf16.vlgmr.msra.gmra.mrb[28].mxu1 %v2913_v54  ;;  %v1668_v56 = vpop.permute.xlu0 %1667 }
 0x63c   :  { %2718 = vmatpush3.bf16.msra.mxu0 %v1591_v40  ;;  %2764 = vmatpush3.bf16.msra.mxu1 %v1668_v56 }
 0x63d   :  { %2743 = vmatprep.subr.bf16.mxu0 %v3176_v0  ;;  %2765 = vmatprep.subr.bf16.mxu1 %v3176_v0 }
 0x63e   :  { %2779 = vmatprep.mubr.msk.bf16.mxu1 %vm3177_vm0, %v3176_v0 }
 0x63f   :  { %v1661_v58 = vpop.permute.xlu1 %1660  ;;  %2720 = vmatmul.mubr.bf16.vlgmr.msra.gmra.mrb[32].mxu0 %v2914_v57  ;;  %v1672_v59 = vpop.permute.xlu0 %1671 }
 0x640   :  { %2744 = vmatpush3.bf16.msra.mxu0 %v1633_v42  ;;  %2766 = vmatpush3.bf16.msra.mxu1 %v1672_v59 }
 0x641   :  { %2745 = vmatprep.subr.bf16.mxu0 %v3176_v0  ;;  %2767 = vmatprep.subr.bf16.mxu1 %v3176_v0 }
 0x642   :  { %2759 = vmatprep.mubr.msk.bf16.mxu0 %vm3177_vm0, %v3176_v0 }
 0x643   :  { %v1703_v60 = vpop.permute.xlu1 %1702  ;;  %v1676_v61 = vpop.permute.xlu0 %1675 }
 0x644   :  { %2746 = vmatpush3.bf16.msra.mxu0 %v1637_v44  ;;  %2768 = vmatpush3.bf16.msra.mxu1 %v1676_v61 }
 0x645   :  { %2747 = vmatprep.subr.bf16.mxu0 %v3176_v0  ;;  %2769 = vmatprep.subr.bf16.mxu1 %v3176_v0 }
 0x647   :  { %v1707_v62 = vpop.permute.xlu1 %1706  ;;  %v1680_v63 = vpop.permute.xlu0 %1679 }
 0x648   :  { %2748 = vmatpush3.bf16.msra.mxu0 %v1641_v46  ;;  %2770 = vmatpush3.bf16.msra.mxu1 %v1680_v63 }
 0x649   :  { %2749 = vmatprep.subr.bf16.mxu0 %v3176_v0  ;;  %2771 = vmatprep.subr.bf16.mxu1 %v3176_v0 }
 0x64b   :  { %v1684_v1 = vpop.permute.xlu0 %1683  ;;  %v1711_v2 = vpop.permute.xlu1 %1710 }
 0x64c   :  { %2750 = vmatpush3.bf16.msra.mxu0 %v1645_v48  ;;  %2772 = vmatpush3.bf16.msra.mxu1 %v1684_v1 }
 0x64d   :  { %2751 = vmatprep.subr.bf16.mxu0 %v3176_v0  ;;  %2773 = vmatprep.subr.bf16.mxu1 %v3176_v0 }
 0x64f   :  { %v1688_v3 = vpop.permute.xlu0 %1687  ;;  %v1715_v4 = vpop.permute.xlu1 %1714 }
 0x650   :  { %2752 = vmatpush3.bf16.msra.mxu0 %v1649_v50  ;;  %2774 = vmatpush3.bf16.msra.mxu1 %v1688_v3 }
 0x651   :  { %2753 = vmatprep.subr.bf16.mxu0 %v3176_v0  ;;  %2775 = vmatprep.subr.bf16.mxu1 %v3176_v0 }
 0x653   :  { %v1692_v5 = vpop.permute.xlu0 %1691  ;;  %v1719_v9 = vpop.permute.xlu1 %1718 }
 0x654   :  { %2754 = vmatpush3.bf16.msra.mxu0 %v1653_v52  ;;  %2776 = vmatpush3.bf16.msra.mxu1 %v1692_v5 }
 0x655   :  { %2755 = vmatprep.subr.bf16.mxu0 %v3176_v0  ;;  %2777 = vmatprep.subr.bf16.mxu1 %v3176_v0 }
 0x657   :  { %v1696_v7 = vpop.permute.xlu0 %1695  ;;  %v1723_v18 = vpop.permute.xlu1 %1722 }
 0x658   :  { %2756 = vmatpush3.bf16.msra.mxu0 %v1657_v55  ;;  %2778 = vmatpush3.bf16.msra.mxu1 %v1696_v7 }
 0x659   :  { %2757 = vmatprep.subr.bf16.mxu0 %v3176_v0  ;;  %2803 = vmatprep.subr.bf16.mxu1 %v3176_v0 }
 0x65b   :  { %2780 = vmatmul.mubr.bf16.vlgmr.msra.gmra.mrb[32].mxu1 %v2915_v8  ;;  %v1738_v10 = vpop.permute.xlu0 %1737  ;;  %v1727_v6 = vpop.permute.xlu1 %1726 }
 0x65c   :  { %2758 = vmatpush3.bf16.msra.mxu0 %v1661_v58  ;;  %2804 = vmatpush3.bf16.msra.mxu1 %v1738_v10 }
 0x65d   :  { %2783 = vmatprep.subr.bf16.mxu0 %v3176_v0  ;;  %2805 = vmatprep.subr.bf16.mxu1 %v3176_v0 }
 0x65e   :  { %2819 = vmatprep.mubr.msk.bf16.mxu1 %vm3177_vm0, %v3176_v0 }
 0x65f   :  { %2760 = vmatmul.mubr.bf16.vlgmr.msra.gmra.mrb[36].mxu0 %v2916_v11  ;;  %v1742_v12 = vpop.permute.xlu0 %1741  ;;  %v1731_v16 = vpop.permute.xlu1 %1730 }
 0x660   :  { %2784 = vmatpush3.bf16.msra.mxu0 %v1703_v60  ;;  %2806 = vmatpush3.bf16.msra.mxu1 %v1742_v12 }
 0x661   :  { %2785 = vmatprep.subr.bf16.mxu0 %v3176_v0  ;;  %2807 = vmatprep.subr.bf16.mxu1 %v3176_v0 }
 0x662   :  { %2799 = vmatprep.mubr.msk.bf16.mxu0 %vm3177_vm0, %v3176_v0 }
 0x663   :  { %v1746_v14 = vpop.permute.xlu0 %1745  ;;  %v1773_v28 = vpop.permute.xlu1 %1772 }
 0x664   :  { %2786 = vmatpush3.bf16.msra.mxu0 %v1707_v62  ;;  %2808 = vmatpush3.bf16.msra.mxu1 %v1746_v14 }
 0x665   :  { %2787 = vmatprep.subr.bf16.mxu0 %v3176_v0  ;;  %2809 = vmatprep.subr.bf16.mxu1 %v3176_v0 }
 0x667   :  { %v1750_v36 = vpop.permute.xlu0 %1749  ;;  %v1777_v31 = vpop.permute.xlu1 %1776 }
 0x668   :  { %2788 = vmatpush3.bf16.msra.mxu0 %v1711_v2  ;;  %2810 = vmatpush3.bf16.msra.mxu1 %v1750_v36 }
 0x669   :  { %2789 = vmatprep.subr.bf16.mxu0 %v3176_v0  ;;  %2811 = vmatprep.subr.bf16.mxu1 %v3176_v0 }
 0x66b   :  { %v1754_v17 = vpop.permute.xlu0 %1753  ;;  %v1781_v24 = vpop.permute.xlu1 %1780 }
 0x66c   :  { %2790 = vmatpush3.bf16.msra.mxu0 %v1715_v4  ;;  %2812 = vmatpush3.bf16.msra.mxu1 %v1754_v17 }
 0x66d   :  { %2791 = vmatprep.subr.bf16.mxu0 %v3176_v0  ;;  %2813 = vmatprep.subr.bf16.mxu1 %v3176_v0 }
 0x66f   :  { %v1758_v19 = vpop.permute.xlu0 %1757  ;;  %v1785_v25 = vpop.permute.xlu1 %1784 }
 0x670   :  { %2792 = vmatpush3.bf16.msra.mxu0 %v1719_v9  ;;  %2814 = vmatpush3.bf16.msra.mxu1 %v1758_v19 }
 0x671   :  { %2793 = vmatprep.subr.bf16.mxu0 %v3176_v0  ;;  %2815 = vmatprep.subr.bf16.mxu1 %v3176_v0 }
 0x673   :  { %v1762_v20 = vpop.permute.xlu0 %1761  ;;  %v1789_v26 = vpop.permute.xlu1 %1788 }
 0x674   :  { %2794 = vmatpush3.bf16.msra.mxu0 %v1723_v18  ;;  %2816 = vmatpush3.bf16.msra.mxu1 %v1762_v20 }
 0x675   :  { %2795 = vmatprep.subr.bf16.mxu0 %v3176_v0  ;;  %2817 = vmatprep.subr.bf16.mxu1 %v3176_v0 }
 0x677   :  { %v1766_v30 = vpop.permute.xlu0 %1765  ;;  %v1793_v27 = vpop.permute.xlu1 %1792 }
 0x678   :  { %2796 = vmatpush3.bf16.msra.mxu0 %v1727_v6  ;;  %2818 = vmatpush3.bf16.msra.mxu1 %v1766_v30 }
 0x679   :  { %2797 = vmatprep.subr.bf16.mxu0 %v3176_v0 }
 0x67b   :  { %2820 = vmatmul.mubr.bf16.vlgmr.msra.gmra.mrb[36].mxu1 %v2917_v22  ;;  %v1797_v29 = vpop.permute.xlu1 %1796 }
 0x67c   :  { %2798 = vmatpush3.bf16.msra.mxu0 %v1731_v16 }
 0x67d   :  { %2823 = vmatprep.subr.bf16.mxu0 %v3176_v0 }
 0x67f   :  { %2800 = vmatmul.mubr.bf16.vlgmr.msra.gmra.mrb[40].mxu0 %v2918_v23  ;;  %v1801_v32 = vpop.permute.xlu1 %1800 }
 0x680   :  { %2824 = vmatpush3.bf16.msra.mxu0 %v1773_v28  ;;  %2839 = vmatprep.mubr.msk.bf16.mxu0 %vm3177_vm0, %v3176_v0 }
 0x681   :  { %2825 = vmatprep.subr.bf16.mxu0 %v3176_v0 }
 0x684   :  { %2826 = vmatpush3.bf16.msra.mxu0 %v1777_v31 }
 0x685   :  { %2827 = vmatprep.subr.bf16.mxu0 %v3176_v0 }
 0x688   :  { %2828 = vmatpush3.bf16.msra.mxu0 %v1781_v24 }
 0x689   :  { %2829 = vmatprep.subr.bf16.mxu0 %v3176_v0 }
 0x68c   :  { %2830 = vmatpush3.bf16.msra.mxu0 %v1785_v25 }
 0x68d   :  { %2831 = vmatprep.subr.bf16.mxu0 %v3176_v0 }
 0x690   :  { %2832 = vmatpush3.bf16.msra.mxu0 %v1789_v26 }
 0x691   :  { %2833 = vmatprep.subr.bf16.mxu0 %v3176_v0 }
 0x694   :  { %2834 = vmatpush3.bf16.msra.mxu0 %v1793_v27 }
 0x695   :  { %2835 = vmatprep.subr.bf16.mxu0 %v3176_v0 }
 0x698   :  { %2836 = vmatpush3.bf16.msra.mxu0 %v1797_v29 }
 0x699   :  { %2837 = vmatprep.subr.bf16.mxu0 %v3176_v0 }
 0x69c   :  { %2838 = vmatpush3.bf16.msra.mxu0 %v1801_v32 }
 0x69f   :  { %2840 = vmatmul.mubr.bf16.vlgmr.msra.gmra.mrb[44].mxu0 %v2919_v33 }
 0x6f2   :  { %v1842_v34 = vpop.f32.mrb[28].mxu0 }
 0x6f3   :  { %v2701_v35 = vpop.f32.mrb[29].mxu0  ;;  %2195 = vperm.xlu0 %2862, %v1842_v34  }
 0x6f4   :  { %v1845_v37 = vpop.f32.mrb[30].mxu0 }
 0x6f5   :  { %v2702_v38 = vpop.f32.mrb[31].mxu0 }
 0x70e   :  { %v1936_v39 = vpop.f32.mrb[28].mxu1 }
 0x70f   :  { %2207 = vperm.xlu1 %2863, %v1936_v39   ;;  %v2741_v40 = vpop.f32.mrb[29].mxu1 }
 0x710   :  { %v1939_v41 = vpop.f32.mrb[30].mxu1 }
 0x711   :  { %2210 = vperm.xlu0 %2862, %v1939_v41   ;;  %v2742_v42 = vpop.f32.mrb[31].mxu1 }
 0x712   :  { %v1889_v43 = vpop.f32.mrb[32].mxu0 }
 0x713   :  { %2198 = vperm.xlu1 %2863, %v1845_v37   ;;  %v2721_v44 = vpop.f32.mrb[33].mxu0 }
 0x714   :  { %v1892_v45 = vpop.f32.mrb[34].mxu0 }
 0x715   :  { %2204 = vperm.xlu0 %2862, %v1892_v45   ;;  %v2722_v0 = vpop.f32.mrb[35].mxu0 }
 0x717   :  { %2201 = vperm.xlu1 %2863, %v1889_v43  }
 0x72e   :  { %v2030_v46 = vpop.f32.mrb[32].mxu1 }
 0x72f   :  { %v2781_v47 = vpop.f32.mrb[33].mxu1  ;;  %2219 = vperm.xlu1 %2863, %v2030_v46  }
 0x730   :  { %v2033_v48 = vpop.f32.mrb[34].mxu1 }
 0x731   :  { %2222 = vperm.xlu0 %2862, %v2033_v48   ;;  %v2782_v49 = vpop.f32.mrb[35].mxu1 }
 0x732   :  { %v1983_v50 = vpop.f32.mrb[36].mxu0 }
 0x733   :  { %v2761_v51 = vpop.f32.mrb[37].mxu0  ;;  %2213 = vperm.xlu1 %2863, %v1983_v50  }
 0x734   :  { %v1986_v52 = vpop.f32.mrb[38].mxu0 }
 0x735   :  { %2216 = vperm.xlu0 %2862, %v1986_v52   ;;  %v2762_v53 = vpop.f32.mrb[39].mxu0 }
 0x74e   :  { %v2124_v54 = vpop.f32.mrb[36].mxu1 }
 0x74f   :  { %v2821_v55 = vpop.f32.mrb[37].mxu1  ;;  %2231 = vperm.xlu1 %2863, %v2124_v54  }
 0x750   :  { %v2127_v56 = vpop.f32.mrb[38].mxu1 }
 0x751   :  { %2234 = vperm.xlu0 %2862, %v2127_v56   ;;  %v2822_v57 = vpop.f32.mrb[39].mxu1 }
 0x752   :  { %v2077_v58 = vpop.f32.mrb[40].mxu0 }
 0x753   :  { %v2801_v59 = vpop.f32.mrb[41].mxu0  ;;  %2225 = vperm.xlu1 %2863, %v2077_v58  }
 0x754   :  { %v2080_v60 = vpop.f32.mrb[42].mxu0 }
 0x755   :  { %2228 = vperm.xlu0 %2862, %v2080_v60   ;;  %v2802_v61 = vpop.f32.mrb[43].mxu0 }
 0x772   :  { %v2171_v62 = vpop.f32.mrb[44].mxu0  ;;  %v2196_v4 = vpop.permute.xlu0 %2195 }
 0x773   :  { %2237 = vperm.xlu1 %2863, %v2171_v62   ;;  %v2841_v63 = vpop.f32.mrb[45].mxu0  ;;  %v2245_v20 = vrot.slane %v2196_v4, %v3416_v15 }
 0x774   :  { %v2174_v1 = vpop.f32.mrb[46].mxu0 }
 0x775   :  { %2240 = vperm.xlu0 %2862, %v2174_v1   ;;  %v2842_v2 = vpop.f32.mrb[47].mxu0 }
 0x78e   :  { %v2208_v3 = vpop.permute.xlu1 %2207 }
 0x78f   :  { %v2263_v19 = vrot.slane %v2208_v3, %v3416_v15 }
 0x790   :  { %v2211_v5 = vpop.permute.xlu0 %2210 }
 0x791   :  { %v2267_v28 = vrot.slane %v2211_v5, %v3413_v13 }
 0x792   :  { %v2199_v7 = vpop.permute.xlu1 %2198 }
 0x793   :  { %v2249_v16 = vrot.slane %v2199_v7, %v3413_v13  ;;  %v2268_v25 = vsel %vm708_vm1, %v2267_v28, %v2263_v19 }
 0x794   :  { %v2205_v8 = vpop.permute.xlu0 %2204 }
 0x795   :  { %v2258_v17 = vrot.slane %v2205_v8, %v3413_v13  ;;  %v2250_v24 = vsel %vm708_vm1, %v2249_v16, %v2245_v20 }
 0x796   :  { %v2202_v9 = vpop.permute.xlu1 %2201 }
 0x797   :  { %v2254_v36 = vrot.slane %v2202_v9, %v3416_v15 }
 0x799   :  { %v2259_v21 = vsel %vm708_vm1, %v2258_v17, %v2254_v36 }
 0x79a   :  { %v2314_v26 = vsel %vm773_vm2, %v2259_v21, %v2250_v24 }
 0x79b   :  { %v2315_v35 = vsel %vm775_vm3, %v2268_v25, %v2314_v26 }
 0x7ae   :  { %v2220_v10 = vpop.permute.xlu1 %2219 }
 0x7af   :  { %v2281_v27 = vrot.slane %v2220_v10, %v3416_v15 }
 0x7b0   :  { %v2223_v11 = vpop.permute.xlu0 %2222 }
 0x7b1   :  { %v2285_v29 = vrot.slane %v2223_v11, %v3413_v13 }
 0x7b2   :  { %v2214_v18 = vpop.permute.xlu1 %2213 }
 0x7b3   :  { %v2272_v31 = vrot.slane %v2214_v18, %v3416_v15  ;;  %v2286_v37 = vsel %vm708_vm1, %v2285_v29, %v2281_v27 }
 0x7b4   :  { %v2217_v12 = vpop.permute.xlu0 %2216 }
 0x7b5   :  { %v2276_v30 = vrot.slane %v2217_v12, %v3413_v13 }
 0x7b7   :  { %v2277_v32 = vsel %vm708_vm1, %v2276_v30, %v2272_v31 }
 0x7b8   :  { %v2316_v38 = vsel %vm777_vm4, %v2277_v32, %v2315_v35 }
 0x7b9   :  { %v2317_v43 = vsel %vm779_vm5, %v2286_v37, %v2316_v38 }
 0x7ce   :  { %v2232_v14 = vpop.permute.xlu1 %2231 }
 0x7cf   :  { %v2299_v39 = vrot.slane %v2232_v14, %v3416_v15 }
 0x7d0   :  { %v2235_v6 = vpop.permute.xlu0 %2234 }
 0x7d1   :  { %v2303_v40 = vrot.slane %v2235_v6, %v3413_v13 }
 0x7d2   :  { %v2226_v22 = vpop.permute.xlu1 %2225 }
 0x7d3   :  { %v2290_v33 = vrot.slane %v2226_v22, %v3416_v15  ;;  %v2304_v44 = vsel %vm708_vm1, %v2303_v40, %v2299_v39 }
 0x7d4   :  { %v2229_v23 = vpop.permute.xlu0 %2228 }
 0x7d5   :  { %v2294_v34 = vrot.slane %v2229_v23, %v3413_v13 }
 0x7d7   :  { %v2295_v41 = vsel %vm708_vm1, %v2294_v34, %v2290_v33 }
 0x7d8   :  { %v2318_v45 = vsel %vm781_vm6, %v2295_v41, %v2317_v43 }
 0x7d9   :  { %v2319_v49 = vsel %vm783_vm7, %v2304_v44, %v2318_v45 }
 0x7f2   :  { %v2238_v42 = vpop.permute.xlu1 %2237 }
 0x7f3   :  { %v2308_v46 = vrot.slane %v2238_v42, %v3416_v15 }
 0x7f4   :  { %v2241_v0 = vpop.permute.xlu0 %2240 }
 0x7f5   :  { %v2312_v47 = vrot.slane %v2241_v0, %v3413_v13 }
 0x7f7   :  { %v2313_v48 = vsel %vm708_vm1, %v2312_v47, %v2308_v46 }
 0x7f8   :  { %v2320_v50 = vsel %vm785_vm8, %v2313_v48, %v2319_v49 }
 0x7f9   :  { %v2322_v51 = vsel %vm789_vm10, %v2320_v50, 0.0 }
 0x7fa   :  { %2323 = vst [vmem:[#allocation16] sm:$0xff] %v2322_v51 }
 0x7fb   :  { %3143 = shalt.err (!%p3140_p12)
}
 0x7fc   :  { %s3144_s16 = scalar_lea.hbm %s3654_s9, 128 }
 0x7fd   :  { %p3145_p13 = scmp.ne.s32.totalorder %s3654_s9, %s3144_s16  ;;  %p3148_p0 = scmp.lt.u32.totalorder %s3144_s16, %s3654_s9 }
 0x7ff   :  { %p3150_p1 = pnand %p3148_p0, %p3145_p13 }
 0x801   :  { %3153 = shalt.err (!%p3150_p1)
}
 0x802   :  { %2333 = dma.vmem_to_hbm [thread:$0]  %s2331_s20, 128, %s3654_s9, [#allocation4]  }
 0x803   :  { %3164 = dma.done.wait [#allocation4], 128  }
 0x804   :  { %3165 = vsyncadd [#allocation4], 4294967168 }
 0x805   :  { %2337 = vsyncpa [#allocation3], 1 }
 0x806   :  { %2338 = vsyncpa [#allocation6], 1 }
 0x807   :  { %2339 = vsyncpa [#allocation9], 1 }
 0x808   :  { %2340 = vsyncpa [#allocation12], 1 }
 0x809   :  { %2341 = vsyncpa [#allocation15], 1 }
 0x80a   :  { %2342 = vsyncpa [#allocation4], 1 }

</bundles_post_ra>
